<compile_context>
chip_gen: v5e
topology: v5e:2x2
jax: 0.10.0
libtpu: 0.0.40
codegen_flags: <defaults>
</compile_context>

<pallas_src>
import jax
import jax.numpy as jnp
import numpy as np
from jax.experimental import pallas as pl
from jax.experimental.pallas import tpu as pltpu


def _residual_basic_kernel(x_ref, w1_ref, b1_ref, w2_ref, b2_ref, o_ref, pad_ref):
    """One block of Bt images per grid step.

    x_ref  : (Bt, H, W, C)      input images, fp32 (C already padded to a 128-multiple)
    w1_ref : (9, C, C)          conv1 weights, tap-major (ky*3+kx), MXU dtype
    b1_ref : (1, C)             conv1 bias, fp32
    w2_ref : (9, C, C)          conv2 weights
    b2_ref : (1, C)             conv2 bias, fp32
    o_ref  : (Bt*H*W, C)        output rows in matmul layout (lane-dense, unmasked store)
    pad_ref: (Bt, H+2, W+2, C)  shared zero-padded activation scratch, MXU dtype
    """
    Bt, H, W, C = x_ref.shape
    M = Bt * H * W
    mm_dtype = pad_ref.dtype

    def conv3x3(w_ref, bias):
        # sum_{tap} pad[:, ky:ky+H, kx:kx+W, :] @ w[tap]  -- 9 MXU matmuls, fp32 accum.
        acc = None
        for t in range(9):
            ky, kx = divmod(t, 3)
            tap = pad_ref[:, ky:ky + H, kx:kx + W, :].reshape(M, C).astype(mm_dtype)
            part = jnp.dot(tap, w_ref[t], preferred_element_type=jnp.float32)
            acc = part if acc is None else acc + part
        return acc + bias                                       # (M, C) fp32

    # Zero the padded scratch (borders must be zero; interior is overwritten below).
    pad_ref[...] = jnp.zeros_like(pad_ref)

    x = x_ref[...]                                              # (Bt, H, W, C)
    pad_ref[:, 1:H + 1, 1:W + 1, :] = x.astype(mm_dtype)

    # ---- conv1 + bias + ReLU ----
    y1 = jnp.maximum(conv3x3(w1_ref, b1_ref[...]), 0.0)         # (M, C) fp32

    # ---- conv2 + bias, reusing the same padded scratch (borders still zero) ----
    pad_ref[:, 1:H + 1, 1:W + 1, :] = y1.reshape(Bt, H, W, C).astype(mm_dtype)
    y2 = conv3x3(w2_ref, b2_ref[...])                           # (M, C) fp32

    # ---- residual add (identity == unpadded x) + ReLU; single lane-dense store ----
    out = jnp.maximum(y2 + x.reshape(M, C).astype(jnp.float32), 0.0)
    o_ref[...] = out.astype(o_ref.dtype)


def _round_up(v, m):
    return (v + m - 1) // m * m


def _pick_vmem_limit_bytes():
    """48 MiB on 64-MiB-VMEM parts (v7x-class), 96 MiB on 128-MiB parts (v5e/v6e)."""
    try:
        cap = pltpu.get_tpu_info().vmem_capacity_bytes
    except Exception:
        cap = None
    if cap is not None and cap > 96 * 1024 * 1024:
        return 96 * 1024 * 1024
    return 48 * 1024 * 1024


def _pick_block_n(N, H, W, Cp, vmem_limit_bytes):
    """Images per grid step: amortize the ~0.35us/step pipeline overhead, stay inside the
    VMEM budget, and keep >= 2 grid steps so the batch axis can split across v7x's 2 TCs."""
    per_img = H * W * Cp * 4 * 8          # ~8 fp32-sized live copies of one activation
    budget = max(vmem_limit_bytes // 3, per_img)
    bt = int(max(1, min(N, budget // per_img)))
    if N >= 2:
        bt = min(bt, N // 2)
    bt = max(bt, 1)
    while N % bt:                          # keep the grid exact (no ragged last block)
        bt -= 1
    return bt


def residual_basic_pallas(x_nhwc, w1, b1, w2, b2, *,
                          matmul_dtype=jnp.bfloat16, block_n=None):
    """x_nhwc: (N, H, W, C); w*: (3, 3, C, C) HWIO; b*: (C,).

    Residual_Basic with stride=1 / downsample=None (hence C_in == C_out).
    matmul_dtype: MXU operand dtype (default bf16 = fast path on v5e/v6e/v7x);
    accumulation / bias / ReLU / residual stay fp32.
    """
    N, H, W, C = x_nhwc.shape
    assert w1.shape == (3, 3, C, C) and w2.shape == (3, 3, C, C) and \
        b1.shape == (C,) and b2.shape == (C,), \
        "Residual_Basic kernel assumes k=3, stride=1, padding=1, C_in == C_out (downsample=None)"

    # Lane-dense layout: pad channels to a multiple of 128. Padded channels are zero in
    # x / weights / bias so they remain exactly zero through both convs and the residual.
    Cp = _round_up(C, 128)
    pc = Cp - C
    x_p = jnp.pad(x_nhwc, ((0, 0), (0, 0), (0, 0), (0, pc)))
    w1m = jnp.pad(w1, ((0, 0), (0, 0), (0, pc), (0, pc))).reshape(9, Cp, Cp).astype(matmul_dtype)
    w2m = jnp.pad(w2, ((0, 0), (0, 0), (0, pc), (0, pc))).reshape(9, Cp, Cp).astype(matmul_dtype)
    b1m = jnp.pad(b1, ((0, pc),)).reshape(1, Cp).astype(jnp.float32)
    b2m = jnp.pad(b2, ((0, pc),)).reshape(1, Cp).astype(jnp.float32)

    vmem_limit = _pick_vmem_limit_bytes()
    bt = block_n if block_n is not None else _pick_block_n(N, H, W, Cp, vmem_limit)
    assert N % bt == 0

    out_flat = pl.pallas_call(
        _residual_basic_kernel,
        out_shape=jax.ShapeDtypeStruct((N * H * W, Cp), x_nhwc.dtype),
        grid=(N // bt,),
        in_specs=[
            pl.BlockSpec((bt, H, W, Cp), lambda n: (n, 0, 0, 0)),
            # Constant index maps: weight/bias re-fetch is elided after the first step.
            pl.BlockSpec((9, Cp, Cp), lambda n: (0, 0, 0)),
            pl.BlockSpec((1, Cp), lambda n: (0, 0)),
            pl.BlockSpec((9, Cp, Cp), lambda n: (0, 0, 0)),
            pl.BlockSpec((1, Cp), lambda n: (0, 0)),
        ],
        out_specs=pl.BlockSpec((bt * H * W, Cp), lambda n: (n, 0)),
        scratch_shapes=[pltpu.VMEM((bt, H + 2, W + 2, Cp), matmul_dtype)],
        compiler_params=pltpu.CompilerParams(
            dimension_semantics=("parallel",),   # shard the batch across v7x's 2 TCs
            vmem_limit_bytes=vmem_limit,
        ),
    )(x_p, w1m, b1m, w2m, b2m)

    # Free HBM-level relayout back to NHWC + drop the channel padding.
    return out_flat.reshape(N, H, W, Cp)[..., :C]


def residual_basic_reference(x_nhwc, w1, b1, w2, b2):
    """Pure-JAX reference (NHWC / HWIO)."""
    dn = ("NHWC", "HWIO", "NHWC")
    y1 = jax.lax.conv_general_dilated(x_nhwc, w1, (1, 1), "SAME",
                                      dimension_numbers=dn) + b1
    y1 = jnp.maximum(y1, 0.0)
    y2 = jax.lax.conv_general_dilated(y1, w2, (1, 1), "SAME",
                                      dimension_numbers=dn) + b2
    return jnp.maximum(y2 + x_nhwc, 0.0)


if __name__ == "__main__":
    # batch=2, channels=4 (in == out, downsample=None), spatial 16x16, k=3, stride=1, pad=1.
    N, C, Himg, Wimg = 2, 4, 16, 16

    key = jax.random.PRNGKey(0)
    kx_, kw1, kb1, kw2, kb2 = jax.random.split(key, 5)

    # Input built in PyTorch layout (NCHW), transposed to kernel layout NHWC.
    x_nchw = jax.random.normal(kx_, (N, C, Himg, Wimg), dtype=jnp.float32)
    x_nhwc = jnp.transpose(x_nchw, (0, 2, 3, 1))

    # Parameters (HWIO), matching Conv2d(C, C, 3, bias=True) shapes.
    w1 = 0.1 * jax.random.normal(kw1, (3, 3, C, C), dtype=jnp.float32)
    b1 = 0.1 * jax.random.normal(kb1, (C,), dtype=jnp.float32)
    w2 = 0.1 * jax.random.normal(kw2, (3, 3, C, C), dtype=jnp.float32)
    b2 = 0.1 * jax.random.normal(kb2, (C,), dtype=jnp.float32)

    ref = residual_basic_reference(x_nhwc, w1, b1, w2, b2)

    # fp32 MXU operands: tight check against the fp32 reference.
    out_f32 = jax.block_until_ready(
        residual_basic_pallas(x_nhwc, w1, b1, w2, b2, matmul_dtype=jnp.float32))
    np.testing.assert_allclose(np.asarray(out_f32), np.asarray(ref), rtol=1e-4, atol=1e-4)

    # Default bf16 MXU operands (fast path on v5e/v6e/v7x), fp32 accumulation.
    out_bf16 = jax.block_until_ready(residual_basic_pallas(x_nhwc, w1, b1, w2, b2))
    np.testing.assert_allclose(np.asarray(out_bf16), np.asarray(ref), rtol=5e-2, atol=5e-2)

    print("KERNEL_OK")
</pallas_src>

<mosaic_0001>
module attributes {stable_mosaic.version = 11 : i64} {
  func.func @_residual_basic_kernel(%arg0: i32, %arg1: memref<1x16x16x128xf32, #tpu.memory_space<vmem>>, %arg2: memref<9x128x128xf32, #tpu.memory_space<vmem>>, %arg3: memref<1x128xf32, #tpu.memory_space<vmem>>, %arg4: memref<9x128x128xf32, #tpu.memory_space<vmem>>, %arg5: memref<1x128xf32, #tpu.memory_space<vmem>>, %arg6: memref<256x128xf32, #tpu.memory_space<vmem>>, %arg7: memref<1x18x18x128xf32, #tpu.memory_space<vmem>>) attributes {dimension_semantics = [#tpu.dimension_semantics<parallel>], iteration_bounds = array<i64: 2>, scalar_prefetch = 0 : i64, scratch_operands = 1 : i64, tpu.core_type = #tpu.core_type<tc>, window_params = [{transform_indices = @transform_0, window_bounds = array<i64: 1, 16, 16, 128>}, {pipeline_mode = #tpu.pipeline_mode<synchronous>, transform_indices = @transform_1, window_bounds = array<i64: 9, 128, 128>}, {pipeline_mode = #tpu.pipeline_mode<synchronous>, transform_indices = @transform_2, window_bounds = array<i64: 1, 128>}, {pipeline_mode = #tpu.pipeline_mode<synchronous>, transform_indices = @transform_3, window_bounds = array<i64: 9, 128, 128>}, {pipeline_mode = #tpu.pipeline_mode<synchronous>, transform_indices = @transform_4, window_bounds = array<i64: 1, 128>}, {transform_indices = @transform_5, window_bounds = array<i64: 256, 128>}]} {
    %cst = arith.constant 0.000000e+00 : f32
    %0 = vector.broadcast %cst : f32 to vector<1x18x18x128xf32>
    %c0 = arith.constant 0 : index
    %c0_0 = arith.constant 0 : index
    %c0_1 = arith.constant 0 : index
    %c0_2 = arith.constant 0 : index
    %1 = vector.load %arg7[%c0, %c0_0, %c0_1, %c0_2] : memref<1x18x18x128xf32, #tpu.memory_space<vmem>>, vector<1x18x18x128xf32>
    tpu.vector_store %arg7[%c0, %c0_0, %c0_1, %c0_2], %0 {strides = array<i32>} : memref<1x18x18x128xf32, #tpu.memory_space<vmem>>, vector<1x18x18x128xf32>,
    %c0_3 = arith.constant 0 : index
    %c0_4 = arith.constant 0 : index
    %c0_5 = arith.constant 0 : index
    %c0_6 = arith.constant 0 : index
    %2 = vector.load %arg1[%c0_3, %c0_4, %c0_5, %c0_6] : memref<1x16x16x128xf32, #tpu.memory_space<vmem>>, vector<1x16x16x128xf32>
    %c0_7 = arith.constant 0 : index
    %c1 = arith.constant 1 : index
    %c1_8 = arith.constant 1 : index
    %c0_9 = arith.constant 0 : index
    %3 = vector.load %arg7[%c0_7, %c1, %c1_8, %c0_9] : memref<1x18x18x128xf32, #tpu.memory_space<vmem>>, vector<1x16x16x128xf32>
    tpu.vector_store %arg7[%c0_7, %c1, %c1_8, %c0_9], %2 {strides = array<i32>} : memref<1x18x18x128xf32, #tpu.memory_space<vmem>>, vector<1x16x16x128xf32>,
    %c0_10 = arith.constant 0 : index
    %c0_11 = arith.constant 0 : index
    %4 = vector.load %arg3[%c0_10, %c0_11] : memref<1x128xf32, #tpu.memory_space<vmem>>, vector<1x128xf32>
    %c0_12 = arith.constant 0 : index
    %c0_13 = arith.constant 0 : index
    %c0_14 = arith.constant 0 : index
    %c0_15 = arith.constant 0 : index
    %5 = vector.load %arg7[%c0_12, %c0_13, %c0_14, %c0_15] : memref<1x18x18x128xf32, #tpu.memory_space<vmem>>, vector<1x16x16x128xf32>
    %6 = vector.shape_cast %5 : vector<1x16x16x128xf32> to vector<256x128xf32>
    %c0_16 = arith.constant 0 : index
    %c0_17 = arith.constant 0 : index
    %c0_18 = arith.constant 0 : index
    %7 = vector.load %arg2[%c0_16, %c0_17, %c0_18] : memref<9x128x128xf32, #tpu.memory_space<vmem>>, vector<1x128x128xf32>
    %8 = vector.shape_cast %7 : vector<1x128x128xf32> to vector<128x128xf32>
    %cst_19 = arith.constant dense<0.000000e+00> : vector<256x128xf32>
    %9 = tpu.matmul %6, %8, %cst_19 {dimension_numbers = #tpu.dot_dimension_numbers<[1], [0], [0], [1], [0, 0, 1, 1], [], []>} : vector<256x128xf32>, vector<128x128xf32>, vector<256x128xf32> -> vector<256x128xf32>
    %c0_20 = arith.constant 0 : index
    %c0_21 = arith.constant 0 : index
    %c1_22 = arith.constant 1 : index
    %c0_23 = arith.constant 0 : index
    %10 = vector.load %arg7[%c0_20, %c0_21, %c1_22, %c0_23] : memref<1x18x18x128xf32, #tpu.memory_space<vmem>>, vector<1x16x16x128xf32>
    %11 = vector.shape_cast %10 : vector<1x16x16x128xf32> to vector<256x128xf32>
    %c1_24 = arith.constant 1 : index
    %c0_25 = arith.constant 0 : index
    %c0_26 = arith.constant 0 : index
    %12 = vector.load %arg2[%c1_24, %c0_25, %c0_26] : memref<9x128x128xf32, #tpu.memory_space<vmem>>, vector<1x128x128xf32>
    %13 = vector.shape_cast %12 : vector<1x128x128xf32> to vector<128x128xf32>
    %cst_27 = arith.constant dense<0.000000e+00> : vector<256x128xf32>
    %14 = tpu.matmul %11, %13, %cst_27 {dimension_numbers = #tpu.dot_dimension_numbers<[1], [0], [0], [1], [0, 0, 1, 1], [], []>} : vector<256x128xf32>, vector<128x128xf32>, vector<256x128xf32> -> vector<256x128xf32>
    %15 = arith.addf %9, %14 : vector<256x128xf32>
    %c0_28 = arith.constant 0 : index
    %c0_29 = arith.constant 0 : index
    %c2 = arith.constant 2 : index
    %c0_30 = arith.constant 0 : index
    %16 = vector.load %arg7[%c0_28, %c0_29, %c2, %c0_30] : memref<1x18x18x128xf32, #tpu.memory_space<vmem>>, vector<1x16x16x128xf32>
    %17 = vector.shape_cast %16 : vector<1x16x16x128xf32> to vector<256x128xf32>
    %c2_31 = arith.constant 2 : index
    %c0_32 = arith.constant 0 : index
    %c0_33 = arith.constant 0 : index
    %18 = vector.load %arg2[%c2_31, %c0_32, %c0_33] : memref<9x128x128xf32, #tpu.memory_space<vmem>>, vector<1x128x128xf32>
    %19 = vector.shape_cast %18 : vector<1x128x128xf32> to vector<128x128xf32>
    %cst_34 = arith.constant dense<0.000000e+00> : vector<256x128xf32>
    %20 = tpu.matmul %17, %19, %cst_34 {dimension_numbers = #tpu.dot_dimension_numbers<[1], [0], [0], [1], [0, 0, 1, 1], [], []>} : vector<256x128xf32>, vector<128x128xf32>, vector<256x128xf32> -> vector<256x128xf32>
    %21 = arith.addf %15, %20 : vector<256x128xf32>
    %c0_35 = arith.constant 0 : index
    %c1_36 = arith.constant 1 : index
    %c0_37 = arith.constant 0 : index
    %c0_38 = arith.constant 0 : index
    %22 = vector.load %arg7[%c0_35, %c1_36, %c0_37, %c0_38] : memref<1x18x18x128xf32, #tpu.memory_space<vmem>>, vector<1x16x16x128xf32>
    %23 = vector.shape_cast %22 : vector<1x16x16x128xf32> to vector<256x128xf32>
    %c3 = arith.constant 3 : index
    %c0_39 = arith.constant 0 : index
    %c0_40 = arith.constant 0 : index
    %24 = vector.load %arg2[%c3, %c0_39, %c0_40] : memref<9x128x128xf32, #tpu.memory_space<vmem>>, vector<1x128x128xf32>
    %25 = vector.shape_cast %24 : vector<1x128x128xf32> to vector<128x128xf32>
    %cst_41 = arith.constant dense<0.000000e+00> : vector<256x128xf32>
    %26 = tpu.matmul %23, %25, %cst_41 {dimension_numbers = #tpu.dot_dimension_numbers<[1], [0], [0], [1], [0, 0, 1, 1], [], []>} : vector<256x128xf32>, vector<128x128xf32>, vector<256x128xf32> -> vector<256x128xf32>
    %27 = arith.addf %21, %26 : vector<256x128xf32>
    %c0_42 = arith.constant 0 : index
    %c1_43 = arith.constant 1 : index
    %c1_44 = arith.constant 1 : index
    %c0_45 = arith.constant 0 : index
    %28 = vector.load %arg7[%c0_42, %c1_43, %c1_44, %c0_45] : memref<1x18x18x128xf32, #tpu.memory_space<vmem>>, vector<1x16x16x128xf32>
    %29 = vector.shape_cast %28 : vector<1x16x16x128xf32> to vector<256x128xf32>
    %c4 = arith.constant 4 : index
    %c0_46 = arith.constant 0 : index
    %c0_47 = arith.constant 0 : index
    %30 = vector.load %arg2[%c4, %c0_46, %c0_47] : memref<9x128x128xf32, #tpu.memory_space<vmem>>, vector<1x128x128xf32>
    %31 = vector.shape_cast %30 : vector<1x128x128xf32> to vector<128x128xf32>
    %cst_48 = arith.constant dense<0.000000e+00> : vector<256x128xf32>
    %32 = tpu.matmul %29, %31, %cst_48 {dimension_numbers = #tpu.dot_dimension_numbers<[1], [0], [0], [1], [0, 0, 1, 1], [], []>} : vector<256x128xf32>, vector<128x128xf32>, vector<256x128xf32> -> vector<256x128xf32>
    %33 = arith.addf %27, %32 : vector<256x128xf32>
    %c0_49 = arith.constant 0 : index
    %c1_50 = arith.constant 1 : index
    %c2_51 = arith.constant 2 : index
    %c0_52 = arith.constant 0 : index
    %34 = vector.load %arg7[%c0_49, %c1_50, %c2_51, %c0_52] : memref<1x18x18x128xf32, #tpu.memory_space<vmem>>, vector<1x16x16x128xf32>
    %35 = vector.shape_cast %34 : vector<1x16x16x128xf32> to vector<256x128xf32>
    %c5 = arith.constant 5 : index
    %c0_53 = arith.constant 0 : index
    %c0_54 = arith.constant 0 : index
    %36 = vector.load %arg2[%c5, %c0_53, %c0_54] : memref<9x128x128xf32, #tpu.memory_space<vmem>>, vector<1x128x128xf32>
    %37 = vector.shape_cast %36 : vector<1x128x128xf32> to vector<128x128xf32>
    %cst_55 = arith.constant dense<0.000000e+00> : vector<256x128xf32>
    %38 = tpu.matmul %35, %37, %cst_55 {dimension_numbers = #tpu.dot_dimension_numbers<[1], [0], [0], [1], [0, 0, 1, 1], [], []>} : vector<256x128xf32>, vector<128x128xf32>, vector<256x128xf32> -> vector<256x128xf32>
    %39 = arith.addf %33, %38 : vector<256x128xf32>
    %c0_56 = arith.constant 0 : index
    %c2_57 = arith.constant 2 : index
    %c0_58 = arith.constant 0 : index
    %c0_59 = arith.constant 0 : index
    %40 = vector.load %arg7[%c0_56, %c2_57, %c0_58, %c0_59] : memref<1x18x18x128xf32, #tpu.memory_space<vmem>>, vector<1x16x16x128xf32>
    %41 = vector.shape_cast %40 : vector<1x16x16x128xf32> to vector<256x128xf32>
    %c6 = arith.constant 6 : index
    %c0_60 = arith.constant 0 : index
    %c0_61 = arith.constant 0 : index
    %42 = vector.load %arg2[%c6, %c0_60, %c0_61] : memref<9x128x128xf32, #tpu.memory_space<vmem>>, vector<1x128x128xf32>
    %43 = vector.shape_cast %42 : vector<1x128x128xf32> to vector<128x128xf32>
    %cst_62 = arith.constant dense<0.000000e+00> : vector<256x128xf32>
    %44 = tpu.matmul %41, %43, %cst_62 {dimension_numbers = #tpu.dot_dimension_numbers<[1], [0], [0], [1], [0, 0, 1, 1], [], []>} : vector<256x128xf32>, vector<128x128xf32>, vector<256x128xf32> -> vector<256x128xf32>
    %45 = arith.addf %39, %44 : vector<256x128xf32>
    %c0_63 = arith.constant 0 : index
    %c2_64 = arith.constant 2 : index
    %c1_65 = arith.constant 1 : index
    %c0_66 = arith.constant 0 : index
    %46 = vector.load %arg7[%c0_63, %c2_64, %c1_65, %c0_66] : memref<1x18x18x128xf32, #tpu.memory_space<vmem>>, vector<1x16x16x128xf32>
    %47 = vector.shape_cast %46 : vector<1x16x16x128xf32> to vector<256x128xf32>
    %c7 = arith.constant 7 : index
    %c0_67 = arith.constant 0 : index
    %c0_68 = arith.constant 0 : index
    %48 = vector.load %arg2[%c7, %c0_67, %c0_68] : memref<9x128x128xf32, #tpu.memory_space<vmem>>, vector<1x128x128xf32>
    %49 = vector.shape_cast %48 : vector<1x128x128xf32> to vector<128x128xf32>
    %cst_69 = arith.constant dense<0.000000e+00> : vector<256x128xf32>
    %50 = tpu.matmul %47, %49, %cst_69 {dimension_numbers = #tpu.dot_dimension_numbers<[1], [0], [0], [1], [0, 0, 1, 1], [], []>} : vector<256x128xf32>, vector<128x128xf32>, vector<256x128xf32> -> vector<256x128xf32>
    %51 = arith.addf %45, %50 : vector<256x128xf32>
    %c0_70 = arith.constant 0 : index
    %c2_71 = arith.constant 2 : index
    %c2_72 = arith.constant 2 : index
    %c0_73 = arith.constant 0 : index
    %52 = vector.load %arg7[%c0_70, %c2_71, %c2_72, %c0_73] : memref<1x18x18x128xf32, #tpu.memory_space<vmem>>, vector<1x16x16x128xf32>
    %53 = vector.shape_cast %52 : vector<1x16x16x128xf32> to vector<256x128xf32>
    %c8 = arith.constant 8 : index
    %c0_74 = arith.constant 0 : index
    %c0_75 = arith.constant 0 : index
    %54 = vector.load %arg2[%c8, %c0_74, %c0_75] : memref<9x128x128xf32, #tpu.memory_space<vmem>>, vector<1x128x128xf32>
    %55 = vector.shape_cast %54 : vector<1x128x128xf32> to vector<128x128xf32>
    %cst_76 = arith.constant dense<0.000000e+00> : vector<256x128xf32>
    %56 = tpu.matmul %53, %55, %cst_76 {dimension_numbers = #tpu.dot_dimension_numbers<[1], [0], [0], [1], [0, 0, 1, 1], [], []>} : vector<256x128xf32>, vector<128x128xf32>, vector<256x128xf32> -> vector<256x128xf32>
    %57 = arith.addf %51, %56 : vector<256x128xf32>
    %58 = vector.broadcast %4 : vector<1x128xf32> to vector<256x128xf32>
    %59 = arith.addf %57, %58 : vector<256x128xf32>
    %cst_77 = arith.constant 0.000000e+00 : f32
    %60 = vector.broadcast %cst_77 : f32 to vector<256x128xf32>
    %61 = arith.maximumf %59, %60 : vector<256x128xf32>
    %62 = vector.shape_cast %61 : vector<256x128xf32> to vector<1x16x16x128xf32>
    %c0_78 = arith.constant 0 : index
    %c1_79 = arith.constant 1 : index
    %c1_80 = arith.constant 1 : index
    %c0_81 = arith.constant 0 : index
    %63 = vector.load %arg7[%c0_78, %c1_79, %c1_80, %c0_81] : memref<1x18x18x128xf32, #tpu.memory_space<vmem>>, vector<1x16x16x128xf32>
    tpu.vector_store %arg7[%c0_78, %c1_79, %c1_80, %c0_81], %62 {strides = array<i32>} : memref<1x18x18x128xf32, #tpu.memory_space<vmem>>, vector<1x16x16x128xf32>,
    %c0_82 = arith.constant 0 : index
    %c0_83 = arith.constant 0 : index
    %64 = vector.load %arg5[%c0_82, %c0_83] : memref<1x128xf32, #tpu.memory_space<vmem>>, vector<1x128xf32>
    %c0_84 = arith.constant 0 : index
    %c0_85 = arith.constant 0 : index
    %c0_86 = arith.constant 0 : index
    %c0_87 = arith.constant 0 : index
    %65 = vector.load %arg7[%c0_84, %c0_85, %c0_86, %c0_87] : memref<1x18x18x128xf32, #tpu.memory_space<vmem>>, vector<1x16x16x128xf32>
    %66 = vector.shape_cast %65 : vector<1x16x16x128xf32> to vector<256x128xf32>
    %c0_88 = arith.constant 0 : index
    %c0_89 = arith.constant 0 : index
    %c0_90 = arith.constant 0 : index
    %67 = vector.load %arg4[%c0_88, %c0_89, %c0_90] : memref<9x128x128xf32, #tpu.memory_space<vmem>>, vector<1x128x128xf32>
    %68 = vector.shape_cast %67 : vector<1x128x128xf32> to vector<128x128xf32>
    %cst_91 = arith.constant dense<0.000000e+00> : vector<256x128xf32>
    %69 = tpu.matmul %66, %68, %cst_91 {dimension_numbers = #tpu.dot_dimension_numbers<[1], [0], [0], [1], [0, 0, 1, 1], [], []>} : vector<256x128xf32>, vector<128x128xf32>, vector<256x128xf32> -> vector<256x128xf32>
    %c0_92 = arith.constant 0 : index
    %c0_93 = arith.constant 0 : index
    %c1_94 = arith.constant 1 : index
    %c0_95 = arith.constant 0 : index
    %70 = vector.load %arg7[%c0_92, %c0_93, %c1_94, %c0_95] : memref<1x18x18x128xf32, #tpu.memory_space<vmem>>, vector<1x16x16x128xf32>
    %71 = vector.shape_cast %70 : vector<1x16x16x128xf32> to vector<256x128xf32>
    %c1_96 = arith.constant 1 : index
    %c0_97 = arith.constant 0 : index
    %c0_98 = arith.constant 0 : index
    %72 = vector.load %arg4[%c1_96, %c0_97, %c0_98] : memref<9x128x128xf32, #tpu.memory_space<vmem>>, vector<1x128x128xf32>
    %73 = vector.shape_cast %72 : vector<1x128x128xf32> to vector<128x128xf32>
    %cst_99 = arith.constant dense<0.000000e+00> : vector<256x128xf32>
    %74 = tpu.matmul %71, %73, %cst_99 {dimension_numbers = #tpu.dot_dimension_numbers<[1], [0], [0], [1], [0, 0, 1, 1], [], []>} : vector<256x128xf32>, vector<128x128xf32>, vector<256x128xf32> -> vector<256x128xf32>
    %75 = arith.addf %69, %74 : vector<256x128xf32>
    %c0_100 = arith.constant 0 : index
    %c0_101 = arith.constant 0 : index
    %c2_102 = arith.constant 2 : index
    %c0_103 = arith.constant 0 : index
    %76 = vector.load %arg7[%c0_100, %c0_101, %c2_102, %c0_103] : memref<1x18x18x128xf32, #tpu.memory_space<vmem>>, vector<1x16x16x128xf32>
    %77 = vector.shape_cast %76 : vector<1x16x16x128xf32> to vector<256x128xf32>
    %c2_104 = arith.constant 2 : index
    %c0_105 = arith.constant 0 : index
    %c0_106 = arith.constant 0 : index
    %78 = vector.load %arg4[%c2_104, %c0_105, %c0_106] : memref<9x128x128xf32, #tpu.memory_space<vmem>>, vector<1x128x128xf32>
    %79 = vector.shape_cast %78 : vector<1x128x128xf32> to vector<128x128xf32>
    %cst_107 = arith.constant dense<0.000000e+00> : vector<256x128xf32>
    %80 = tpu.matmul %77, %79, %cst_107 {dimension_numbers = #tpu.dot_dimension_numbers<[1], [0], [0], [1], [0, 0, 1, 1], [], []>} : vector<256x128xf32>, vector<128x128xf32>, vector<256x128xf32> -> vector<256x128xf32>
    %81 = arith.addf %75, %80 : vector<256x128xf32>
    %c0_108 = arith.constant 0 : index
    %c1_109 = arith.constant 1 : index
    %c0_110 = arith.constant 0 : index
    %c0_111 = arith.constant 0 : index
    %82 = vector.load %arg7[%c0_108, %c1_109, %c0_110, %c0_111] : memref<1x18x18x128xf32, #tpu.memory_space<vmem>>, vector<1x16x16x128xf32>
    %83 = vector.shape_cast %82 : vector<1x16x16x128xf32> to vector<256x128xf32>
    %c3_112 = arith.constant 3 : index
    %c0_113 = arith.constant 0 : index
    %c0_114 = arith.constant 0 : index
    %84 = vector.load %arg4[%c3_112, %c0_113, %c0_114] : memref<9x128x128xf32, #tpu.memory_space<vmem>>, vector<1x128x128xf32>
    %85 = vector.shape_cast %84 : vector<1x128x128xf32> to vector<128x128xf32>
    %cst_115 = arith.constant dense<0.000000e+00> : vector<256x128xf32>
    %86 = tpu.matmul %83, %85, %cst_115 {dimension_numbers = #tpu.dot_dimension_numbers<[1], [0], [0], [1], [0, 0, 1, 1], [], []>} : vector<256x128xf32>, vector<128x128xf32>, vector<256x128xf32> -> vector<256x128xf32>
    %87 = arith.addf %81, %86 : vector<256x128xf32>
    %c0_116 = arith.constant 0 : index
    %c1_117 = arith.constant 1 : index
    %c1_118 = arith.constant 1 : index
    %c0_119 = arith.constant 0 : index
    %88 = vector.load %arg7[%c0_116, %c1_117, %c1_118, %c0_119] : memref<1x18x18x128xf32, #tpu.memory_space<vmem>>, vector<1x16x16x128xf32>
    %89 = vector.shape_cast %88 : vector<1x16x16x128xf32> to vector<256x128xf32>
    %c4_120 = arith.constant 4 : index
    %c0_121 = arith.constant 0 : index
    %c0_122 = arith.constant 0 : index
    %90 = vector.load %arg4[%c4_120, %c0_121, %c0_122] : memref<9x128x128xf32, #tpu.memory_space<vmem>>, vector<1x128x128xf32>
    %91 = vector.shape_cast %90 : vector<1x128x128xf32> to vector<128x128xf32>
    %cst_123 = arith.constant dense<0.000000e+00> : vector<256x128xf32>
    %92 = tpu.matmul %89, %91, %cst_123 {dimension_numbers = #tpu.dot_dimension_numbers<[1], [0], [0], [1], [0, 0, 1, 1], [], []>} : vector<256x128xf32>, vector<128x128xf32>, vector<256x128xf32> -> vector<256x128xf32>
    %93 = arith.addf %87, %92 : vector<256x128xf32>
    %c0_124 = arith.constant 0 : index
    %c1_125 = arith.constant 1 : index
    %c2_126 = arith.constant 2 : index
    %c0_127 = arith.constant 0 : index
    %94 = vector.load %arg7[%c0_124, %c1_125, %c2_126, %c0_127] : memref<1x18x18x128xf32, #tpu.memory_space<vmem>>, vector<1x16x16x128xf32>
    %95 = vector.shape_cast %94 : vector<1x16x16x128xf32> to vector<256x128xf32>
    %c5_128 = arith.constant 5 : index
    %c0_129 = arith.constant 0 : index
    %c0_130 = arith.constant 0 : index
    %96 = vector.load %arg4[%c5_128, %c0_129, %c0_130] : memref<9x128x128xf32, #tpu.memory_space<vmem>>, vector<1x128x128xf32>
    %97 = vector.shape_cast %96 : vector<1x128x128xf32> to vector<128x128xf32>
    %cst_131 = arith.constant dense<0.000000e+00> : vector<256x128xf32>
    %98 = tpu.matmul %95, %97, %cst_131 {dimension_numbers = #tpu.dot_dimension_numbers<[1], [0], [0], [1], [0, 0, 1, 1], [], []>} : vector<256x128xf32>, vector<128x128xf32>, vector<256x128xf32> -> vector<256x128xf32>
    %99 = arith.addf %93, %98 : vector<256x128xf32>
    %c0_132 = arith.constant 0 : index
    %c2_133 = arith.constant 2 : index
    %c0_134 = arith.constant 0 : index
    %c0_135 = arith.constant 0 : index
    %100 = vector.load %arg7[%c0_132, %c2_133, %c0_134, %c0_135] : memref<1x18x18x128xf32, #tpu.memory_space<vmem>>, vector<1x16x16x128xf32>
    %101 = vector.shape_cast %100 : vector<1x16x16x128xf32> to vector<256x128xf32>
    %c6_136 = arith.constant 6 : index
    %c0_137 = arith.constant 0 : index
    %c0_138 = arith.constant 0 : index
    %102 = vector.load %arg4[%c6_136, %c0_137, %c0_138] : memref<9x128x128xf32, #tpu.memory_space<vmem>>, vector<1x128x128xf32>
    %103 = vector.shape_cast %102 : vector<1x128x128xf32> to vector<128x128xf32>
    %cst_139 = arith.constant dense<0.000000e+00> : vector<256x128xf32>
    %104 = tpu.matmul %101, %103, %cst_139 {dimension_numbers = #tpu.dot_dimension_numbers<[1], [0], [0], [1], [0, 0, 1, 1], [], []>} : vector<256x128xf32>, vector<128x128xf32>, vector<256x128xf32> -> vector<256x128xf32>
    %105 = arith.addf %99, %104 : vector<256x128xf32>
    %c0_140 = arith.constant 0 : index
    %c2_141 = arith.constant 2 : index
    %c1_142 = arith.constant 1 : index
    %c0_143 = arith.constant 0 : index
    %106 = vector.load %arg7[%c0_140, %c2_141, %c1_142, %c0_143] : memref<1x18x18x128xf32, #tpu.memory_space<vmem>>, vector<1x16x16x128xf32>
    %107 = vector.shape_cast %106 : vector<1x16x16x128xf32> to vector<256x128xf32>
    %c7_144 = arith.constant 7 : index
    %c0_145 = arith.constant 0 : index
    %c0_146 = arith.constant 0 : index
    %108 = vector.load %arg4[%c7_144, %c0_145, %c0_146] : memref<9x128x128xf32, #tpu.memory_space<vmem>>, vector<1x128x128xf32>
    %109 = vector.shape_cast %108 : vector<1x128x128xf32> to vector<128x128xf32>
    %cst_147 = arith.constant dense<0.000000e+00> : vector<256x128xf32>
    %110 = tpu.matmul %107, %109, %cst_147 {dimension_numbers = #tpu.dot_dimension_numbers<[1], [0], [0], [1], [0, 0, 1, 1], [], []>} : vector<256x128xf32>, vector<128x128xf32>, vector<256x128xf32> -> vector<256x128xf32>
    %111 = arith.addf %105, %110 : vector<256x128xf32>
    %c0_148 = arith.constant 0 : index
    %c2_149 = arith.constant 2 : index
    %c2_150 = arith.constant 2 : index
    %c0_151 = arith.constant 0 : index
    %112 = vector.load %arg7[%c0_148, %c2_149, %c2_150, %c0_151] : memref<1x18x18x128xf32, #tpu.memory_space<vmem>>, vector<1x16x16x128xf32>
    %113 = vector.shape_cast %112 : vector<1x16x16x128xf32> to vector<256x128xf32>
    %c8_152 = arith.constant 8 : index
    %c0_153 = arith.constant 0 : index
    %c0_154 = arith.constant 0 : index
    %114 = vector.load %arg4[%c8_152, %c0_153, %c0_154] : memref<9x128x128xf32, #tpu.memory_space<vmem>>, vector<1x128x128xf32>
    %115 = vector.shape_cast %114 : vector<1x128x128xf32> to vector<128x128xf32>
    %cst_155 = arith.constant dense<0.000000e+00> : vector<256x128xf32>
    %116 = tpu.matmul %113, %115, %cst_155 {dimension_numbers = #tpu.dot_dimension_numbers<[1], [0], [0], [1], [0, 0, 1, 1], [], []>} : vector<256x128xf32>, vector<128x128xf32>, vector<256x128xf32> -> vector<256x128xf32>
    %117 = arith.addf %111, %116 : vector<256x128xf32>
    %118 = vector.broadcast %64 : vector<1x128xf32> to vector<256x128xf32>
    %119 = arith.addf %117, %118 : vector<256x128xf32>
    %120 = vector.shape_cast %2 : vector<1x16x16x128xf32> to vector<256x128xf32>
    %121 = arith.addf %119, %120 : vector<256x128xf32>
    %cst_156 = arith.constant 0.000000e+00 : f32
    %122 = vector.broadcast %cst_156 : f32 to vector<256x128xf32>
    %123 = arith.maximumf %121, %122 : vector<256x128xf32>
    %c0_157 = arith.constant 0 : index
    %c0_158 = arith.constant 0 : index
    %124 = vector.load %arg6[%c0_157, %c0_158] : memref<256x128xf32, #tpu.memory_space<vmem>>, vector<256x128xf32>
    tpu.vector_store %arg6[%c0_157, %c0_158], %123 {strides = array<i32>} : memref<256x128xf32, #tpu.memory_space<vmem>>, vector<256x128xf32>,
    return
  }
  func.func @transform_0(%arg0: i32) -> (i32, i32, i32, i32) {
    %c0_i32 = arith.constant 0 : i32
    %c0_i32_0 = arith.constant 0 : i32
    %c0_i32_1 = arith.constant 0 : i32
    %c0_i32_2 = arith.constant 0 : i32
    return %arg0, %c0_i32, %c0_i32_0, %c0_i32_1 : i32, i32, i32, i32
  }
  func.func @transform_1(%arg0: i32) -> (i32, i32, i32) {
    %c0_i32 = arith.constant 0 : i32
    %c0_i32_0 = arith.constant 0 : i32
    %c0_i32_1 = arith.constant 0 : i32
    %c0_i32_2 = arith.constant 0 : i32
    return %c0_i32, %c0_i32_0, %c0_i32_1 : i32, i32, i32
  }
  func.func @transform_2(%arg0: i32) -> (i32, i32) {
    %c0_i32 = arith.constant 0 : i32
    %c0_i32_0 = arith.constant 0 : i32
    %c0_i32_1 = arith.constant 0 : i32
    return %c0_i32, %c0_i32_0 : i32, i32
  }
  func.func @transform_3(%arg0: i32) -> (i32, i32, i32) {
    %c0_i32 = arith.constant 0 : i32
    %c0_i32_0 = arith.constant 0 : i32
    %c0_i32_1 = arith.constant 0 : i32
    %c0_i32_2 = arith.constant 0 : i32
    return %c0_i32, %c0_i32_0, %c0_i32_1 : i32, i32, i32
  }
  func.func @transform_4(%arg0: i32) -> (i32, i32) {
    %c0_i32 = arith.constant 0 : i32
    %c0_i32_0 = arith.constant 0 : i32
    %c0_i32_1 = arith.constant 0 : i32
    return %c0_i32, %c0_i32_0 : i32, i32
  }
  func.func @transform_5(%arg0: i32) -> (i32, i32) {
    %c0_i32 = arith.constant 0 : i32
    %c0_i32_0 = arith.constant 0 : i32
    return %arg0, %c0_i32 : i32, i32
  }
}

</mosaic_0001>

<bundles_post_ra>
// kernel: tpu_custom_call.1
= control target key start
LH: loop header
LB: loop body
LE: loop exit
PB: predicated region body
PF: predicated region fallthrough
CT: control target
= control target key end

     0   :  { %10 = vsyncpa [#allocation4], 0  ;;  %s6216_s0 = inlined_call_operand.hbm [shape: f32[2,16,16,128], index: 0, kind: input, shape index: {}]   ;;  %s6217_s1 = inlined_call_operand.hbm [shape: f32[9,128,128], index: 1, kind: input, shape index: {}]   ;;  %s6218_s2 = inlined_call_operand.vmem [shape: f32[1,128], index: 2, kind: input, shape index: {}]   ;;  %s6219_s3 = inlined_call_operand.hbm [shape: f32[9,128,128], index: 3, kind: input, shape index: {}]   ;;  %s6220_s4 = inlined_call_operand.vmem [shape: f32[1,128], index: 4, kind: input, shape index: {}]   ;;  %s6221_s5 = inlined_call_operand.hbm [shape: f32[512,128], index: 5, kind: output, shape index: {}]  }
   0x1   :  { %12 = vsyncpa [#allocation4 + $0x1], 0 }
   0x2   :  { %13 = vsyncpa [#allocation7], 0 }
   0x3   :  { %14 = vsyncpa [#allocation5], 0 }
   0x4   :  { %16 = vsyncpa [#allocation5 + $0x1], 0  ;;  %s4429_s18 = smov 0   ;;  %s4431_s19 = smov 0  }
   0x5   :  { %s4433_s20 = smov 0   ;;  %s4435_s21 = smov 0  }
   0x6 LB: > { %s4450_s22 = sadd.s32 4294967295, %s4390_s21   ;;  %s4101_s23 = sadd.s32 4294967294, %s4390_s21   ;;  %s4390_s21 = sphi %s4435_s21, %s6411_s21   ;;  %s4386_s20 = sphi %s4433_s20, %s6410_s20   ;;  %s4382_s19 = sphi %s4431_s19, %s6409_s19   ;;  %s4378_s18 = sphi %s4429_s18, %s6408_s18  }
   0x7   : > { %p42_p0 = scmp.ne.s32.totalorder %s4382_s19, %s4378_s18  ;;  %p43_p1 = scmp.eq.s32.totalorder %s4450_s22, 0 }
   0x8   : > { %p150_p2 = scmp.eq.s32.totalorder %s4450_s22, 1  ;;  %p156_p3 = scmp.eq.s32.totalorder %s4101_s23, 1 }
   0x9   : > { %p4459_p4 = por %p43_p1, %p42_p0  ;;  %p4102_p5 = scmp.ge.s32.totalorder %s4390_s21, 1 }
   0xa   : > { %p4464_p6 = por %p156_p3, %p42_p0  ;;  %p163_p7 = scmp.lt.s32.totalorder %s4390_s21, 3 }
   0xb   : > { %s174_s28 = sshll.u32 %s6217_s1, 4  ;;  %s4392_s30 = smov [#allocation6]   ;;  %s175_s28 = int_to_ptr.hbm [resolvable:$true] %s174_s28 }
   0xc   : > { %p4472_p8 = pnand %p4102_p5, %p163_p7  ;;  %s176_s6 = sshll.u32 %s4392_s30, 4  ;;  %s177_s6 = int_to_ptr.vmem [resolvable:$true] %s176_s6 }
   0xd   : > { %s191_s9 = sshll.u32 %s6219_s3, 4  ;;  %s6222_s10 = smov 128   ;;  %s192_s9 = int_to_ptr.hbm [resolvable:$true] %s191_s9 }
   0xe   : > { %p4165_p9 = pneg %p4472_p8  ;;  %s4394_s11 = smov 8  }
   0xf   : > { %s4395_s12 = smov [#allocation8]   ;;  %s4491_s14 = sadd.s32 1, %s4390_s21  }
  0x10   : > { %p4166_p10 = pnand %p4165_p9, %p43_p1  ;;  %s193_s13 = sshll.u32 %s4395_s12, 4  ;;  %s194_s13 = int_to_ptr.vmem [resolvable:$true] %s193_s13 }
  0x11   : > { %s29_s15 = sadd.s32 1, %s4386_s20  ;;  %s26_s16 = ssub.s32 %s4390_s21, %s4491_s14 }
  0x12   : > { %4168 = dma.hbm_to_vmem [thread:$0]  (!%p4166_p10), %s175_s28, 18432, %s177_s6, [#allocation7], %s6222_s10, %s6222_s10, %s4394_s11  }
  0x13   : > { %4171 = dma.hbm_to_vmem [thread:$0]  (!%p4166_p10), %s192_s9, 18432, %s194_s13, [#allocation7], %s6222_s10, %s6222_s10, %s4394_s11  }
  0x14   : > { %p36_p12 = scmp.ne.s32.totalorder %s4386_s20, %s4382_s19  ;;  %p27_p13 = scmp.eq.s32.totalorder %s26_s16, 0 }
  0x15   : > { %p37_p0 = scmp.eq.s32.totalorder %s4390_s21, 0  ;;  %p4182_p5 = scmp.lt.s32.totalorder %s4390_s21, 2 }
  0x16   : > { %p4501_p3 = por %p150_p2, %p36_p12  ;;  %s210_s26 = sand.u32 1, %s4386_s20  }
  0x17   : > { %s4507_s23 = scalar_select %p27_p13, %s4386_s20, %s29_s15  }
  0x18   : > { %p38_p7 = por %p37_p0, %p36_p12  ;;  %s4106_s27 = sshll.u32 %s210_s26, 8 }
  0x19   : > { %s4119_s28 = sshll.u32 %s4390_s21, 8  ;;  %s214_s8 = scalar_lea.vmem [#allocation3], %s4106_s27 }
  0x1a   : > { %s219_s7 = scalar_lea.hbm %s6216_s0, %s4119_s28  ;;  %s222_s9 = sshll.u32 %s214_s8, 4  ;;  %s223_s9 = int_to_ptr.vmem [resolvable:$true] %s222_s9 }
  0x1b   : > { %s220_s12 = sshll.u32 %s219_s7, 4  ;;  %p4514_p2 = pnand %p4182_p5, %p38_p7  ;;  %s221_s12 = int_to_ptr.hbm [resolvable:$true] %s220_s12 }
  0x1c   : > { %s211_s15 = scalar_lea.sflag [#allocation4], %s210_s26  ;;  %s4290_s16 = sshra.s32 %s221_s12, 4  ;;  %s4291_s16 = int_to_ptr.hbm [resolvable:$true] %s4290_s16 }
  0x1d   : > { %s4292_s10 = scalar_lea.hbm %s4291_s16, 256  ;;  %p4294_p10 = pneg %p4514_p2 }
  0x1e   : > { %p4293_p9 = scmp.ne.s32.totalorder %s4291_s16, %s4292_s10  ;;  %s4297_s30 = scalar_lea.hbm %s6216_s0, 512 }
  0x1f   : > { %p4298_p0 = scmp.lt.s32.totalorder %s4291_s16, %s6216_s0  ;;  %p4299_p5 = scmp.lt.s32.totalorder %s4297_s30, %s4292_s10 }
  0x20   : > { %p4295_p12 = pnand %p4294_p10, %p4293_p9 }
  0x21   : > { %p4300_p7 = por %p4299_p5, %p4298_p0 }
  0x22   : > { %p4296_p13 = pneg %p4295_p12 }
  0x24   : > { %p4301_p11 = pnand %p4300_p7, %p4296_p13 }
  0x26   : > { %4304 = shalt.err (!%p4301_p11)
}
  0x27   : > { %s6262_s26 = smov 128   ;;  %234 = sbr.rel (%p4472_p8) target bundleno = 1523 (0x5f3), region = 40 }
  0x28   : > { %4175 = dma.hbm_to_vmem [thread:$0]  (!%p4514_p2), %s221_s12, 4096, %s223_s9, %s211_s15, %s6262_s26, %s6262_s26, %s4394_s11  }
  0x2c   : > { %s4534_s8 = sand.u32 1, %s4382_s19  }
  0x2d   : > { %s4110_s10 = sshll.u32 %s4534_s8, 8  ;;  %s237_s16 = scalar_lea.sflag [#allocation4], %s4534_s8 }
  0x2e   : > { %s4540_s28 = scalar_lea.vmem [#allocation3], %s4110_s10 }
  0x2f   : > { %4365 = dma.done.wait (%p4459_p4), %s237_s16, 4096  }
  0x30   : > { %4367 = vsyncadd (%p4459_p4), %s237_s16, 4294963200 }
  0x31   : > { %4369 = dma.done.wait (%p43_p1), [#allocation7], 36864  }
  0x32   : > { %4371 = vsyncadd (%p43_p1), [#allocation7], 4294930432  ;;  %v4396_v0 = vmov 0.0   ;;  %v495_v1 = vld [vmem:[#allocation6 + $0xf8] sm:$0xff]  ;;  %v494_v3 = vld [vmem:[#allocation6 + $0xf0] sm:$0xff]  ;;  %s5991_s15 = scalar_lea.vmem [#allocation9], %s4110_s10 }
  0x33   : > { %279 = vst [vmem:[#allocation2] sm:$0xff] %v4396_v0  ;;  %v446_v2 = vld [vmem:[#allocation6 + $0x78] sm:$0xff]  ;;  %496 = vmatpush.msra.mxu0 %v495_v1  ;;  %4121 = vmatpush.msra.mxu2 %v495_v1  ;;  %v445_v4 = vld [vmem:[#allocation6 + $0x70] sm:$0xff]  ;;  %v493_v5 = vld [vmem:[#allocation6 + $0xe8] sm:$0xff]  ;;  %s4120_s27 = sshll.u32 %s4450_s22, 8  ;;  %s4006_s26 = sshll.u32 %s5991_s15, 4  ;;  %s4007_s26 = int_to_ptr.vmem [resolvable:$true] %s4006_s26 }
  0x34   : > { %280 = vst [vmem:[#allocation2 + $0x8] sm:$0xff] %v4396_v0  ;;  %4137 = vmatpush.msra.mxu3 %v446_v2  ;;  %609 = vmatpush.msra.mxu1 %v446_v2  ;;  %v444_v6 = vld [vmem:[#allocation6 + $0x68] sm:$0xff]  ;;  %v492_v7 = vld [vmem:[#allocation6 + $0xe0] sm:$0xff]  ;;  %v491_v9 = vld [vmem:[#allocation6 + $0xd8] sm:$0xff]  ;;  %s4005_s7 = scalar_lea.hbm %s6221_s5, %s4120_s27  ;;  %s3994_s22 = scalar_lea.sflag [#allocation5], %s4534_s8 }
  0x35   : > { %281 = vst [vmem:[#allocation2 + $0x10] sm:$0x3] %v4396_v0  ;;  %497 = vmatpush.msra.mxu0 %v494_v3  ;;  %4122 = vmatpush.msra.mxu2 %v494_v3  ;;  %v443_v8 = vld [vmem:[#allocation6 + $0x60] sm:$0xff]  ;;  %v442_v10 = vld [vmem:[#allocation6 + $0x58] sm:$0xff]  ;;  %v490_v11 = vld [vmem:[#allocation6 + $0xd0] sm:$0xff]  ;;  %s4008_s10 = sshll.u32 %s4005_s7, 4  ;;  %s4009_s10 = int_to_ptr.hbm [resolvable:$true] %s4008_s10 }
  0x36   : > { %282 = vst [vmem:[#allocation2 + $0x18] sm:$0xff] %v4396_v0  ;;  %4138 = vmatpush.msra.mxu3 %v445_v4  ;;  %610 = vmatpush.msra.mxu1 %v445_v4  ;;  %v441_v12 = vld [vmem:[#allocation6 + $0x50] sm:$0xff]  ;;  %v489_v13 = vld [vmem:[#allocation6 + $0xc8] sm:$0xff]  ;;  %v488_v15 = vld [vmem:[#allocation6 + $0xc0] sm:$0xff]  ;;  %s4334_s16 = sshra.s32 %s4009_s10, 4  ;;  %s4340_s11 = scalar_lea.hbm %s6221_s5, 512  ;;  %s4335_s16 = int_to_ptr.hbm [resolvable:$true] %s4334_s16 }
  0x37   : > { %283 = vst [vmem:[#allocation2 + $0x20] sm:$0xff] %v4396_v0  ;;  %498 = vmatpush.msra.mxu0 %v493_v5  ;;  %4123 = vmatpush.msra.mxu2 %v493_v5  ;;  %v440_v14 = vld [vmem:[#allocation6 + $0x48] sm:$0xff]  ;;  %v439_v16 = vld [vmem:[#allocation6 + $0x40] sm:$0xff]  ;;  %v487_v17 = vld [vmem:[#allocation6 + $0xb8] sm:$0xff]  ;;  %p4341_p11 = scmp.lt.s32.totalorder %s4335_s16, %s6221_s5 }
  0x38   : > { %284 = vst [vmem:[#allocation2 + $0x28] sm:$0x3] %v4396_v0  ;;  %4139 = vmatpush.msra.mxu3 %v444_v6  ;;  %611 = vmatpush.msra.mxu1 %v444_v6  ;;  %v438_v18 = vld [vmem:[#allocation6 + $0x38] sm:$0xff]  ;;  %v486_v19 = vld [vmem:[#allocation6 + $0xb0] sm:$0xff]  ;;  %v485_v21 = vld [vmem:[#allocation6 + $0xa8] sm:$0xff] }
  0x39   : > { %285 = vst [vmem:[#allocation2 + $0x30] sm:$0xff] %v4396_v0  ;;  %499 = vmatpush.msra.mxu0 %v492_v7  ;;  %4124 = vmatpush.msra.mxu2 %v492_v7  ;;  %v437_v20 = vld [vmem:[#allocation6 + $0x30] sm:$0xff]  ;;  %v436_v22 = vld [vmem:[#allocation6 + $0x28] sm:$0xff]  ;;  %v484_v23 = vld [vmem:[#allocation6 + $0xa0] sm:$0xff] }
  0x3a   : > { %286 = vst [vmem:[#allocation2 + $0x38] sm:$0xff] %v4396_v0  ;;  %4140 = vmatpush.msra.mxu3 %v443_v8  ;;  %612 = vmatpush.msra.mxu1 %v443_v8  ;;  %v435_v24 = vld [vmem:[#allocation6 + $0x20] sm:$0xff]  ;;  %v483_v25 = vld [vmem:[#allocation6 + $0x98] sm:$0xff]  ;;  %v482_v27 = vld [vmem:[#allocation6 + $0x90] sm:$0xff] }
  0x3b   : > { %287 = vst [vmem:[#allocation2 + $0x40] sm:$0x3] %v4396_v0  ;;  %500 = vmatpush.msra.mxu0 %v491_v9  ;;  %4125 = vmatpush.msra.mxu2 %v491_v9  ;;  %v434_v26 = vld [vmem:[#allocation6 + $0x18] sm:$0xff]  ;;  %v433_v28 = vld [vmem:[#allocation6 + $0x10] sm:$0xff]  ;;  %v481_v29 = vld [vmem:[#allocation6 + $0x88] sm:$0xff] }
  0x3c   : > { %288 = vst [vmem:[#allocation2 + $0x48] sm:$0xff] %v4396_v0  ;;  %4141 = vmatpush.msra.mxu3 %v442_v10  ;;  %613 = vmatpush.msra.mxu1 %v442_v10  ;;  %v432_v30 = vld [vmem:[#allocation6 + $0x8] sm:$0xff]  ;;  %v480_v31 = vld [vmem:[#allocation6 + $0x80] sm:$0xff]  ;;  %v447_v33 = vld [vmem:[#allocation2 + $0x1] sm:$0xff] }
  0x3d   : > { %289 = vst [vmem:[#allocation2 + $0x50] sm:$0xff] %v4396_v0  ;;  %501 = vmatpush.msra.mxu0 %v490_v11  ;;  %4126 = vmatpush.msra.mxu2 %v490_v11  ;;  %v431_v32 = vld [vmem:[#allocation6] sm:$0xff]  ;;  %v964_v34 = vld [vmem:[#allocation6 + $0x1f8] sm:$0xff]  ;;  %v4590_v36 = vld [vmem:[%s4540_s28 + $0x70] sm:$0xff] }
  0x3e   : > { %290 = vst [vmem:[#allocation2 + $0x58] sm:$0x3] %v4396_v0  ;;  %4142 = vmatpush.msra.mxu3 %v441_v12  ;;  %614 = vmatpush.msra.mxu1 %v441_v12  ;;  %v770_v35 = vld [vmem:[#allocation6 + $0x178] sm:$0xff]  ;;  %v963_v37 = vld [vmem:[#allocation6 + $0x1f0] sm:$0xff]  ;;  %v768_v42 = vld [vmem:[#allocation6 + $0x168] sm:$0xff] }
  0x3f   : > { %291 = vst [vmem:[#allocation2 + $0x60] sm:$0xff] %v4396_v0  ;;  %502 = vmatpush.msra.mxu0 %v489_v13  ;;  %4127 = vmatpush.msra.mxu2 %v489_v13  ;;  %v769_v38 = vld [vmem:[#allocation6 + $0x170] sm:$0xff]  ;;  %v1158_v39 = vld [vmem:[#allocation6 + $0x278] sm:$0xff]  ;;  %v962_v43 = vld [vmem:[#allocation6 + $0x1e8] sm:$0xff] }
  0x40   : > { %292 = vst [vmem:[#allocation2 + $0x68] sm:$0xff] %v4396_v0  ;;  %4143 = vmatpush.msra.mxu3 %v440_v14  ;;  %615 = vmatpush.msra.mxu1 %v440_v14  ;;  %v448_v40 = vld [vmem:[#allocation2 + $0x9] sm:$0xff]  ;;  %v1157_v44 = vld [vmem:[#allocation6 + $0x270] sm:$0xff]  ;;  %v1156_v49 = vld [vmem:[#allocation6 + $0x268] sm:$0xff] }
  0x41   : > { %293 = vst [vmem:[#allocation2 + $0x70] sm:$0x3] %v4396_v0  ;;  %503 = vmatpush.msra.mxu0 %v488_v15  ;;  %4128 = vmatpush.msra.mxu2 %v488_v15  ;;  %v4602_v41 = vld [vmem:[%s4540_s28 + $0x78] sm:$0xff]  ;;  %v4613_v45 = vld [vmem:[%s4540_s28] sm:$0xff]  ;;  %v4626_v50 = vld [vmem:[%s4540_s28 + $0x88] sm:$0xff] }
  0x42   : > { %294 = vst [vmem:[#allocation2 + $0x78] sm:$0xff] %v4396_v0  ;;  %4144 = vmatpush.msra.mxu3 %v439_v16  ;;  %616 = vmatpush.msra.mxu1 %v439_v16  ;;  %v4618_v46 = vld [vmem:[%s4540_s28 + $0x80] sm:$0xff]  ;;  %v4630_v51 = vld [vmem:[%s4540_s28 + $0x8] sm:$0xff]  ;;  %v4634_v52 = vld [vmem:[%s4540_s28 + $0x90] sm:$0xff] }
  0x43   : > { %295 = vst [vmem:[#allocation2 + $0x80] sm:$0xff] %v4396_v0  ;;  %504 = vmatpush.msra.mxu0 %v487_v17  ;;  %4129 = vmatpush.msra.mxu2 %v487_v17  ;;  %v767_v47 = vld [vmem:[#allocation6 + $0x160] sm:$0xff]  ;;  %v4638_v53 = vld [vmem:[%s4540_s28 + $0x10] sm:$0xff]  ;;  %v4643_v55 = vld [vmem:[%s4540_s28 + $0x98] sm:$0xff] }
  0x44   : > { %296 = vst [vmem:[#allocation2 + $0x88] sm:$0x3] %v4396_v0  ;;  %4145 = vmatpush.msra.mxu3 %v438_v18  ;;  %617 = vmatpush.msra.mxu1 %v438_v18  ;;  %v961_v48 = vld [vmem:[#allocation6 + $0x1e0] sm:$0xff]  ;;  %v766_v56 = vld [vmem:[#allocation6 + $0x158] sm:$0xff]  ;;  %v959_v1 = vld [vmem:[#allocation6 + $0x1d0] sm:$0xff] }
  0x45   : > { %297 = vst [vmem:[#allocation2 + $0x90] sm:$0xff] %v4396_v0  ;;  %505 = vmatpush.msra.mxu0 %v486_v19  ;;  %4130 = vmatpush.msra.mxu2 %v486_v19  ;;  %v960_v57 = vld [vmem:[#allocation6 + $0x1d8] sm:$0xff]  ;;  %v1155_v59 = vld [vmem:[#allocation6 + $0x260] sm:$0xff]  ;;  %v4671_v6 = vld [vmem:[%s4540_s28 + $0xa8] sm:$0xff] }
  0x46   : > { %298 = vst [vmem:[#allocation2 + $0x98] sm:$0xff] %v4396_v0  ;;  %4146 = vmatpush.msra.mxu3 %v437_v20  ;;  %618 = vmatpush.msra.mxu1 %v437_v20  ;;  %v4651_v60 = vld [vmem:[%s4540_s28 + $0x18] sm:$0xff]  ;;  %v4658_v63 = vld [vmem:[%s4540_s28 + $0xa0] sm:$0xff]  ;;  %v764_v7 = vld [vmem:[#allocation6 + $0x148] sm:$0xff] }
  0x47   : > { %299 = vst [vmem:[#allocation2 + $0xa0] sm:$0x3] %v4396_v0  ;;  %506 = vmatpush.msra.mxu0 %v485_v21  ;;  %4131 = vmatpush.msra.mxu2 %v485_v21  ;;  %v1154_v2 = vld [vmem:[#allocation6 + $0x258] sm:$0xff]  ;;  %v4664_v3 = vld [vmem:[%s4540_s28 + $0x20] sm:$0xff]  ;;  %v958_v8 = vld [vmem:[#allocation6 + $0x1c8] sm:$0xff] }
  0x48   : > { %300 = vst [vmem:[#allocation2 + $0xa8] sm:$0xff] %v4396_v0  ;;  %4147 = vmatpush.msra.mxu3 %v436_v22  ;;  %619 = vmatpush.msra.mxu1 %v436_v22  ;;  %v1153_v9 = vld [vmem:[#allocation6 + $0x250] sm:$0xff]  ;;  %v4677_v10 = vld [vmem:[%s4540_s28 + $0x28] sm:$0xff]  ;;  %v763_v14 = vld [vmem:[#allocation6 + $0x140] sm:$0xff] }
  0x49   : > { %301 = vst [vmem:[#allocation2 + $0xb0] sm:$0xff] %v4396_v0  ;;  %507 = vmatpush.msra.mxu0 %v484_v23  ;;  %4132 = vmatpush.msra.mxu2 %v484_v23  ;;  %v4684_v13 = vld [vmem:[%s4540_s28 + $0xb0] sm:$0xff]  ;;  %v957_v15 = vld [vmem:[#allocation6 + $0x1c0] sm:$0xff]  ;;  %v1152_v16 = vld [vmem:[#allocation6 + $0x248] sm:$0xff] }
  0x4a   : > { %302 = vst [vmem:[#allocation2 + $0xb8] sm:$0x3] %v4396_v0  ;;  %4148 = vmatpush.msra.mxu3 %v435_v24  ;;  %620 = vmatpush.msra.mxu1 %v435_v24  ;;  %v4690_v17 = vld [vmem:[%s4540_s28 + $0x30] sm:$0xff]  ;;  %v4697_v20 = vld [vmem:[%s4540_s28 + $0xb8] sm:$0xff]  ;;  %v1151_v23 = vld [vmem:[#allocation6 + $0x240] sm:$0xff] }
  0x4b   : > { %303 = vst [vmem:[#allocation2 + $0xc0] sm:$0xff] %v4396_v0  ;;  %508 = vmatpush.msra.mxu0 %v483_v25  ;;  %4133 = vmatpush.msra.mxu2 %v483_v25  ;;  %v762_v21 = vld [vmem:[#allocation6 + $0x138] sm:$0xff] }
  0x4c   : > { %304 = vst [vmem:[#allocation2 + $0xc8] sm:$0xff] %v4396_v0  ;;  %4149 = vmatpush.msra.mxu3 %v434_v26  ;;  %621 = vmatpush.msra.mxu1 %v434_v26  ;;  %v956_v22 = vld [vmem:[#allocation6 + $0x1b8] sm:$0xff] }
  0x4d   : > { %305 = vst [vmem:[#allocation2 + $0xd0] sm:$0x3] %v4396_v0  ;;  %509 = vmatpush.msra.mxu0 %v482_v27  ;;  %4134 = vmatpush.msra.mxu2 %v482_v27  ;;  %v4703_v24 = vld [vmem:[%s4540_s28 + $0x38] sm:$0xff]  ;;  %v4710_v27 = vld [vmem:[%s4540_s28 + $0xc0] sm:$0xff] }
  0x4e   : > { %306 = vst [vmem:[#allocation2 + $0xd8] sm:$0xff] %v4396_v0  ;;  %4150 = vmatpush.msra.mxu3 %v433_v28  ;;  %622 = vmatpush.msra.mxu1 %v433_v28  ;;  %v761_v28 = vld [vmem:[#allocation6 + $0x130] sm:$0xff] }
  0x4f   : > { %307 = vst [vmem:[#allocation2 + $0xe0] sm:$0xff] %v4396_v0  ;;  %510 = vmatpush.msra.mxu0 %v481_v29  ;;  %4135 = vmatpush.msra.mxu2 %v481_v29  ;;  %v955_v29 = vld [vmem:[#allocation6 + $0x1b0] sm:$0xff] }
  0x50   : > { %308 = vst [vmem:[#allocation2 + $0xe8] sm:$0x3] %v4396_v0  ;;  %4151 = vmatpush.msra.mxu3 %v432_v30  ;;  %623 = vmatpush.msra.mxu1 %v432_v30  ;;  %v1150_v30 = vld [vmem:[#allocation6 + $0x238] sm:$0xff] }
  0x51   : > { %309 = vst [vmem:[#allocation2 + $0xf0] sm:$0xff] %v4396_v0  ;;  %511 = vmatpush.msra.mxu0 %v480_v31  ;;  %4136 = vmatpush.msra.mxu2 %v480_v31  ;;  %v4716_v31 = vld [vmem:[%s4540_s28 + $0x40] sm:$0xff] }
  0x52   : > { %310 = vst [vmem:[#allocation2 + $0xf8] sm:$0xff] %v4396_v0  ;;  %4152 = vmatpush.msra.mxu3 %v431_v32  ;;  %512 = vmatmul.f32.vlgmr.msra.gmra.mxu0 %v447_v33 }
  0x53   : > { %311 = vst [vmem:[#allocation2 + $0x100] sm:$0x3] %v4396_v0  ;;  %560 = vmatmul.f32.vlgmr.msra.gmra.mxu2 %v4590_v36  ;;  %624 = vmatpush.msra.mxu1 %v431_v32 }
  0x54   : > { %312 = vst [vmem:[#allocation2 + $0x108] sm:$0xff] %v4396_v0  ;;  %965 = vmatpush.msrb.mxu3 %v964_v34  ;;  %771 = vmatpush.msrb.mxu2 %v770_v35  ;;  %v4723_v34 = vld [vmem:[%s4540_s28 + $0xc8] sm:$0xff] }
  0x55   : > { %313 = vst [vmem:[#allocation2 + $0x110] sm:$0xff] %v4396_v0  ;;  %625 = vmatmul.f32.vlgmr.msra.gmra.mxu1 %v4396_v0  ;;  %1159 = vmatpush.msrb.mxu0 %v1158_v39  ;;  %v760_v35 = vld [vmem:[#allocation6 + $0x128] sm:$0xff] }
  0x56   : > { %314 = vst [vmem:[#allocation2 + $0x118] sm:$0x3] %v4396_v0  ;;  %966 = vmatpush.msrb.mxu3 %v963_v37  ;;  %772 = vmatpush.msrb.mxu2 %v769_v38  ;;  %v954_v37 = vld [vmem:[#allocation6 + $0x1a8] sm:$0xff]  ;;  %v1149_v38 = vld [vmem:[#allocation6 + $0x230] sm:$0xff] }
  0x57   : > { %315 = vst [vmem:[#allocation2 + $0x120] sm:$0xff] %v4396_v0  ;;  %1160 = vmatpush.msrb.mxu0 %v1157_v44  ;;  %v4729_v39 = vld [vmem:[%s4540_s28 + $0x48] sm:$0xff]  ;;  %v759_v44 = vld [vmem:[#allocation6 + $0x120] sm:$0xff] }
  0x58   : > { %316 = vst [vmem:[#allocation2 + $0x128] sm:$0xff] %v4396_v0  ;;  %967 = vmatpush.msrb.mxu3 %v962_v43  ;;  %773 = vmatpush.msrb.mxu2 %v768_v42  ;;  %v4736_v43 = vld [vmem:[%s4540_s28 + $0xd0] sm:$0xff] }
  0x59   : > { %317 = vst [vmem:[#allocation2 + $0x130] sm:$0x3] %v4396_v0  ;;  %1161 = vmatpush.msrb.mxu0 %v1156_v49  ;;  %v4742_v49 = vld [vmem:[%s4540_s28 + $0x50] sm:$0xff] }
  0x5a   : > { %6263 = vst [vmem:[#allocation13_spill] sm:$0xff] %v4590_v36  ;;  %515 = vmatmul.f32.gmra.mxu0 %v448_v40  ;;  %968 = vmatpush.msrb.mxu3 %v961_v48  ;;  %v1148_v48 = vld [vmem:[#allocation6 + $0x228] sm:$0xff] }
  0x5b   : > { %318 = vst [vmem:[#allocation2 + $0x138] sm:$0xff] %v4396_v0  ;;  %563 = vmatmul.f32.gmra.mxu2 %v4602_v41  ;;  %1162 = vmatpush.msrb.mxu0 %v1155_v59  ;;  %v758_v59 = vld [vmem:[#allocation6 + $0x118] sm:$0xff] }
  0x5c   : > { %319 = vst [vmem:[#allocation2 + $0x140] sm:$0xff] %v4396_v0  ;;  %774 = vmatpush.msrb.mxu2 %v767_v47  ;;  %969 = vmatpush.msrb.mxu3 %v960_v57  ;;  %v953_v47 = vld [vmem:[#allocation6 + $0x1a0] sm:$0xff]  ;;  %v4749_v57 = vld [vmem:[%s4540_s28 + $0xd8] sm:$0xff] }
  0x5d   : > { %320 = vst [vmem:[#allocation2 + $0x148] sm:$0x3] %v4396_v0  ;;  %628 = vmatmul.f32.gmra.mxu1 %v4396_v0  ;;  %1163 = vmatpush.msrb.mxu0 %v1154_v2 }
  0x5e   : > { %321 = vst [vmem:[#allocation2 + $0x150] sm:$0xff] %v4396_v0  ;;  %775 = vmatpush.msrb.mxu2 %v766_v56  ;;  %970 = vmatpush.msrb.mxu3 %v959_v1  ;;  %v4755_v1 = vld [vmem:[%s4540_s28 + $0x58] sm:$0xff] }
  0x5f   : > { %322 = vst [vmem:[#allocation2 + $0x158] sm:$0xff] %v4396_v0  ;;  %1164 = vmatpush.msrb.mxu0 %v1153_v9  ;;  %v951_v9 = vld [vmem:[#allocation6 + $0x190] sm:$0xff] }
  0x60   : > { %323 = vst [vmem:[#allocation2 + $0x160] sm:$0x3] %v4396_v0  ;;  %971 = vmatpush.msrb.mxu3 %v958_v8  ;;  %v757_v8 = vld [vmem:[#allocation6 + $0x110] sm:$0xff] }
  0x61   : > { %324 = vst [vmem:[#allocation2 + $0x168] sm:$0xff] %v4396_v0  ;;  %1165 = vmatpush.msrb.mxu0 %v1152_v16  ;;  %v4769_v16 = vld [vmem:[%s4540_s28 + $0x60] sm:$0xff] }
  0x62   : > { %6264 = vst [vmem:[#allocation14_spill] sm:$0xff] %v4602_v41  ;;  %518 = vmatmul.f32.gmra.mxu0 %v4613_v45  ;;  %972 = vmatpush.msrb.mxu3 %v957_v15  ;;  %v1351_v15 = vld [vmem:[#allocation6 + $0x2f0] sm:$0xff] }
  0x63   : > { %325 = vst [vmem:[#allocation2 + $0x170] sm:$0xff] %v4396_v0  ;;  %566 = vmatmul.f32.gmra.mxu2 %v4618_v46  ;;  %1166 = vmatpush.msrb.mxu0 %v1151_v23  ;;  %v756_v23 = vld [vmem:[#allocation6 + $0x108] sm:$0xff] }
  0x64   : > { %326 = vst [vmem:[#allocation2 + $0x178] sm:$0x3] %v4396_v0  ;;  %973 = vmatpush.msrb.mxu3 %v956_v22  ;;  %v4775_v22 = vld [vmem:[%s4540_s28 + $0xe8] sm:$0xff] }
  0x65   : > { %327 = vst [vmem:[#allocation2 + $0x180] sm:$0xff] %v4396_v0  ;;  %1167 = vmatpush.msrb.mxu0 %v1150_v30  ;;  %v1349_v30 = vld [vmem:[#allocation6 + $0x2e0] sm:$0xff] }
  0x66   : > { %328 = vst [vmem:[#allocation2 + $0x188] sm:$0xff] %v4396_v0  ;;  %974 = vmatpush.msrb.mxu3 %v955_v29  ;;  %v1145_v29 = vld [vmem:[#allocation6 + $0x210] sm:$0xff] }
  0x67   : > { %329 = vst [vmem:[#allocation2 + $0x190] sm:$0x3] %v4396_v0  ;;  %1168 = vmatpush.msrb.mxu0 %v1149_v38  ;;  %v1347_v38 = vld [vmem:[#allocation6 + $0x2d0] sm:$0xff] }
  0x68   : > { %330 = vst [vmem:[#allocation2 + $0x198] sm:$0xff] %v4396_v0  ;;  %975 = vmatpush.msrb.mxu3 %v954_v37 }
  0x69   : > { %6265 = vst [vmem:[#allocation15_spill] sm:$0xff] %v4613_v45  ;;  %1169 = vmatpush.msrb.mxu0 %v1148_v48  ;;  %v949_v48 = vld [vmem:[#allocation6 + $0x180] sm:$0xff] }
  0x6a   : > { %331 = vst [vmem:[#allocation2 + $0x1a0] sm:$0xff] %v4396_v0  ;;  %521 = vmatmul.f32.gmra.mxu0 %v4630_v51  ;;  %976 = vmatpush.msrb.mxu3 %v953_v47  ;;  %v1346_v47 = vld [vmem:[#allocation6 + $0x2c8] sm:$0xff] }
  0x6b   : > { %332 = vst [vmem:[#allocation2 + $0x1a8] sm:$0x3] %v4396_v0  ;;  %569 = vmatmul.f32.gmra.mxu2 %v4626_v50  ;;  %v765_v0 = vld [vmem:[#allocation6 + $0x150] sm:$0xff] }
  0x6c   : > { %6266 = vst [vmem:[#allocation16_spill] sm:$0xff] %v4618_v46  ;;  %776 = vmatpush.msrb.mxu2 %v765_v0  ;;  %v1147_v0 = vld [vmem:[#allocation6 + $0x220] sm:$0xff] }
  0x6d   : > { %380 = vst [vmem:[#allocation2 + $0xc1] sm:$0xff] %v4590_v36  ;;  %1170 = vmatpush.msrb.mxu0 %v1147_v0  ;;  %v1344_v0 = vld [vmem:[#allocation6 + $0x2b8] sm:$0xff] }
  0x6e   : > { %381 = vst [vmem:[#allocation2 + $0xc9] sm:$0xff] %v4602_v41  ;;  %777 = vmatpush.msrb.mxu2 %v764_v7  ;;  %v4762_v7 = vld [vmem:[%s4540_s28 + $0xe0] sm:$0xff] }
  0x6f   : > { %366 = vst [vmem:[#allocation2 + $0x19] sm:$0xff] %v4613_v45 }
  0x70   : > { %6267 = vst [vmem:[#allocation17_spill] sm:$0xff] %v4626_v50  ;;  %778 = vmatpush.msrb.mxu2 %v763_v14  ;;  %v1352_v14 = vld [vmem:[#allocation6 + $0x2f8] sm:$0xff] }
  0x71   : > { %382 = vst [vmem:[#allocation2 + $0xd9] sm:$0xff] %v4618_v46  ;;  %1353 = vmatpush.msrb.mxu1 %v1352_v14  ;;  %v1342_v14 = vld [vmem:[#allocation6 + $0x2a8] sm:$0xff] }
  0x72   : > { %6268 = vst [vmem:[#allocation18_spill] sm:$0xff] %v4630_v51  ;;  %524 = vmatmul.f32.gmra.mxu0 %v4638_v53  ;;  %779 = vmatpush.msrb.mxu2 %v762_v21  ;;  %v1735_v46 = vld [vmem:[#allocation6 + $0x3c8] sm:$0xff] }
  0x73   : > { %367 = vst [vmem:[#allocation2 + $0x21] sm:$0xff] %v4630_v51  ;;  %572 = vmatmul.f32.gmra.mxu2 %v4634_v52  ;;  %1354 = vmatpush.msrb.mxu1 %v1351_v15  ;;  %v1741_v15 = vld [vmem:[#allocation6 + $0x3f8] sm:$0xff] }
  0x74   : > { %6269 = vst [vmem:[#allocation19_spill] sm:$0xff] %v4634_v52  ;;  %v415_v54 = vld [vmem:[#allocation2 + $0xc0] sm:$0xff]  ;;  %780 = vmatpush.msrb.mxu2 %v761_v28  ;;  %v950_v28 = vld [vmem:[#allocation6 + $0x188] sm:$0xff] }
  0x75   : > { %383 = vst [vmem:[#allocation2 + $0xe1] sm:$0xff] %v4626_v50  ;;  %673 = vmatmul.f32.vlgmr.msra.gmra.mxu3 %v415_v54  ;;  %v416_v61 = vld [vmem:[#allocation2 + $0xc8] sm:$0xff] }
  0x76   : > { %6270 = vst [vmem:[#allocation20_spill] sm:$0xff] %v4638_v53  ;;  %v4648_v58 = vld [vmem:[#allocation2 + $0x18] sm:$0xff]  ;;  %781 = vmatpush.msrb.mxu2 %v760_v35  ;;  %v1348_v35 = vld [vmem:[#allocation6 + $0x2d8] sm:$0xff] }
  0x77   : > { %368 = vst [vmem:[#allocation2 + $0x31] sm:$0xff] %v4638_v53  ;;  %631 = vmatmul.f32.gmra.mxu1 %v4648_v58 }
  0x78   : > { %384 = vst [vmem:[#allocation2 + $0xf1] sm:$0xff] %v4634_v52  ;;  %v417_v4 = vld [vmem:[#allocation2 + $0xd8] sm:$0xff]  ;;  %782 = vmatpush.msrb.mxu2 %v759_v44  ;;  %v755_v44 = vld [vmem:[#allocation6 + $0x100] sm:$0xff] }
  0x79   : > { %6271 = vst [vmem:[#allocation21_spill] sm:$0xff] %v4643_v55 }
  0x7a   : > { %385 = vst [vmem:[#allocation2 + $0xf9] sm:$0xff] %v4643_v55  ;;  %v4655_v62 = vld [vmem:[#allocation2 + $0x20] sm:$0xff]  ;;  %527 = vmatmul.f32.gmra.mxu0 %v4651_v60  ;;  %783 = vmatpush.msrb.mxu2 %v758_v59  ;;  %v1345_v59 = vld [vmem:[#allocation6 + $0x2c0] sm:$0xff] }
  0x7b   : > { %6272 = vst [vmem:[#allocation22_spill] sm:$0xff] %v4651_v60  ;;  %575 = vmatmul.f32.gmra.mxu2 %v4643_v55 }
  0x7c   : > { %369 = vst [vmem:[#allocation2 + $0x39] sm:$0xff] %v4651_v60  ;;  %v418_v11 = vld [vmem:[#allocation2 + $0xe0] sm:$0xff]  ;;  %784 = vmatpush.msrb.mxu2 %v757_v8 }
  0x7d   : > { %6273 = vst [vmem:[#allocation23_spill] sm:$0xff] %v4658_v63  ;;  %676 = vmatmul.f32.gmra.mxu3 %v416_v61  ;;  %v952_v61 = vld [vmem:[#allocation6 + $0x198] sm:$0xff]  ;;  %v1343_v8 = vld [vmem:[#allocation6 + $0x2b0] sm:$0xff] }
  0x7e   : > { %386 = vst [vmem:[#allocation2 + $0x109] sm:$0xff] %v4658_v63  ;;  %v4668_v5 = vld [vmem:[#allocation2 + $0x30] sm:$0xff]  ;;  %977 = vmatpush.msrb.mxu3 %v952_v61  ;;  %785 = vmatpush.msrb.mxu2 %v756_v23  ;;  %v1340_v23 = vld [vmem:[#allocation6 + $0x298] sm:$0xff] }
  0x7f   : > { %6274 = vst [vmem:[#allocation24_spill] sm:$0xff] %v4664_v3  ;;  %634 = vmatmul.f32.gmra.mxu1 %v4655_v62  ;;  %v419_v18 = vld [vmem:[#allocation2 + $0xf0] sm:$0xff] }
  0x80   : > { %370 = vst [vmem:[#allocation2 + $0x49] sm:$0xff] %v4664_v3  ;;  %978 = vmatpush.msrb.mxu3 %v951_v9  ;;  %786 = vmatpush.msrb.mxu2 %v755_v44  ;;  %v1143_v61 = vld [vmem:[#allocation6 + $0x200] sm:$0xff] }
  0x81   : > { %6275 = vst [vmem:[#allocation25_spill] sm:$0xff] %v4671_v6  ;;  %v420_v25 = vld [vmem:[#allocation2 + $0xf8] sm:$0xff]  ;;  %v1337_v44 = vld [vmem:[#allocation6 + $0x280] sm:$0xff] }
  0x82   : > { %387 = vst [vmem:[#allocation2 + $0x111] sm:$0xff] %v4671_v6  ;;  %530 = vmatmul.f32.gmra.mxu0 %v4664_v3  ;;  %979 = vmatpush.msrb.mxu3 %v950_v28 }
  0x83   : > { %6276 = vst [vmem:[#allocation26_spill] sm:$0xff] %v4677_v10  ;;  %v4681_v12 = vld [vmem:[#allocation2 + $0x38] sm:$0xff]  ;;  %578 = vmatmul.f32.gmra.mxu2 %v4658_v63  ;;  %v1736_v63 = vld [vmem:[#allocation6 + $0x3d0] sm:$0xff] }
  0x84   : > { %371 = vst [vmem:[#allocation2 + $0x51] sm:$0xff] %v4677_v10  ;;  %980 = vmatpush.msrb.mxu3 %v949_v48 }
  0x85   : > { %679 = vmatmul.f32.gmra.mxu3 %v417_v4  ;;  %6277 = vst [vmem:[#allocation27_spill] sm:$0xff] %v4684_v13  ;;  %v421_v32 = vld [vmem:[#allocation2 + $0x108] sm:$0xff] }
  0x86   : > { %388 = vst [vmem:[#allocation2 + $0x121] sm:$0xff] %v4684_v13  ;;  %1742 = vmatpush.msra.mxu3 %v1741_v15 }
  0x87   : > { %637 = vmatmul.f32.gmra.mxu1 %v4668_v5  ;;  %6278 = vst [vmem:[#allocation28_spill] sm:$0xff] %v4690_v17  ;;  %v4694_v19 = vld [vmem:[#allocation2 + $0x48] sm:$0xff] }
  0x88   : > { %372 = vst [vmem:[#allocation2 + $0x61] sm:$0xff] %v4690_v17 }
  0x89   : > { %6279 = vst [vmem:[#allocation29_spill] sm:$0xff] %v4697_v20  ;;  %v422_v40 = vld [vmem:[#allocation2 + $0x110] sm:$0xff] }
  0x8a   : > { %533 = vmatmul.f32.gmra.mxu0 %v4677_v10  ;;  %389 = vst [vmem:[#allocation2 + $0x129] sm:$0xff] %v4697_v20 }
  0x8b   : > { %581 = vmatmul.f32.gmra.mxu2 %v4671_v6  ;;  %6280 = vst [vmem:[#allocation30_spill] sm:$0xff] %v4703_v24  ;;  %v4707_v26 = vld [vmem:[#allocation2 + $0x50] sm:$0xff] }
  0x8c   : > { %373 = vst [vmem:[#allocation2 + $0x69] sm:$0xff] %v4703_v24 }
  0x8d   : > { %682 = vmatmul.f32.gmra.mxu3 %v418_v11  ;;  %6281 = vst [vmem:[#allocation31_spill] sm:$0xff] %v4710_v27  ;;  %v423_v54 = vld [vmem:[#allocation2 + $0x120] sm:$0xff]  ;;  %v1146_v11 = vld [vmem:[#allocation6 + $0x218] sm:$0xff] }
  0x8e   : > { %390 = vst [vmem:[#allocation2 + $0x139] sm:$0xff] %v4710_v27  ;;  %1171 = vmatpush.msrb.mxu0 %v1146_v11  ;;  %v1547_v11 = vld [vmem:[#allocation6 + $0x378] sm:$0xff] }
  0x8f   : > { %640 = vmatmul.f32.gmra.mxu1 %v4681_v12  ;;  %6282 = vst [vmem:[#allocation32_spill] sm:$0xff] %v4716_v31  ;;  %v4720_v33 = vld [vmem:[#allocation2 + $0x60] sm:$0xff]  ;;  %1548 = vmatpush.msra.mxu2 %v1547_v11 }
  0x90   : > { %374 = vst [vmem:[#allocation2 + $0x79] sm:$0xff] %v4716_v31  ;;  %1172 = vmatpush.msrb.mxu0 %v1145_v29  ;;  %v722_v29 = vld [vmem:[#allocation2 + $0x2] sm:$0xff] }
  0x91   : > { %6283 = vst [vmem:[#allocation33_spill] sm:$0xff] %v4723_v34  ;;  %v424_v2 = vld [vmem:[#allocation2 + $0x128] sm:$0xff] }
  0x92   : > { %536 = vmatmul.f32.gmra.mxu0 %v4690_v17  ;;  %391 = vst [vmem:[#allocation2 + $0x141] sm:$0xff] %v4723_v34 }
  0x93   : > { %584 = vmatmul.f32.gmra.mxu2 %v4684_v13  ;;  %6284 = vst [vmem:[#allocation34_spill] sm:$0xff] %v4729_v39  ;;  %v4733_v42 = vld [vmem:[#allocation2 + $0x68] sm:$0xff] }
  0x94   : > { %375 = vst [vmem:[#allocation2 + $0x81] sm:$0xff] %v4729_v39  ;;  %v1311_v13 = vld [vmem:[#allocation2 + $0x6a] sm:$0xff] }
  0x95   : > { %685 = vmatmul.f32.gmra.mxu3 %v419_v18  ;;  %6285 = vst [vmem:[#allocation35_spill] sm:$0xff] %v4736_v43  ;;  %v425_v18 = vld [vmem:[#allocation2 + $0x138] sm:$0xff] }
  0x96   : > { %392 = vst [vmem:[#allocation2 + $0x151] sm:$0xff] %v4736_v43 }
  0x97   : > { %643 = vmatmul.f32.gmra.mxu1 %v4694_v19  ;;  %6286 = vst [vmem:[#allocation36_spill] sm:$0xff] %v4742_v49  ;;  %v4746_v56 = vld [vmem:[#allocation2 + $0x78] sm:$0xff] }
  0x98   : > { %376 = vst [vmem:[#allocation2 + $0x91] sm:$0xff] %v4742_v49 }
  0x99   : > { %6287 = vst [vmem:[#allocation37_spill] sm:$0xff] %v4749_v57  ;;  %v426_v37 = vld [vmem:[#allocation2 + $0x140] sm:$0xff] }
  0x9a   : > { %539 = vmatmul.f32.gmra.mxu0 %v4703_v24  ;;  %393 = vst [vmem:[#allocation2 + $0x159] sm:$0xff] %v4749_v57 }
  0x9b   : > { %587 = vmatmul.f32.gmra.mxu2 %v4697_v20  ;;  %6288 = vst [vmem:[#allocation38_spill] sm:$0xff] %v4755_v1  ;;  %v4759_v4 = vld [vmem:[#allocation2 + $0x80] sm:$0xff] }
  0x9c   : > { %377 = vst [vmem:[#allocation2 + $0x99] sm:$0xff] %v4755_v1  ;;  %v1312_v6 = vld [vmem:[#allocation2 + $0x7a] sm:$0xff]  ;;  %v1313_v52 = vld [vmem:[#allocation2 + $0x82] sm:$0xff] }
  0x9d   : > { %688 = vmatmul.f32.gmra.mxu3 %v420_v25  ;;  %6289 = vst [vmem:[#allocation39_spill] sm:$0xff] %v4762_v7  ;;  %v1350_v25 = vld [vmem:[#allocation6 + $0x2e8] sm:$0xff] }
  0x9e   : > { %394 = vst [vmem:[#allocation2 + $0x169] sm:$0xff] %v4762_v7  ;;  %1355 = vmatpush.msrb.mxu1 %v1350_v25 }
  0x9f   : > { %646 = vmatmul.f32.gmra.mxu1 %v4707_v26  ;;  %6290 = vst [vmem:[#allocation40_spill] sm:$0xff] %v4769_v16  ;;  %v4772_v21 = vld [vmem:[#allocation2 + $0x90] sm:$0xff] }
  0xa0   : > { %378 = vst [vmem:[#allocation2 + $0xa9] sm:$0xff] %v4769_v16  ;;  %1356 = vmatpush.msrb.mxu1 %v1349_v30  ;;  %v1339_v30 = vld [vmem:[#allocation6 + $0x290] sm:$0xff] }
  0xa1   : > { %6291 = vst [vmem:[#allocation41_spill] sm:$0xff] %v4775_v22  ;;  %v428_v25 = vld [vmem:[#allocation2 + $0x158] sm:$0xff] }
  0xa2   : > { %542 = vmatmul.f32.gmra.mxu0 %v4716_v31  ;;  %395 = vst [vmem:[#allocation2 + $0x171] sm:$0xff] %v4775_v22  ;;  %1357 = vmatpush.msrb.mxu1 %v1348_v35 }
  0xa3   : > { %590 = vmatmul.f32.gmra.mxu2 %v4710_v27  ;;  %v1737_v27 = vld [vmem:[#allocation6 + $0x3d8] sm:$0xff]  ;;  %v1314_v50 = vld [vmem:[#allocation2 + $0x92] sm:$0xff]  ;;  %v1315_v36 = vld [vmem:[#allocation2 + $0x9a] sm:$0xff] }
  0xa4   : > { %1358 = vmatpush.msrb.mxu1 %v1347_v38  ;;  %v1935_v38 = vld [vmem:[#allocation6 + $0x478] sm:$0xff] }
  0xa5   : > { %691 = vmatmul.f32.gmra.mxu3 %v421_v32  ;;  %v4782_v32 = vld [vmem:[%s4540_s28 + $0x68] sm:$0xff] }
  0xa6   : > { %6292 = vst [vmem:[#allocation42_spill] sm:$0xff] %v4782_v32  ;;  %1359 = vmatpush.msrb.mxu1 %v1346_v47 }
  0xa7   : > { %649 = vmatmul.f32.gmra.mxu1 %v4720_v33  ;;  %379 = vst [vmem:[#allocation2 + $0xb1] sm:$0xff] %v4782_v32  ;;  %v4790_v9 = vld [vmem:[#allocation2 + $0xa8] sm:$0xff] }
  0xa8   : > { %1360 = vmatpush.msrb.mxu1 %v1345_v59 }
  0xaa   : > { %545 = vmatmul.f32.gmra.mxu0 %v4729_v39  ;;  %1361 = vmatpush.msrb.mxu1 %v1344_v0  ;;  %v1304_v0 = vld [vmem:[#allocation2 + $0x1a] sm:$0xff] }
  0xab   : > { %593 = vmatmul.f32.gmra.mxu2 %v4723_v34  ;;  %v1310_v34 = vld [vmem:[#allocation2 + $0x62] sm:$0xff] }
  0xac   : > { %1362 = vmatpush.msrb.mxu1 %v1343_v8  ;;  %v1740_v8 = vld [vmem:[#allocation6 + $0x3f0] sm:$0xff] }
  0xad   : > { %694 = vmatmul.f32.gmra.mxu3 %v422_v40  ;;  %v4785_v40 = vld [vmem:[#allocation2 + $0x98] sm:$0xff] }
  0xae   : > { %1363 = vmatpush.msrb.mxu1 %v1342_v14  ;;  %v4797_v35 = vld [vmem:[#allocation2 + $0xb0] sm:$0xff]  ;;  %1743 = vmatpush.msra.mxu3 %v1740_v8 }
  0xaf   : > { %652 = vmatmul.f32.gmra.mxu1 %v4733_v42  ;;  %v430_v14 = vld [vmem:[#allocation2 + $0x170] sm:$0xff] }
  0xb2   : > { %548 = vmatmul.f32.gmra.mxu0 %v4742_v49 }
  0xb3   : > { %596 = vmatmul.f32.gmra.mxu2 %v4736_v43  ;;  %v1309_v43 = vld [vmem:[#allocation2 + $0x52] sm:$0xff] }
  0xb5   : > { %697 = vmatmul.f32.gmra.mxu3 %v423_v54  ;;  %v1144_v54 = vld [vmem:[#allocation6 + $0x208] sm:$0xff] }
  0xb6   : > { %1173 = vmatpush.msrb.mxu0 %v1144_v54  ;;  %v429_v54 = vld [vmem:[#allocation2 + $0x168] sm:$0xff] }
  0xb7   : > { %655 = vmatmul.f32.gmra.mxu1 %v4746_v56 }
  0xb8   : > { %1174 = vmatpush.msrb.mxu0 %v1143_v61  ;;  %v723_v61 = vld [vmem:[#allocation2 + $0xa] sm:$0xff] }
  0xba   : > { %551 = vmatmul.f32.gmra.mxu0 %v4755_v1 }
  0xbb   : > { %599 = vmatmul.f32.gmra.mxu2 %v4749_v57  ;;  %1936 = vmatpush.msra.mxu0 %v1935_v38  ;;  %v1306_v38 = vld [vmem:[#allocation2 + $0x32] sm:$0xff] }
  0xbd   : > { %700 = vmatmul.f32.gmra.mxu3 %v424_v2  ;;  %v427_v2 = vld [vmem:[#allocation2 + $0x150] sm:$0xff] }
  0xbf   : > { %658 = vmatmul.f32.gmra.mxu1 %v4759_v4 }
  0xc2   : > { %554 = vmatmul.f32.gmra.mxu0 %v4769_v16 }
  0xc3   : > { %602 = vmatmul.f32.gmra.mxu2 %v4762_v7  ;;  %v1738_v7 = vld [vmem:[#allocation6 + $0x3e0] sm:$0xff] }
  0xc5   : > { %703 = vmatmul.f32.gmra.mxu3 %v425_v18  ;;  %v1341_v18 = vld [vmem:[#allocation6 + $0x2a0] sm:$0xff] }
  0xc6   : > { %1364 = vmatpush.msrb.mxu1 %v1341_v18 }
  0xc7   : > { %661 = vmatmul.f32.gmra.mxu1 %v4772_v21 }
  0xc8   : > { %1365 = vmatpush.msrb.mxu1 %v1340_v23  ;;  %v1305_v23 = vld [vmem:[#allocation2 + $0x22] sm:$0xff] }
  0xca   : > { %557 = vmatmul.f32.gmra.mxu0 %v4782_v32  ;;  %1366 = vmatpush.msrb.mxu1 %v1339_v30 }
  0xcb   : > { %605 = vmatmul.f32.gmra.mxu2 %v4775_v22  ;;  %v1308_v22 = vld [vmem:[#allocation2 + $0x4a] sm:$0xff] }
  0xcd   : > { %706 = vmatmul.f32.gmra.mxu3 %v426_v37  ;;  %v1338_v37 = vld [vmem:[#allocation6 + $0x288] sm:$0xff] }
  0xce   : > { %1367 = vmatpush.msrb.mxu1 %v1338_v37 }
  0xcf   : > { %664 = vmatmul.f32.gmra.mxu1 %v4785_v40  ;;  %v4795_v28 = vpop.f32.mrf.mxu0 }
  0xd0   : > { %1368 = vmatpush.msrb.mxu1 %v1337_v44  ;;  %v1545_v44 = vld [vmem:[#allocation6 + $0x368] sm:$0xff] }
  0xd2   : > { %1175 = vmatmul.f32.vlgmr.msrb.gmra.mxu0 %v4613_v45  ;;  %v4801_v47 = vpop.f32.mrf.mxu1 }
  0xd3   : > { %787 = vmatmul.f32.vlgmr.msrb.gmra.mxu2 %v722_v29 }
  0xd5   : > { %709 = vmatmul.f32.gmra.mxu3 %v427_v2  ;;  %v1546_v2 = vld [vmem:[#allocation6 + $0x370] sm:$0xff] }
  0xd6   : > { %v561_v48 = vpop.f32.mrf.mxu2  ;;  %1549 = vmatpush.msra.mxu2 %v1546_v2 }
  0xd7   : > { %667 = vmatmul.f32.gmra.mxu1 %v4790_v9  ;;  %v4803_v59 = vpop.f32.mrf.mxu0 }
  0xd8   : > { %1550 = vmatpush.msra.mxu2 %v1545_v44 }
  0xda   : > { %1178 = vmatmul.f32.gmra.mxu0 %v4630_v51  ;;  %v4808_v18 = vpop.f32.mrf.mxu1 }
  0xdb   : > { %790 = vmatmul.f32.gmra.mxu2 %v723_v61 }
  0xdd   : > { %712 = vmatmul.f32.gmra.mxu3 %v428_v25  ;;  %v1934_v25 = vld [vmem:[#allocation6 + $0x470] sm:$0xff] }
  0xde   : > { %v564_v11 = vpop.f32.mrf.mxu2  ;;  %1937 = vmatpush.msra.mxu0 %v1934_v25  ;;  %v1307_v25 = vld [vmem:[#allocation2 + $0x3a] sm:$0xff] }
  0xdf   : > { %670 = vmatmul.f32.gmra.mxu1 %v4797_v35  ;;  %v4806_v15 = vpop.f32.mrf.mxu0 }
  0xe2   : > { %1181 = vmatmul.f32.gmra.mxu0 %v4638_v53  ;;  %v1732_v53 = vld [vmem:[#allocation6 + $0x3b0] sm:$0xff] }
  0xe3   : > { %793 = vmatmul.f32.gmra.mxu2 %v1304_v0 }
  0xe5   : > { %715 = vmatmul.f32.gmra.mxu3 %v429_v54  ;;  %v1739_v54 = vld [vmem:[#allocation6 + $0x3e8] sm:$0xff] }
  0xe6   : > { %v567_v29 = vpop.f32.mrf.mxu2  ;;  %1744 = vmatpush.msra.mxu3 %v1739_v54 }
  0xe7   : > { %1369 = vmatmul.f32.vlgmr.msrb.gmra.mxu1 %v1304_v0  ;;  %v4811_v30 = vpop.f32.mrf.mxu0 }
  0xe8   : > { %1745 = vmatpush.msra.mxu3 %v1738_v7 }
  0xea   : > { %1184 = vmatmul.f32.gmra.mxu0 %v4651_v60  ;;  %1746 = vmatpush.msra.mxu3 %v1737_v27  ;;  %v1127_v60 = vld [vmem:[#allocation2 + $0xe1] sm:$0xff] }
  0xeb   : > { %796 = vmatmul.f32.gmra.mxu2 %v1305_v23 }
  0xec   : > { %1747 = vmatpush.msra.mxu3 %v1736_v63 }
  0xed   : > { %718 = vmatmul.f32.gmra.mxu3 %v430_v14 }
  0xee   : > { %v570_v2 = vpop.f32.mrf.mxu2  ;;  %1748 = vmatpush.msra.mxu3 %v1735_v46 }
  0xef   : > { %1372 = vmatmul.f32.gmra.mxu1 %v1305_v23  ;;  %v4819_v8 = vpop.f32.mrf.mxu0 }
  0xf2   : > { %1187 = vmatmul.f32.gmra.mxu0 %v4664_v3 }
  0xf3   : > { %799 = vmatmul.f32.gmra.mxu2 %v1306_v38 }
  0xf4   : > { %v4813_v37 = vpop.f32.mrf.mxu1 }
  0xf5   : > { %981 = vmatmul.f32.vlgmr.msrb.gmra.mxu3 %v4648_v58  ;;  %v1933_v58 = vld [vmem:[#allocation6 + $0x468] sm:$0xff] }
  0xf6   : > { %1938 = vmatpush.msra.mxu0 %v1933_v58  ;;  %v573_v44 = vpop.f32.mrf.mxu2 }
  0xf7   : > { %1375 = vmatmul.f32.gmra.mxu1 %v1306_v38 }
  0xf8   : > { %v674_v61 = vpop.f32.mrf.mxu3 }
  0xf9   : > { %v4817_v0 = vadd.f32 %v674_v61, %v561_v48  ;;  %v4827_v48 = vpop.f32.mrf.mxu0 }
  0xfa   : > { %1190 = vmatmul.f32.gmra.mxu0 %v4677_v10  ;;  %v1126_v10 = vld [vmem:[#allocation2 + $0xd9] sm:$0xff] }
  0xfb   : > { %802 = vmatmul.f32.gmra.mxu2 %v1307_v25 }
  0xfc   : > { %v4821_v14 = vpop.f32.mrf.mxu1 }
  0xfd   : > { %984 = vmatmul.f32.gmra.mxu3 %v4655_v62  ;;  %v1544_v62 = vld [vmem:[#allocation6 + $0x360] sm:$0xff] }
  0xfe   : > { %1551 = vmatpush.msra.mxu2 %v1544_v62 }
  0xff   : > { %1378 = vmatmul.f32.gmra.mxu1 %v1307_v25 }
 0x100   : > { %v677_v23 = vpop.f32.mrf.mxu3 }
 0x101   : > { %v4825_v54 = vadd.f32 %v677_v23, %v564_v11  ;;  %v576_v11 = vpop.f32.mrf.mxu2  ;;  %v4835_v23 = vpop.f32.mrf.mxu0 }
 0x102   : > { %1193 = vmatmul.f32.gmra.mxu0 %v4690_v17 }
 0x103   : > { %805 = vmatmul.f32.gmra.mxu2 %v1308_v22 }
 0x104   : > { %v4829_v61 = vpop.f32.mrf.mxu1 }
 0x105   : > { %987 = vmatmul.f32.gmra.mxu3 %v4668_v5  ;;  %v1932_v5 = vld [vmem:[#allocation6 + $0x460] sm:$0xff] }
 0x106   : > { %1939 = vmatpush.msra.mxu0 %v1932_v5 }
 0x107   : > { %1381 = vmatmul.f32.gmra.mxu1 %v1308_v22 }
 0x108   : > { %v680_v38 = vpop.f32.mrf.mxu3 }
 0x109   : > { %v4833_v58 = vadd.f32 %v680_v38, %v567_v29  ;;  %v579_v62 = vpop.f32.mrf.mxu2  ;;  %v4843_v29 = vpop.f32.mrf.mxu0 }
 0x10a   : > { %1196 = vmatmul.f32.gmra.mxu0 %v4703_v24 }
 0x10b   : > { %808 = vmatmul.f32.gmra.mxu2 %v1309_v43 }
 0x10c   : > { %v4837_v57 = vpop.f32.mrf.mxu1 }
 0x10d   : > { %990 = vmatmul.f32.gmra.mxu3 %v4681_v12  ;;  %v1543_v12 = vld [vmem:[#allocation6 + $0x358] sm:$0xff] }
 0x10e   : > { %1552 = vmatpush.msra.mxu2 %v1543_v12 }
 0x10f   : > { %1384 = vmatmul.f32.gmra.mxu1 %v1309_v43 }
 0x110   : > { %v683_v7 = vpop.f32.mrf.mxu3 }
 0x111   : > { %v4841_v25 = vadd.f32 %v683_v7, %v570_v2  ;;  %v582_v2 = vpop.f32.mrf.mxu2  ;;  %v4851_v7 = vpop.f32.mrf.mxu0 }
 0x112   : > { %1199 = vmatmul.f32.gmra.mxu0 %v4716_v31  ;;  %v4908_v31 = vld [vmem:[#allocation2 + $0xc2] sm:$0xff] }
 0x113   : > { %811 = vmatmul.f32.gmra.mxu2 %v1310_v34 }
 0x114   : > { %v4845_v38 = vpop.f32.mrf.mxu1 }
 0x115   : > { %993 = vmatmul.f32.gmra.mxu3 %v4694_v19  ;;  %v1931_v19 = vld [vmem:[#allocation6 + $0x458] sm:$0xff] }
 0x116   : > { %1940 = vmatpush.msra.mxu0 %v1931_v19 }
 0x117   : > { %1387 = vmatmul.f32.gmra.mxu1 %v1310_v34 }
 0x118   : > { %v686_v22 = vpop.f32.mrf.mxu3 }
 0x119   : > { %v4849_v5 = vadd.f32 %v686_v22, %v573_v44  ;;  %v585_v12 = vpop.f32.mrf.mxu2  ;;  %v4859_v44 = vpop.f32.mrf.mxu0 }
 0x11a   : > { %1202 = vmatmul.f32.gmra.mxu0 %v4729_v39  ;;  %v1317_v39 = vld [vmem:[#allocation2 + $0xb2] sm:$0xff] }
 0x11b   : > { %814 = vmatmul.f32.gmra.mxu2 %v1311_v13 }
 0x11c   : > { %v4853_v20 = vpop.f32.mrf.mxu1 }
 0x11d   : > { %996 = vmatmul.f32.gmra.mxu3 %v4707_v26  ;;  %v1542_v26 = vld [vmem:[#allocation6 + $0x350] sm:$0xff] }
 0x11e   : > { %1553 = vmatpush.msra.mxu2 %v1542_v26 }
 0x11f   : > { %1390 = vmatmul.f32.gmra.mxu1 %v1311_v13 }
 0x120   : > { %v689_v27 = vpop.f32.mrf.mxu3 }
 0x121   : > { %v4857_v43 = vadd.f32 %v689_v27, %v576_v11  ;;  %v588_v11 = vpop.f32.mrf.mxu2  ;;  %v4867_v27 = vpop.f32.mrf.mxu0 }
 0x122   : > { %1205 = vmatmul.f32.gmra.mxu0 %v4742_v49  ;;  %v1734_v49 = vld [vmem:[#allocation6 + $0x3c0] sm:$0xff] }
 0x123   : > { %817 = vmatmul.f32.gmra.mxu2 %v1312_v6  ;;  %1749 = vmatpush.msra.mxu3 %v1734_v49 }
 0x124   : > { %v4861_v22 = vpop.f32.mrf.mxu1 }
 0x125   : > { %999 = vmatmul.f32.gmra.mxu3 %v4720_v33  ;;  %v1930_v33 = vld [vmem:[#allocation6 + $0x450] sm:$0xff] }
 0x126   : > { %1941 = vmatpush.msra.mxu0 %v1930_v33 }
 0x127   : > { %1393 = vmatmul.f32.gmra.mxu1 %v1312_v6 }
 0x128   : > { %v692_v34 = vpop.f32.mrf.mxu3 }
 0x129   : > { %v4865_v19 = vadd.f32 %v692_v34, %v579_v62  ;;  %v591_v26 = vpop.f32.mrf.mxu2  ;;  %v4875_v62 = vpop.f32.mrf.mxu0 }
 0x12a   : > { %1208 = vmatmul.f32.gmra.mxu0 %v4755_v1  ;;  %v1540_v1 = vld [vmem:[#allocation6 + $0x340] sm:$0xff] }
 0x12b   : > { %820 = vmatmul.f32.gmra.mxu2 %v1313_v52 }
 0x12c   : > { %v4869_v55 = vpop.f32.mrf.mxu1 }
 0x12d   : > { %1002 = vmatmul.f32.gmra.mxu3 %v4733_v42  ;;  %v1541_v42 = vld [vmem:[#allocation6 + $0x348] sm:$0xff] }
 0x12e   : > { %1554 = vmatpush.msra.mxu2 %v1541_v42 }
 0x12f   : > { %1396 = vmatmul.f32.gmra.mxu1 %v1313_v52 }
 0x130   : > { %v695_v63 = vpop.f32.mrf.mxu3  ;;  %1555 = vmatpush.msra.mxu2 %v1540_v1 }
 0x131   : > { %v4873_v13 = vadd.f32 %v695_v63, %v582_v2  ;;  %v594_v2 = vpop.f32.mrf.mxu2  ;;  %v4883_v63 = vpop.f32.mrf.mxu0 }
 0x132   : > { %1211 = vmatmul.f32.gmra.mxu0 %v4769_v16  ;;  %v1124_v16 = vld [vmem:[#allocation2 + $0xc1] sm:$0xff] }
 0x133   : > { %823 = vmatmul.f32.gmra.mxu2 %v1314_v50 }
 0x134   : > { %v4877_v34 = vpop.f32.mrf.mxu1 }
 0x135   : > { %1005 = vmatmul.f32.gmra.mxu3 %v4746_v56  ;;  %v1929_v56 = vld [vmem:[#allocation6 + $0x448] sm:$0xff] }
 0x136   : > { %1942 = vmatpush.msra.mxu0 %v1929_v56 }
 0x137   : > { %1399 = vmatmul.f32.gmra.mxu1 %v1314_v50 }
 0x138   : > { %v698_v6 = vpop.f32.mrf.mxu3 }
 0x139   : > { %v4881_v33 = vadd.f32 %v698_v6, %v585_v12  ;;  %v597_v42 = vpop.f32.mrf.mxu2  ;;  %v4891_v12 = vpop.f32.mrf.mxu0  ;;  %v1316_v6 = vld [vmem:[#allocation2 + $0xaa] sm:$0xff] }
 0x13a   : > { %1214 = vmatmul.f32.gmra.mxu0 %v4782_v32 }
 0x13b   : > { %826 = vmatmul.f32.gmra.mxu2 %v1315_v36 }
 0x13c   : > { %v4885_v41 = vpop.f32.mrf.mxu1 }
 0x13d   : > { %1008 = vmatmul.f32.gmra.mxu3 %v4759_v4 }
 0x13f   : > { %1402 = vmatmul.f32.gmra.mxu1 %v1315_v36 }
 0x140   : > { %v701_v46 = vpop.f32.mrf.mxu3 }
 0x141   : > { %v4889_v52 = vadd.f32 %v701_v46, %v588_v11  ;;  %v600_v11 = vpop.f32.mrf.mxu2  ;;  %v4899_v46 = vpop.f32.mrf.mxu0 }
 0x142   : > { %1217 = vmatmul.f32.gmra.mxu0 %v1124_v16  ;;  %v1733_v16 = vld [vmem:[#allocation6 + $0x3b8] sm:$0xff] }
 0x143   : > { %829 = vmatmul.f32.gmra.mxu2 %v1316_v6  ;;  %1750 = vmatpush.msra.mxu3 %v1733_v16 }
 0x144   : > { %v4895_v4 = vpop.f32.mrf.mxu1 }
 0x145   : > { %1011 = vmatmul.f32.gmra.mxu3 %v4772_v21  ;;  %v1928_v21 = vld [vmem:[#allocation6 + $0x440] sm:$0xff] }
 0x146   : > { %1943 = vmatpush.msra.mxu0 %v1928_v21  ;;  %1751 = vmatpush.msra.mxu3 %v1732_v53  ;;  %v1926_v53 = vld [vmem:[#allocation6 + $0x430] sm:$0xff] }
 0x147   : > { %1405 = vmatmul.f32.gmra.mxu1 %v1316_v6 }
 0x148   : > { %v704_v50 = vpop.f32.mrf.mxu3 }
 0x149   : > { %v4897_v56 = vadd.f32 %v704_v50, %v591_v26  ;;  %v603_v1 = vpop.f32.mrf.mxu2  ;;  %v4906_v26 = vpop.f32.mrf.mxu0  ;;  %v1125_v50 = vld [vmem:[#allocation2 + $0xc9] sm:$0xff] }
 0x14a   : > { %1220 = vmatmul.f32.gmra.mxu0 %v1125_v50 }
 0x14b   : > { %832 = vmatmul.f32.gmra.mxu2 %v1317_v39 }
 0x14c   : > { %v4902_v36 = vpop.f32.mrf.mxu1 }
 0x14d   : > { %1014 = vmatmul.f32.gmra.mxu3 %v4785_v40  ;;  %v1539_v40 = vld [vmem:[#allocation6 + $0x338] sm:$0xff] }
 0x14e   : > { %1556 = vmatpush.msra.mxu2 %v1539_v40 }
 0x14f   : > { %1408 = vmatmul.f32.gmra.mxu1 %v1317_v39  ;;  %v1927_v39 = vld [vmem:[#allocation6 + $0x438] sm:$0xff] }
 0x150   : > { %v707_v32 = vpop.f32.mrf.mxu3  ;;  %1944 = vmatpush.msra.mxu0 %v1927_v39  ;;  %v1538_v39 = vld [vmem:[#allocation6 + $0x330] sm:$0xff] }
 0x151   : > { %v4904_v49 = vadd.f32 %v707_v32, %v594_v2  ;;  %v606_v32 = vpop.f32.mrf.mxu2  ;;  %v2277_v2 = vld [vmem:[#allocation8 + $0xf8] sm:$0xff]  ;;  %v4916_v17 = vpop.f32.mrf.mxu0  ;;  %1557 = vmatpush.msra.mxu2 %v1538_v39 }
 0x152   : > { %2278 = vmatpush.msra.mxu1 %v2277_v2  ;;  %1223 = vmatmul.f32.gmra.mxu0 %v1126_v10  ;;  %v4931_v10 = vld [vmem:[#allocation2 + $0xda] sm:$0xff] }
 0x153   : > { %835 = vmatmul.f32.gmra.mxu2 %v4908_v31  ;;  %6294 = vst [vmem:[#allocation44_spill] sm:$0xff] %v4931_v10  ;;  %1945 = vmatpush.msra.mxu0 %v1926_v53  ;;  %v1731_v53 = vld [vmem:[#allocation6 + $0x3a8] sm:$0xff] }
 0x154   : > { %v4914_v24 = vpop.f32.mrf.mxu1  ;;  %1752 = vmatpush.msra.mxu3 %v1731_v53 }
 0x155   : > { %1017 = vmatmul.f32.gmra.mxu3 %v4790_v9  ;;  %v4918_v9 = vld [vmem:[#allocation2 + $0xca] sm:$0xff] }
 0x157   : > { %1411 = vmatmul.f32.gmra.mxu1 %v4908_v31 }
 0x158   : > { %v710_v6 = vpop.f32.mrf.mxu3 }
 0x159   : > { %v4912_v21 = vadd.f32 %v710_v6, %v597_v42  ;;  %v627_v42 = vadd.f32 %v4801_v47, %v4795_v28  ;;  %v788_v16 = vpop.f32.mrf.mxu2  ;;  %v930_v6 = vld [vmem:[#allocation2 + $0xc0] sm:$0xff]  ;;  %v4927_v3 = vpop.f32.mrf.mxu0  ;;  %v630_v28 = vadd.f32 %v4808_v18, %v4803_v59  ;;  %v633_v59 = vadd.f32 %v4813_v37, %v4806_v15 }
 0x15a   : > { %1226 = vmatmul.f32.gmra.mxu0 %v1127_v60  ;;  %v1128_v60 = vld [vmem:[#allocation2 + $0xf1] sm:$0xff]  ;;  %v636_v15 = vadd.f32 %v4821_v14, %v4811_v30  ;;  %v639_v30 = vadd.f32 %v4829_v61, %v4819_v8 }
 0x15b   : > { %v884_v2 = vadd.f32 %v788_v16, %v627_v42  ;;  %838 = vmatmul.f32.gmra.mxu2 %v4918_v9  ;;  %v931_v16 = vld [vmem:[#allocation2 + $0xc8] sm:$0xff] }
 0x15d   : > { %1020 = vmatmul.f32.gmra.mxu3 %v4797_v35  ;;  %v4929_v35 = vpop.f32.mrf.mxu1 }
 0x15f   : > { %1414 = vmatmul.f32.gmra.mxu1 %v4918_v9 }
 0x160   : > { %v713_v50 = vpop.f32.mrf.mxu3 }
 0x161   : > { %v4925_v40 = vadd.f32 %v713_v50, %v600_v11  ;;  %v791_v42 = vpop.f32.mrf.mxu2  ;;  %v2276_v50 = vld [vmem:[#allocation8 + $0xf0] sm:$0xff] }
 0x162   : > { %v885_v51 = vadd.f32 %v791_v42, %v630_v28  ;;  %2279 = vmatpush.msra.mxu1 %v2276_v50  ;;  %1229 = vmatmul.f32.gmra.mxu0 %v1128_v60  ;;  %v932_v28 = vld [vmem:[#allocation2 + $0xd8] sm:$0xff] }
 0x163   : > { %6293 = vst [vmem:[#allocation43_spill] sm:$0xff] %v4925_v40  ;;  %v4941_v40 = vld [vmem:[#allocation2 + $0xe2] sm:$0xff]  ;;  %841 = vmatmul.f32.gmra.mxu2 %v4931_v10  ;;  %v1129_v50 = vld [vmem:[#allocation2 + $0xf9] sm:$0xff] }
 0x164   : > { %6296 = vst [vmem:[#allocation46_spill] sm:$0xff] %v4941_v40  ;;  %v1537_v60 = vld [vmem:[#allocation6 + $0x328] sm:$0xff] }
 0x165   : > { %1023 = vmatmul.f32.gmra.mxu3 %v930_v6  ;;  %v4939_v6 = vpop.f32.mrf.mxu0  ;;  %v1370_v45 = vpop.f32.mrf.mxu1  ;;  %1558 = vmatpush.msra.mxu2 %v1537_v60  ;;  %v1925_v60 = vld [vmem:[#allocation6 + $0x428] sm:$0xff] }
 0x166   : > { %1946 = vmatpush.msra.mxu0 %v1925_v60  ;;  %v1730_v60 = vld [vmem:[#allocation6 + $0x3a0] sm:$0xff] }
 0x167   : > { %1417 = vmatmul.f32.gmra.mxu1 %v4931_v10  ;;  %1753 = vmatpush.msra.mxu3 %v1730_v60 }
 0x168   : > { %v716_v47 = vpop.f32.mrf.mxu3 }
 0x169   : > { %v4937_v11 = vadd.f32 %v716_v47, %v603_v1  ;;  %v794_v39 = vpop.f32.mrf.mxu2 }
 0x16a   : > { %v886_v47 = vadd.f32 %v794_v39, %v633_v59  ;;  %1232 = vmatmul.f32.gmra.mxu0 %v1129_v50  ;;  %v933_v39 = vld [vmem:[#allocation2 + $0xe0] sm:$0xff]  ;;  %v1130_v50 = vld [vmem:[#allocation2 + $0x109] sm:$0xff] }
 0x16b   : > { %6295 = vst [vmem:[#allocation45_spill] sm:$0xff] %v4937_v11  ;;  %844 = vmatmul.f32.gmra.mxu2 %v4941_v40 }
 0x16d   : > { %1026 = vmatmul.f32.gmra.mxu3 %v931_v16  ;;  %v4949_v42 = vpop.f32.mrf.mxu0  ;;  %v4951_v16 = vld [vmem:[#allocation2 + $0xf2] sm:$0xff]  ;;  %v1373_v11 = vpop.f32.mrf.mxu1 }
 0x16f   : > { %1420 = vmatmul.f32.gmra.mxu1 %v4941_v40  ;;  %v4960_v40 = vld [vmem:[#allocation2 + $0xfa] sm:$0xff] }
 0x170   : > { %v719_v18 = vpop.f32.mrf.mxu3 }
 0x171   : > { %v4947_v1 = vadd.f32 %v719_v18, %v606_v32  ;;  %v797_v59 = vpop.f32.mrf.mxu2  ;;  %v2275_v18 = vld [vmem:[#allocation8 + $0xe8] sm:$0xff] }
 0x172   : > { %2280 = vmatpush.msra.mxu1 %v2275_v18  ;;  %1235 = vmatmul.f32.gmra.mxu0 %v1130_v50  ;;  %v4971_v18 = vld [vmem:[#allocation2 + $0x10a] sm:$0xff] }
 0x173   : > { %6297 = vst [vmem:[#allocation47_spill] sm:$0xff] %v4947_v1  ;;  %v887_v1 = vadd.f32 %v797_v59, %v636_v15  ;;  %847 = vmatmul.f32.gmra.mxu2 %v4951_v16  ;;  %v1536_v50 = vld [vmem:[#allocation6 + $0x320] sm:$0xff] }
 0x174   : > { %1559 = vmatpush.msra.mxu2 %v1536_v50 }
 0x175   : > { %1029 = vmatmul.f32.gmra.mxu3 %v932_v28  ;;  %v4957_v28 = vpop.f32.mrf.mxu0 }
 0x177   : > { %1423 = vmatmul.f32.gmra.mxu1 %v4951_v16 }
 0x178   : > { %v982_v37 = vpop.f32.mrf.mxu3 }
 0x179   : > { %v1078_v32 = vadd.f32 %v982_v37, %v884_v2  ;;  %v1376_v2 = vpop.f32.mrf.mxu1  ;;  %v800_v37 = vpop.f32.mrf.mxu2 }
 0x17b   : > { %v1272_v10 = vadd.f32 %v4916_v17, %v1078_v32  ;;  %v934_v17 = vld [vmem:[#allocation2 + $0xf0] sm:$0xff]  ;;  %v888_v32 = vadd.f32 %v800_v37, %v639_v30  ;;  %850 = vmatmul.f32.gmra.mxu2 %v4960_v40 }
 0x17c   : > { %v2274_v30 = vld [vmem:[#allocation8 + $0xe0] sm:$0xff] }
 0x17d   : > { %1032 = vmatmul.f32.gmra.mxu3 %v933_v39  ;;  %v4962_v53 = vadd.f32 %v1370_v45, %v1272_v10  ;;  %v4968_v59 = vpop.f32.mrf.mxu0  ;;  %v1131_v45 = vld [vmem:[#allocation2 + $0x111] sm:$0xff]  ;;  %2281 = vmatpush.msra.mxu1 %v2274_v30 }
 0x17e   : > { %1238 = vmatmul.f32.gmra.mxu0 %v1131_v45 }
 0x17f   : > { %1426 = vmatmul.f32.gmra.mxu1 %v4960_v40 }
 0x180   : > { %v985_v14 = vpop.f32.mrf.mxu3 }
 0x181   : > { %v1079_v15 = vadd.f32 %v985_v14, %v885_v51  ;;  %v642_v51 = vadd.f32 %v4837_v57, %v4827_v48  ;;  %v935_v14 = vld [vmem:[#allocation2 + $0xf8] sm:$0xff]  ;;  %v1924_v57 = vld [vmem:[#allocation6 + $0x420] sm:$0xff]  ;;  %v645_v48 = vadd.f32 %v4845_v38, %v4835_v23  ;;  %v648_v23 = vadd.f32 %v4853_v20, %v4843_v29 }
 0x182   : > { %1947 = vmatpush.msra.mxu0 %v1924_v57  ;;  %v1729_v57 = vld [vmem:[#allocation6 + $0x398] sm:$0xff]  ;;  %v651_v29 = vadd.f32 %v4861_v22, %v4851_v7  ;;  %v654_v7 = vadd.f32 %v4869_v55, %v4859_v44  ;;  %v1922_v55 = vld [vmem:[#allocation6 + $0x410] sm:$0xff]  ;;  %v657_v44 = vadd.f32 %v4877_v34, %v4867_v27  ;;  %v660_v27 = vadd.f32 %v4885_v41, %v4875_v62  ;;  %v1921_v41 = vld [vmem:[#allocation6 + $0x408] sm:$0xff] }
 0x183   : > { %v1273_v10 = vadd.f32 %v4927_v3, %v1079_v15  ;;  %v803_v3 = vpop.f32.mrf.mxu2  ;;  %v1379_v15 = vpop.f32.mrf.mxu1  ;;  %853 = vmatmul.f32.gmra.mxu2 %v4971_v18  ;;  %1754 = vmatpush.msra.mxu3 %v1729_v57  ;;  %v663_v62 = vadd.f32 %v4895_v4, %v4883_v63  ;;  %v666_v63 = vadd.f32 %v4902_v36, %v4891_v12 }
 0x184   : > { %v669_v12 = vadd.f32 %v4914_v24, %v4899_v46  ;;  %v672_v24 = vadd.f32 %v4929_v35, %v4906_v26 }
 0x185   : > { %1035 = vmatmul.f32.gmra.mxu3 %v934_v17  ;;  %v4973_v39 = vadd.f32 %v1373_v11, %v1273_v10  ;;  %v889_v11 = vadd.f32 %v803_v3, %v642_v51  ;;  %v4979_v37 = vpop.f32.mrf.mxu0  ;;  %v1132_v17 = vld [vmem:[#allocation2 + $0x121] sm:$0xff]  ;;  %v4982_v10 = vld [vmem:[#allocation2 + $0x112] sm:$0xff]  ;;  %v1133_v3 = vld [vmem:[#allocation2 + $0x129] sm:$0xff] }
 0x186   : > { %1241 = vmatmul.f32.gmra.mxu0 %v1132_v17 }
 0x187   : > { %1429 = vmatmul.f32.gmra.mxu1 %v4971_v18 }
 0x188   : > { %v988_v8 = vpop.f32.mrf.mxu3 }
 0x189   : > { %v1080_v61 = vadd.f32 %v988_v8, %v886_v47  ;;  %v936_v8 = vld [vmem:[#allocation2 + $0x108] sm:$0xff] }
 0x18b   : > { %v1274_v45 = vadd.f32 %v4939_v6, %v1080_v61  ;;  %v806_v51 = vpop.f32.mrf.mxu2  ;;  %v1382_v30 = vpop.f32.mrf.mxu1  ;;  %856 = vmatmul.f32.gmra.mxu2 %v4982_v10 }
 0x18c   : > { %v890_v6 = vadd.f32 %v806_v51, %v645_v48  ;;  %v2273_v48 = vld [vmem:[#allocation8 + $0xd8] sm:$0xff]  ;;  %v1134_v51 = vld [vmem:[#allocation2 + $0x139] sm:$0xff] }
 0x18d   : > { %1038 = vmatmul.f32.gmra.mxu3 %v935_v14  ;;  %v4984_v50 = vadd.f32 %v1376_v2, %v1274_v45  ;;  %v4990_v61 = vpop.f32.mrf.mxu0  ;;  %v4993_v14 = vld [vmem:[#allocation2 + $0x122] sm:$0xff]  ;;  %2282 = vmatpush.msra.mxu1 %v2273_v48  ;;  %v5015_v48 = vld [vmem:[#allocation2 + $0x13a] sm:$0xff] }
 0x18e   : > { %1244 = vmatmul.f32.gmra.mxu0 %v1133_v3  ;;  %v1535_v45 = vld [vmem:[#allocation6 + $0x318] sm:$0xff] }
 0x18f   : > { %1432 = vmatmul.f32.gmra.mxu1 %v4982_v10  ;;  %1560 = vmatpush.msra.mxu2 %v1535_v45  ;;  %v5004_v3 = vld [vmem:[#allocation2 + $0x12a] sm:$0xff] }
 0x190   : > { %v991_v47 = vpop.f32.mrf.mxu3  ;;  %v1923_v45 = vld [vmem:[#allocation6 + $0x418] sm:$0xff] }
 0x191   : > { %v1081_v60 = vadd.f32 %v991_v47, %v887_v1  ;;  %v937_v47 = vld [vmem:[#allocation2 + $0x110] sm:$0xff]  ;;  %1948 = vmatpush.msra.mxu0 %v1923_v45 }
 0x193   : > { %v1275_v2 = vadd.f32 %v4949_v42, %v1081_v60  ;;  %v809_v42 = vpop.f32.mrf.mxu2  ;;  %v1385_v20 = vpop.f32.mrf.mxu1  ;;  %859 = vmatmul.f32.gmra.mxu2 %v4993_v14  ;;  %1949 = vmatpush.msra.mxu0 %v1922_v55  ;;  %v2271_v55 = vld [vmem:[#allocation8 + $0xc8] sm:$0xff] }
 0x194   : > { %v891_v60 = vadd.f32 %v809_v42, %v648_v23 }
 0x195   : > { %1041 = vmatmul.f32.gmra.mxu3 %v936_v8  ;;  %v4995_v17 = vadd.f32 %v1379_v15, %v1275_v2  ;;  %v5001_v15 = vpop.f32.mrf.mxu0  ;;  %1950 = vmatpush.msra.mxu0 %v1921_v41  ;;  %v2270_v41 = vld [vmem:[#allocation8 + $0xc0] sm:$0xff] }
 0x196   : > { %1247 = vmatmul.f32.gmra.mxu0 %v1134_v51  ;;  %v1534_v51 = vld [vmem:[#allocation6 + $0x310] sm:$0xff] }
 0x197   : > { %1435 = vmatmul.f32.gmra.mxu1 %v4993_v14  ;;  %1561 = vmatpush.msra.mxu2 %v1534_v51 }
 0x198   : > { %v994_v38 = vpop.f32.mrf.mxu3 }
 0x199   : > { %v1082_v1 = vadd.f32 %v994_v38, %v888_v32 }
 0x19b   : > { %v1276_v8 = vadd.f32 %v4957_v28, %v1082_v1  ;;  %v812_v23 = vpop.f32.mrf.mxu2  ;;  %v938_v28 = vld [vmem:[#allocation2 + $0x120] sm:$0xff]  ;;  %862 = vmatmul.f32.gmra.mxu2 %v5004_v3 }
 0x19c   : > { %v892_v38 = vadd.f32 %v812_v23, %v651_v29  ;;  %v2272_v29 = vld [vmem:[#allocation8 + $0xd0] sm:$0xff]  ;;  %v1136_v23 = vld [vmem:[#allocation2 + $0x151] sm:$0xff] }
 0x19d   : > { %1044 = vmatmul.f32.gmra.mxu3 %v937_v47  ;;  %v5006_v2 = vadd.f32 %v1382_v30, %v1276_v8  ;;  %v5012_v1 = vpop.f32.mrf.mxu0  ;;  %v1135_v30 = vld [vmem:[#allocation2 + $0x141] sm:$0xff]  ;;  %2283 = vmatpush.msra.mxu1 %v2272_v29  ;;  %v5037_v29 = vld [vmem:[#allocation2 + $0x152] sm:$0xff] }
 0x19e   : > { %1250 = vmatmul.f32.gmra.mxu0 %v1135_v30  ;;  %v1728_v8 = vld [vmem:[#allocation6 + $0x390] sm:$0xff] }
 0x19f   : > { %1438 = vmatmul.f32.gmra.mxu1 %v5004_v3  ;;  %1755 = vmatpush.msra.mxu3 %v1728_v8  ;;  %v5026_v30 = vld [vmem:[#allocation2 + $0x142] sm:$0xff] }
 0x1a0   : > { %v997_v32 = vpop.f32.mrf.mxu3  ;;  %2284 = vmatpush.msra.mxu1 %v2271_v55  ;;  %v5068_v55 = vld [vmem:[%s4540_s28 + $0xf8] sm:$0xff] }
 0x1a1   : > { %v1083_v57 = vadd.f32 %v997_v32, %v889_v11  ;;  %v1388_v11 = vpop.f32.mrf.mxu1  ;;  %v939_v32 = vld [vmem:[#allocation2 + $0x128] sm:$0xff]  ;;  %6299 = vst [vmem:[#allocation49_spill] sm:$0xff] %v5068_v55 }
 0x1a2   : > { %397 = vst [vmem:[#allocation2 + $0x189] sm:$0xff] %v5068_v55  ;;  %2285 = vmatpush.msra.mxu1 %v2270_v41  ;;  %v2269_v41 = vld [vmem:[#allocation8 + $0xb8] sm:$0xff] }
 0x1a3   : > { %v1277_v42 = vadd.f32 %v4968_v59, %v1083_v57  ;;  %v815_v45 = vpop.f32.mrf.mxu2  ;;  %865 = vmatmul.f32.gmra.mxu2 %v5015_v48 }
 0x1a4   : > { %2286 = vmatpush.msra.mxu1 %v2269_v41  ;;  %v1500_v41 = vld [vmem:[#allocation2 + $0x38] sm:$0xff] }
 0x1a5   : > { %1047 = vmatmul.f32.gmra.mxu3 %v938_v28  ;;  %v5017_v47 = vadd.f32 %v1385_v20, %v1277_v42  ;;  %v893_v20 = vadd.f32 %v815_v45, %v654_v7  ;;  %v5023_v57 = vpop.f32.mrf.mxu0  ;;  %v940_v7 = vld [vmem:[#allocation2 + $0x138] sm:$0xff] }
 0x1a6   : > { %1253 = vmatmul.f32.gmra.mxu0 %v1136_v23  ;;  %v1533_v23 = vld [vmem:[#allocation6 + $0x308] sm:$0xff] }
 0x1a7   : > { %1441 = vmatmul.f32.gmra.mxu1 %v5015_v48  ;;  %1562 = vmatpush.msra.mxu2 %v1533_v23  ;;  %v942_v23 = vld [vmem:[#allocation2 + $0x150] sm:$0xff] }
 0x1a8   : > { %v1000_v22 = vpop.f32.mrf.mxu3 }
 0x1a9   : > { %v1084_v59 = vadd.f32 %v1000_v22, %v890_v6 }
 0x1ab   : > { %v1278_v28 = vadd.f32 %v4979_v37, %v1084_v59  ;;  %v818_v8 = vpop.f32.mrf.mxu2  ;;  %v1391_v37 = vpop.f32.mrf.mxu1  ;;  %868 = vmatmul.f32.gmra.mxu2 %v5026_v30 }
 0x1ac   : > { %v894_v22 = vadd.f32 %v818_v8, %v657_v44  ;;  %v941_v44 = vld [vmem:[#allocation2 + $0x140] sm:$0xff]  ;;  %v1138_v8 = vld [vmem:[#allocation2 + $0x169] sm:$0xff] }
 0x1ad   : > { %1050 = vmatmul.f32.gmra.mxu3 %v939_v32  ;;  %v5028_v42 = vadd.f32 %v1388_v11, %v1278_v28  ;;  %v5034_v59 = vpop.f32.mrf.mxu0  ;;  %v1137_v11 = vld [vmem:[#allocation2 + $0x159] sm:$0xff] }
 0x1ae   : > { %1256 = vmatmul.f32.gmra.mxu0 %v1137_v11  ;;  %v1727_v28 = vld [vmem:[#allocation6 + $0x388] sm:$0xff]  ;;  %v5053_v11 = vld [vmem:[%s4540_s28 + $0xf0] sm:$0xff]  ;;  %s4336_s28 = scalar_lea.hbm %s4335_s16, 256 }
 0x1af   : > { %1444 = vmatmul.f32.gmra.mxu1 %v5026_v30  ;;  %1756 = vmatpush.msra.mxu3 %v1727_v28  ;;  %6298 = vst [vmem:[#allocation48_spill] sm:$0xff] %v5053_v11  ;;  %p4337_p1 = scmp.ne.s32.totalorder %s4335_s16, %s4336_s28  ;;  %p4342_p2 = scmp.lt.s32.totalorder %s4340_s11, %s4336_s28 }
 0x1b0   : > { %v1003_v6 = vpop.f32.mrf.mxu3  ;;  %396 = vst [vmem:[#allocation2 + $0x181] sm:$0xff] %v5053_v11 }
 0x1b1   : > { %v1085_v51 = vadd.f32 %v1003_v6, %v891_v60  ;;  %p4338_p4 = pnand %p4337_p1, %p4501_p3  ;;  %p4343_p9 = por %p4342_p2, %p4341_p11 }
 0x1b3   : > { %v1279_v45 = vadd.f32 %v4990_v61, %v1085_v51  ;;  %v821_v60 = vpop.f32.mrf.mxu2  ;;  %871 = vmatmul.f32.gmra.mxu2 %v5037_v29  ;;  %p4339_p8 = pneg %p4338_p4 }
 0x1b4   : > { %v895_v6 = vadd.f32 %v821_v60, %v660_v27  ;;  %v5065_v60 = vld [vmem:[#allocation2 + $0x16a] sm:$0xff] }
 0x1b5   : > { %1053 = vmatmul.f32.gmra.mxu3 %v940_v7  ;;  %v5039_v32 = vadd.f32 %v1391_v37, %v1279_v45  ;;  %v5045_v51 = vpop.f32.mrf.mxu0  ;;  %v5050_v37 = vld [vmem:[#allocation2 + $0x15a] sm:$0xff]  ;;  %p4344_p10 = pnand %p4343_p9, %p4339_p8 }
 0x1b6   : > { %1259 = vmatmul.f32.gmra.mxu0 %v1138_v8  ;;  %v1726_v8 = vld [vmem:[#allocation6 + $0x380] sm:$0xff] }
 0x1b7   : > { %1447 = vmatmul.f32.gmra.mxu1 %v5037_v29  ;;  %1757 = vmatpush.msra.mxu3 %v1726_v8  ;;  %v944_v8 = vld [vmem:[#allocation2 + $0x168] sm:$0xff] }
 0x1b8   : > { %v1006_v34 = vpop.f32.mrf.mxu3 }
 0x1b9   : > { %v1086_v61 = vadd.f32 %v1006_v34, %v892_v38  ;;  %v1139_v34 = vld [vmem:[#allocation2 + $0x171] sm:$0xff] }
 0x1bb   : > { %v5048_v7 = vadd.f32 %v5001_v15, %v1086_v61  ;;  %v824_v45 = vpop.f32.mrf.mxu2  ;;  %874 = vmatmul.f32.gmra.mxu2 %v5050_v37 }
 0x1bc   : > { %v896_v28 = vadd.f32 %v824_v45, %v663_v62  ;;  %v943_v62 = vld [vmem:[#allocation2 + $0x158] sm:$0xff] }
 0x1bd   : > { %1056 = vmatmul.f32.gmra.mxu3 %v941_v44  ;;  %v5060_v27 = vpop.f32.mrf.mxu0  ;;  %v1532_v44 = vld [vmem:[#allocation6 + $0x300] sm:$0xff] }
 0x1be   : > { %1262 = vmatmul.f32.gmra.mxu0 %v1139_v34  ;;  %1563 = vmatpush.msra.mxu2 %v1532_v44  ;;  %v1920_v34 = vld [vmem:[#allocation6 + $0x400] sm:$0xff] }
 0x1bf   : > { %1450 = vmatmul.f32.gmra.mxu1 %v5050_v37  ;;  %1951 = vmatpush.msra.mxu0 %v1920_v34 }
 0x1c0   : > { %v1009_v15 = vpop.f32.mrf.mxu3 }
 0x1c1   : > { %v1087_v38 = vadd.f32 %v1009_v15, %v893_v20 }
 0x1c3   : > { %v5063_v61 = vadd.f32 %v5012_v1, %v1087_v38  ;;  %v827_v20 = vpop.f32.mrf.mxu2  ;;  %877 = vmatmul.f32.gmra.mxu2 %v5065_v60 }
 0x1c4   : > { %v897_v15 = vadd.f32 %v827_v20, %v666_v63 }
 0x1c5   : > { %1059 = vmatmul.f32.gmra.mxu3 %v942_v23  ;;  %v1218_v38 = vpop.f32.mrf.mxu0  ;;  %v5078_v23 = vld [vmem:[#allocation2 + $0x172] sm:$0xff] }
 0x1c6   : > { %1265 = vmatmul.f32.gmra.mxu0 %v5053_v11 }
 0x1c7   : > { %1453 = vmatmul.f32.gmra.mxu1 %v5065_v60 }
 0x1c8   : > { %v1012_v4 = vpop.f32.mrf.mxu3 }
 0x1c9   : > { %v1088_v1 = vadd.f32 %v1012_v4, %v894_v22 }
 0x1cb   : > { %v5076_v45 = vadd.f32 %v5023_v57, %v1088_v1  ;;  %v830_v44 = vpop.f32.mrf.mxu2  ;;  %v5088_v1 = vld [vmem:[#allocation2 + $0x182] sm:$0xff]  ;;  %880 = vmatmul.f32.gmra.mxu2 %v5078_v23 }
 0x1cc   : > { %v898_v57 = vadd.f32 %v830_v44, %v669_v12  ;;  %v1887_v12 = vld [vmem:[#allocation2 + $0x32] sm:$0xff]  ;;  %v1335_v44 = vld [vmem:[#allocation2 + $0x18a] sm:$0xff] }
 0x1cd   : > { %1062 = vmatmul.f32.gmra.mxu3 %v943_v62  ;;  %v1221_v63 = vpop.f32.mrf.mxu0  ;;  %v945_v62 = vld [vmem:[#allocation2 + $0x170] sm:$0xff] }
 0x1ce   : > { %1268 = vmatmul.f32.gmra.mxu0 %v5068_v55 }
 0x1cf   : > { %1456 = vmatmul.f32.gmra.mxu1 %v5078_v23 }
 0x1d0   : > { %v1015_v36 = vpop.f32.mrf.mxu3 }
 0x1d1   : > { %v1089_v22 = vadd.f32 %v1015_v36, %v895_v6 }
 0x1d3   : > { %v5086_v4 = vadd.f32 %v5034_v59, %v1089_v22  ;;  %v833_v20 = vpop.f32.mrf.mxu2  ;;  %v1499_v22 = vld [vmem:[#allocation2 + $0x30] sm:$0xff] }
 0x1d4   : > { %v899_v34 = vadd.f32 %v833_v20, %v672_v24  ;;  %1564 = vmatmul.f32.vlgmr.msra.gmra.mxu2 %v1499_v22  ;;  %v1888_v24 = vld [vmem:[#allocation2 + $0x3a] sm:$0xff]  ;;  %v947_v22 = vld [vmem:[#allocation2 + $0x188] sm:$0xff] }
 0x1d5   : > { %1065 = vmatmul.f32.gmra.mxu3 %v944_v8  ;;  %v1224_v59 = vpop.f32.mrf.mxu0 }
 0x1d6   : > { %1952 = vmatmul.f32.vlgmr.msra.gmra.mxu0 %v1887_v12  ;;  %v2268_v12 = vld [vmem:[#allocation8 + $0xb0] sm:$0xff] }
 0x1d7   : > { %1459 = vmatmul.f32.gmra.mxu1 %v5088_v1 }
 0x1d8   : > { %v1018_v46 = vpop.f32.mrf.mxu3  ;;  %2287 = vmatpush.msra.mxu1 %v2268_v12  ;;  %v2267_v12 = vld [vmem:[#allocation8 + $0xa8] sm:$0xff] }
 0x1d9   : > { %v1090_v6 = vadd.f32 %v1018_v46, %v896_v28  ;;  %v946_v28 = vld [vmem:[#allocation2 + $0x180] sm:$0xff] }
 0x1da   : > { %2288 = vmatpush.msra.mxu1 %v2267_v12 }
 0x1db   : > { %v5096_v36 = vadd.f32 %v5045_v51, %v1090_v6  ;;  %v836_v35 = vpop.f32.mrf.mxu2 }
 0x1dc   : > { %v900_v46 = vadd.f32 %v836_v35, %v4817_v0  ;;  %1567 = vmatmul.f32.gmra.mxu2 %v1500_v41  ;;  %v1501_v35 = vld [vmem:[#allocation2 + $0x48] sm:$0xff] }
 0x1dd   : > { %1068 = vmatmul.f32.gmra.mxu3 %v945_v62  ;;  %v1227_v55 = vpop.f32.mrf.mxu0 }
 0x1de   : > { %1955 = vmatmul.f32.gmra.mxu0 %v1888_v24  ;;  %v1693_v24 = vld [vmem:[#allocation2 + $0x31] sm:$0xff] }
 0x1df   : > { %1462 = vmatmul.f32.gmra.mxu1 %v1335_v44 }
 0x1e0   : > { %v1021_v8 = vpop.f32.mrf.mxu3 }
 0x1e1   : > { %v1091_v26 = vadd.f32 %v1021_v8, %v897_v15  ;;  %v1889_v8 = vld [vmem:[#allocation2 + $0x4a] sm:$0xff] }
 0x1e3   : > { %v5100_v20 = vadd.f32 %v5060_v27, %v1091_v26  ;;  %v839_v62 = vpop.f32.mrf.mxu2 }
 0x1e4   : > { %v901_v15 = vadd.f32 %v839_v62, %v4825_v54  ;;  %1570 = vmatmul.f32.gmra.mxu2 %v1501_v35  ;;  %v1502_v54 = vld [vmem:[#allocation2 + $0x50] sm:$0xff]  ;;  %v1891_v35 = vld [vmem:[#allocation2 + $0x62] sm:$0xff] }
 0x1e5   : > { %1071 = vmatmul.f32.gmra.mxu3 %v946_v28  ;;  %v1230_v44 = vpop.f32.mrf.mxu0 }
 0x1e6   : > { %1958 = vmatmul.f32.gmra.mxu0 %v1889_v8 }
 0x1e8   : > { %v1024_v51 = vpop.f32.mrf.mxu3 }
 0x1e9   : > { %v1092_v6 = vadd.f32 %v1024_v51, %v898_v57  ;;  %v1890_v51 = vld [vmem:[#allocation2 + $0x52] sm:$0xff] }
 0x1eb   : > { %v5103_v0 = vadd.f32 %v1218_v38, %v1092_v6  ;;  %v842_v28 = vpop.f32.mrf.mxu2 }
 0x1ec   : > { %v902_v57 = vadd.f32 %v842_v28, %v4833_v58  ;;  %1573 = vmatmul.f32.gmra.mxu2 %v1502_v54  ;;  %v1503_v58 = vld [vmem:[#allocation2 + $0x60] sm:$0xff]  ;;  %v5111_v28 = vpop.f32.mrf.mxu1 }
 0x1ed   : > { %1074 = vmatmul.f32.gmra.mxu3 %v947_v22  ;;  %v1233_v41 = vpop.f32.mrf.mxu0  ;;  %v1694_v22 = vld [vmem:[#allocation2 + $0x39] sm:$0xff] }
 0x1ee   : > { %1961 = vmatmul.f32.gmra.mxu0 %v1890_v51 }
 0x1f0   : > { %v1027_v27 = vpop.f32.mrf.mxu3 }
 0x1f1   : > { %v1093_v26 = vadd.f32 %v1027_v27, %v899_v34 }
 0x1f3   : > { %v5106_v11 = vadd.f32 %v1221_v63, %v1093_v26  ;;  %v845_v62 = vpop.f32.mrf.mxu2 }
 0x1f4   : > { %v903_v8 = vadd.f32 %v845_v62, %v4841_v25  ;;  %1576 = vmatmul.f32.gmra.mxu2 %v1503_v58  ;;  %v1504_v62 = vld [vmem:[#allocation2 + $0x68] sm:$0xff]  ;;  %v1696_v58 = vld [vmem:[#allocation2 + $0x51] sm:$0xff] }
 0x1f5   : > { %1758 = vmatmul.f32.vlgmr.msra.gmra.mxu3 %v1693_v24  ;;  %v1236_v34 = vpop.f32.mrf.mxu0 }
 0x1f6   : > { %1964 = vmatmul.f32.gmra.mxu0 %v1891_v35  ;;  %v2266_v35 = vld [vmem:[#allocation8 + $0xa0] sm:$0xff] }
 0x1f7   : > { %2289 = vmatpush.msra.mxu1 %v2266_v35  ;;  %v2265_v35 = vld [vmem:[#allocation8 + $0x98] sm:$0xff] }
 0x1f8   : > { %v1030_v38 = vpop.f32.mrf.mxu3 }
 0x1f9   : > { %v1094_v6 = vadd.f32 %v1030_v38, %v900_v46  ;;  %v1695_v46 = vld [vmem:[#allocation2 + $0x49] sm:$0xff]  ;;  %2290 = vmatpush.msra.mxu1 %v2265_v35  ;;  %v2264_v35 = vld [vmem:[#allocation8 + $0x90] sm:$0xff] }
 0x1fa   : > { %v1892_v38 = vld [vmem:[#allocation2 + $0x6a] sm:$0xff] }
 0x1fb   : > { %v5109_v27 = vadd.f32 %v1224_v59, %v1094_v6  ;;  %v848_v24 = vpop.f32.mrf.mxu2  ;;  %v5116_v59 = vpop.f32.mrf.mxu1  ;;  %2291 = vmatpush.msra.mxu1 %v2264_v35 }
 0x1fc   : > { %v904_v51 = vadd.f32 %v848_v24, %v4849_v5  ;;  %1579 = vmatmul.f32.gmra.mxu2 %v1504_v62 }
 0x1fd   : > { %6300 = vst [vmem:[#allocation50_spill] sm:$0xff] %v5109_v27  ;;  %1761 = vmatmul.f32.gmra.mxu3 %v1694_v22  ;;  %v1239_v54 = vpop.f32.mrf.mxu0  ;;  %v1893_v27 = vld [vmem:[#allocation2 + $0x7a] sm:$0xff] }
 0x1fe   : > { %1967 = vmatmul.f32.gmra.mxu0 %v1892_v38 }
 0x200   : > { %v1033_v63 = vpop.f32.mrf.mxu3 }
 0x201   : > { %v1095_v26 = vadd.f32 %v1033_v63, %v901_v15 }
 0x203   : > { %v5114_v25 = vadd.f32 %v1227_v55, %v1095_v26  ;;  %v851_v22 = vpop.f32.mrf.mxu2  ;;  %v1505_v55 = vld [vmem:[#allocation2 + $0x78] sm:$0xff]  ;;  %v5121_v26 = vpop.f32.mrf.mxu1 }
 0x204   : > { %v905_v15 = vadd.f32 %v851_v22, %v4857_v43  ;;  %1582 = vmatmul.f32.gmra.mxu2 %v1505_v55  ;;  %v1506_v22 = vld [vmem:[#allocation2 + $0x80] sm:$0xff]  ;;  %v1698_v55 = vld [vmem:[#allocation2 + $0x69] sm:$0xff] }
 0x205   : > { %6301 = vst [vmem:[#allocation51_spill] sm:$0xff] %v5114_v25  ;;  %1764 = vmatmul.f32.gmra.mxu3 %v1695_v46  ;;  %v1242_v63 = vpop.f32.mrf.mxu0  ;;  %v1894_v25 = vld [vmem:[#allocation2 + $0x82] sm:$0xff] }
 0x206   : > { %1970 = vmatmul.f32.gmra.mxu0 %v1893_v27 }
 0x208   : > { %v1036_v6 = vpop.f32.mrf.mxu3 }
 0x209   : > { %v1096_v12 = vadd.f32 %v1036_v6, %v902_v57  ;;  %v1697_v57 = vld [vmem:[#allocation2 + $0x61] sm:$0xff] }
 0x20b   : > { %v5119_v5 = vadd.f32 %v1230_v44, %v1096_v12  ;;  %v854_v38 = vpop.f32.mrf.mxu2 }
 0x20c   : > { %v906_v62 = vadd.f32 %v854_v38, %v4865_v19  ;;  %1585 = vmatmul.f32.gmra.mxu2 %v1506_v22 }
 0x20d   : > { %6302 = vst [vmem:[#allocation52_spill] sm:$0xff] %v5119_v5  ;;  %1767 = vmatmul.f32.gmra.mxu3 %v1696_v58  ;;  %v1245_v6 = vpop.f32.mrf.mxu0  ;;  %v5126_v58 = vpop.f32.mrf.mxu1  ;;  %v1895_v5 = vld [vmem:[#allocation2 + $0x92] sm:$0xff] }
 0x20e   : > { %1973 = vmatmul.f32.gmra.mxu0 %v1894_v25 }
 0x210   : > { %v1039_v24 = vpop.f32.mrf.mxu3 }
 0x211   : > { %v1097_v46 = vadd.f32 %v1039_v24, %v903_v8 }
 0x213   : > { %v5124_v43 = vadd.f32 %v1233_v41, %v1097_v46  ;;  %v857_v27 = vpop.f32.mrf.mxu2  ;;  %v1507_v41 = vld [vmem:[#allocation2 + $0x90] sm:$0xff] }
 0x214   : > { %v907_v8 = vadd.f32 %v857_v27, %v4873_v13  ;;  %1588 = vmatmul.f32.gmra.mxu2 %v1507_v41  ;;  %v1508_v13 = vld [vmem:[#allocation2 + $0x98] sm:$0xff] }
 0x215   : > { %6303 = vst [vmem:[#allocation53_spill] sm:$0xff] %v5124_v43  ;;  %1770 = vmatmul.f32.gmra.mxu3 %v1697_v57  ;;  %v1248_v24 = vpop.f32.mrf.mxu0  ;;  %v5134_v27 = vpop.f32.mrf.mxu1 }
 0x216   : > { %1976 = vmatmul.f32.gmra.mxu0 %v1895_v5 }
 0x218   : > { %v1042_v44 = vpop.f32.mrf.mxu3 }
 0x219   : > { %v1098_v12 = vadd.f32 %v1042_v44, %v904_v51  ;;  %v1699_v51 = vld [vmem:[#allocation2 + $0x79] sm:$0xff] }
 0x21a   : > { %v1896_v44 = vld [vmem:[#allocation2 + $0x9a] sm:$0xff] }
 0x21b   : > { %v5129_v19 = vadd.f32 %v1236_v34, %v1098_v12  ;;  %v860_v38 = vpop.f32.mrf.mxu2 }
 0x21c   : > { %v908_v57 = vadd.f32 %v860_v38, %v4881_v33  ;;  %1591 = vmatmul.f32.gmra.mxu2 %v1508_v13 }
 0x21d   : > { %1773 = vmatmul.f32.gmra.mxu3 %v1698_v55  ;;  %v1251_v22 = vpop.f32.mrf.mxu0  ;;  %v1700_v55 = vld [vmem:[#allocation2 + $0x81] sm:$0xff] }
 0x21e   : > { %1979 = vmatmul.f32.gmra.mxu0 %v1896_v44 }
 0x220   : > { %v1045_v25 = vpop.f32.mrf.mxu3 }
 0x221   : > { %v1099_v46 = vadd.f32 %v1045_v25, %v905_v15  ;;  %v1897_v25 = vld [vmem:[#allocation2 + $0xaa] sm:$0xff] }
 0x223   : > { %v5132_v43 = vadd.f32 %v1239_v54, %v1099_v46  ;;  %v863_v5 = vpop.f32.mrf.mxu2  ;;  %v1509_v54 = vld [vmem:[#allocation2 + $0xa8] sm:$0xff]  ;;  %v5139_v46 = vpop.f32.mrf.mxu1 }
 0x224   : > { %v909_v15 = vadd.f32 %v863_v5, %v4889_v52  ;;  %1594 = vmatmul.f32.gmra.mxu2 %v1509_v54  ;;  %v1510_v5 = vld [vmem:[#allocation2 + $0xb0] sm:$0xff]  ;;  %v1702_v54 = vld [vmem:[#allocation2 + $0x99] sm:$0xff] }
 0x225   : > { %6304 = vst [vmem:[#allocation54_spill] sm:$0xff] %v5132_v43  ;;  %1776 = vmatmul.f32.gmra.mxu3 %v1699_v51  ;;  %v1254_v41 = vpop.f32.mrf.mxu0  ;;  %v1898_v43 = vld [vmem:[#allocation2 + $0xb2] sm:$0xff] }
 0x226   : > { %1982 = vmatmul.f32.gmra.mxu0 %v1897_v25  ;;  %v2263_v25 = vld [vmem:[#allocation8 + $0x88] sm:$0xff] }
 0x227   : > { %2292 = vmatpush.msra.mxu1 %v2263_v25  ;;  %v1704_v25 = vld [vmem:[#allocation2 + $0xb1] sm:$0xff] }
 0x228   : > { %v1048_v34 = vpop.f32.mrf.mxu3 }
 0x229   : > { %v1100_v12 = vadd.f32 %v1048_v34, %v906_v62  ;;  %v1701_v62 = vld [vmem:[#allocation2 + $0x91] sm:$0xff] }
 0x22b   : > { %v5137_v33 = vadd.f32 %v1242_v63, %v1100_v12  ;;  %v866_v44 = vpop.f32.mrf.mxu2  ;;  %v5144_v63 = vpop.f32.mrf.mxu1 }
 0x22c   : > { %v910_v13 = vadd.f32 %v866_v44, %v4897_v56  ;;  %1597 = vmatmul.f32.gmra.mxu2 %v1510_v5  ;;  %v1511_v44 = vld [vmem:[#allocation2 + $0xc0] sm:$0xff] }
 0x22d   : > { %1779 = vmatmul.f32.gmra.mxu3 %v1700_v55  ;;  %v1257_v34 = vpop.f32.mrf.mxu0 }
 0x22e   : > { %1985 = vmatmul.f32.gmra.mxu0 %v1898_v43 }
 0x230   : > { %v1051_v38 = vpop.f32.mrf.mxu3 }
 0x231   : > { %v1101_v51 = vadd.f32 %v1051_v38, %v907_v8 }
 0x233   : > { %v5142_v52 = vadd.f32 %v1245_v6, %v1101_v51  ;;  %v869_v55 = vpop.f32.mrf.mxu2 }
 0x234   : > { %v911_v8 = vadd.f32 %v869_v55, %v4904_v49  ;;  %1600 = vmatmul.f32.gmra.mxu2 %v1511_v44  ;;  %v1512_v49 = vld [vmem:[#allocation2 + $0xc8] sm:$0xff]  ;;  %v2262_v55 = vld [vmem:[#allocation8 + $0x80] sm:$0xff] }
 0x235   : > { %6305 = vst [vmem:[#allocation55_spill] sm:$0xff] %v5142_v52  ;;  %1782 = vmatmul.f32.gmra.mxu3 %v1701_v62  ;;  %v1260_v38 = vpop.f32.mrf.mxu0  ;;  %v5150_v62 = vpop.f32.mrf.mxu1  ;;  %2293 = vmatpush.msra.mxu1 %v2262_v55  ;;  %v1514_v55 = vld [vmem:[#allocation2 + $0xe0] sm:$0xff] }
 0x236   : > { %1988 = vmatmul.f32.gmra.mxu0 %v4908_v31 }
 0x238   : > { %v1054_v12 = vpop.f32.mrf.mxu3 }
 0x239   : > { %v1102_v35 = vadd.f32 %v1054_v12, %v908_v57  ;;  %v1703_v57 = vld [vmem:[#allocation2 + $0xa9] sm:$0xff] }
 0x23b   : > { %v5147_v56 = vadd.f32 %v1248_v24, %v1102_v35  ;;  %v872_v51 = vpop.f32.mrf.mxu2 }
 0x23c   : > { %v912_v5 = vadd.f32 %v872_v51, %v4912_v21  ;;  %1603 = vmatmul.f32.gmra.mxu2 %v1512_v49  ;;  %v1513_v21 = vld [vmem:[#allocation2 + $0xd8] sm:$0xff]  ;;  %v2552_v49 = vld [vmem:[#allocation8 + $0x178] sm:$0xff] }
 0x23d   : > { %6306 = vst [vmem:[#allocation56_spill] sm:$0xff] %v5147_v56  ;;  %1785 = vmatmul.f32.gmra.mxu3 %v1702_v54  ;;  %v1263_v12 = vpop.f32.mrf.mxu0 }
 0x23e   : > { %1991 = vmatmul.f32.gmra.mxu0 %v4918_v9  ;;  %v2228_v9 = vld [vmem:[#allocation8 + $0x78] sm:$0xff]  ;;  %2553 = vmatpush.msrb.mxu3 %v2552_v49 }
 0x23f   : > { %2391 = vmatpush.msrb.mxu2 %v2228_v9  ;;  %v2230_v49 = vld [vmem:[#allocation2 + $0x9] sm:$0xff] }
 0x240   : > { %v1057_v6 = vpop.f32.mrf.mxu3 }
 0x241   : > { %v1103_v43 = vadd.f32 %v1057_v6, %v909_v15  ;;  %v6308_v15 = vld [vmem:[#allocation43_spill] sm:$0xff] }
 0x243   : > { %v5153_v52 = vadd.f32 %v1251_v22, %v1103_v43  ;;  %v875_v31 = vpop.f32.mrf.mxu2  ;;  %v5161_v22 = vpop.f32.mrf.mxu1  ;;  %v6310_v43 = vld [vmem:[#allocation44_spill] sm:$0xff] }
 0x244   : > { %v913_v54 = vadd.f32 %v875_v31, %v6308_v15  ;;  %1606 = vmatmul.f32.gmra.mxu2 %v1513_v21  ;;  %v6311_v31 = vld [vmem:[#allocation45_spill] sm:$0xff] }
 0x245   : > { %6307 = vst [vmem:[#allocation57_spill] sm:$0xff] %v5153_v52  ;;  %1788 = vmatmul.f32.gmra.mxu3 %v1703_v57  ;;  %v5157_v44 = vpop.f32.mrf.mxu0 }
 0x246   : > { %1994 = vmatmul.f32.gmra.mxu0 %v6310_v43 }
 0x248   : > { %v1060_v24 = vpop.f32.mrf.mxu3 }
 0x249   : > { %v1104_v35 = vadd.f32 %v1060_v24, %v910_v13  ;;  %v1705_v24 = vld [vmem:[#allocation2 + $0xc1] sm:$0xff] }
 0x24b   : > { %v5159_v6 = vadd.f32 %v1254_v41, %v1104_v35  ;;  %v878_v57 = vpop.f32.mrf.mxu2  ;;  %v2229_v41 = vld [vmem:[#allocation2 + $0x1] sm:$0xff]  ;;  %v5170_v21 = vpop.f32.mrf.mxu1 }
 0x24c   : > { %v914_v15 = vadd.f32 %v878_v57, %v6311_v31  ;;  %2294 = vmatmul.f32.vlgmr.msra.gmra.mxu1 %v2229_v41  ;;  %1609 = vmatmul.f32.gmra.mxu2 %v1514_v55  ;;  %v2746_v55 = vld [vmem:[#allocation8 + $0x1f8] sm:$0xff] }
 0x24d   : > { %6309 = vst [vmem:[#allocation43_spill] sm:$0xff] %v5159_v6  ;;  %1791 = vmatmul.f32.gmra.mxu3 %v1704_v25  ;;  %v5165_v52 = vpop.f32.mrf.mxu0  ;;  %v6312_v25 = vld [vmem:[#allocation46_spill] sm:$0xff]  ;;  %v6313_v6 = vld [vmem:[#allocation47_spill] sm:$0xff]  ;;  %2747 = vmatpush.msrb.mxu0 %v2746_v55 }
 0x24e   : > { %1997 = vmatmul.f32.gmra.mxu0 %v6312_v25  ;;  %v2940_v25 = vld [vmem:[#allocation8 + $0x278] sm:$0xff] }
 0x24f   : > { %2941 = vmatpush.msrb.mxu1 %v2940_v25 }
 0x250   : > { %v1063_v13 = vpop.f32.mrf.mxu3 }
 0x251   : > { %v1105_v51 = vadd.f32 %v1063_v13, %v911_v8  ;;  %v1706_v13 = vld [vmem:[#allocation2 + $0xc9] sm:$0xff] }
 0x253   : > { %v5167_v35 = vadd.f32 %v1257_v34, %v1105_v51  ;;  %v881_v9 = vpop.f32.mrf.mxu2  ;;  %v1515_v34 = vld [vmem:[#allocation2 + $0xf0] sm:$0xff]  ;;  %v5178_v51 = vpop.f32.mrf.mxu1 }
 0x254   : > { %v915_v57 = vadd.f32 %v881_v9, %v6313_v6  ;;  %2297 = vmatmul.f32.gmra.mxu1 %v2230_v49  ;;  %1612 = vmatmul.f32.gmra.mxu2 %v1515_v34  ;;  %v1707_v6 = vld [vmem:[#allocation2 + $0xd9] sm:$0xff] }
 0x255   : > { %1794 = vmatmul.f32.gmra.mxu3 %v1705_v24  ;;  %v5173_v31 = vpop.f32.mrf.mxu0  ;;  %v2551_v49 = vld [vmem:[#allocation8 + $0x170] sm:$0xff] }
 0x256   : > { %2000 = vmatmul.f32.gmra.mxu0 %v4951_v16  ;;  %2554 = vmatpush.msrb.mxu3 %v2551_v49 }
 0x258   : > { %v1066_v8 = vpop.f32.mrf.mxu3 }
 0x259   : > { %v1106_v43 = vadd.f32 %v1066_v8, %v912_v5  ;;  %v2227_v8 = vld [vmem:[#allocation8 + $0x70] sm:$0xff] }
 0x25a   : > { %2392 = vmatpush.msrb.mxu2 %v2227_v8 }
 0x25b   : > { %v5175_v56 = vadd.f32 %v1260_v38, %v1106_v43  ;;  %v1565_v5 = vpop.f32.mrf.mxu2  ;;  %v1516_v43 = vld [vmem:[#allocation2 + $0xf8] sm:$0xff]  ;;  %v5185_v34 = vpop.f32.mrf.mxu1 }
 0x25c   : > { %1615 = vmatmul.f32.gmra.mxu2 %v1516_v43  ;;  %v2226_v43 = vld [vmem:[#allocation8 + $0x68] sm:$0xff] }
 0x25d   : > { %1797 = vmatmul.f32.gmra.mxu3 %v1706_v13  ;;  %v5180_v9 = vpop.f32.mrf.mxu0  ;;  %2393 = vmatpush.msrb.mxu2 %v2226_v43  ;;  %v1519_v43 = vld [vmem:[#allocation2 + $0x120] sm:$0xff] }
 0x25e   : > { %2003 = vmatmul.f32.gmra.mxu0 %v4960_v40 }
 0x260   : > { %v1069_v24 = vpop.f32.mrf.mxu3 }
 0x261   : > { %v1107_v41 = vadd.f32 %v1069_v24, %v913_v54  ;;  %v1708_v24 = vld [vmem:[#allocation2 + $0xe1] sm:$0xff] }
 0x263   : > { %v5182_v38 = vadd.f32 %v1263_v12, %v1107_v41  ;;  %v1568_v54 = vpop.f32.mrf.mxu2  ;;  %v1517_v12 = vld [vmem:[#allocation2 + $0x108] sm:$0xff] }
 0x264   : > { %1618 = vmatmul.f32.gmra.mxu2 %v1517_v12  ;;  %v5205_v12 = vld [vmem:[%s6218_s2] ss:$0 sm:$0xff] }
 0x265   : > { %6314 = vst [vmem:[#allocation44_spill] sm:$0xff] %v5182_v38  ;;  %1800 = vmatmul.f32.gmra.mxu3 %v1707_v6  ;;  %v5187_v55 = vpop.f32.mrf.mxu0  ;;  %v2939_v6 = vld [vmem:[#allocation8 + $0x270] sm:$0xff] }
 0x266   : > { %2006 = vmatmul.f32.gmra.mxu0 %v4971_v18  ;;  %2942 = vmatpush.msrb.mxu1 %v2939_v6  ;;  %v1661_v18 = vadd.f32 %v1565_v5, %v4962_v53 }
 0x268   : > { %v1072_v16 = vpop.f32.mrf.mxu3 }
 0x269   : > { %v1108_v13 = vadd.f32 %v1072_v16, %v914_v15  ;;  %v2745_v15 = vld [vmem:[#allocation8 + $0x1f0] sm:$0xff]  ;;  %v1709_v16 = vld [vmem:[#allocation2 + $0xf1] sm:$0xff] }
 0x26a   : > { %2748 = vmatpush.msrb.mxu0 %v2745_v15 }
 0x26b   : > { %v5190_v25 = vadd.f32 %v5157_v44, %v1108_v13  ;;  %v1571_v8 = vpop.f32.mrf.mxu2  ;;  %v1518_v44 = vld [vmem:[#allocation2 + $0x110] sm:$0xff]  ;;  %v5198_v13 = vpop.f32.mrf.mxu1 }
 0x26c   : > { %1621 = vmatmul.f32.gmra.mxu2 %v1518_v44 }
 0x26d   : > { %1803 = vmatmul.f32.gmra.mxu3 %v1708_v24  ;;  %v5193_v38 = vpop.f32.mrf.mxu0 }
 0x26e   : > { %2009 = vmatmul.f32.gmra.mxu0 %v4982_v10  ;;  %v1662_v10 = vadd.f32 %v1568_v54, %v4973_v39 }
 0x270   : > { %v1075_v40 = vpop.f32.mrf.mxu3 }
 0x271   : > { %v1109_v41 = vadd.f32 %v1075_v40, %v915_v57 }
 0x273   : > { %v5196_v49 = vadd.f32 %v5165_v52, %v1109_v41  ;;  %v1574_v40 = vpop.f32.mrf.mxu2  ;;  %v2550_v52 = vld [vmem:[#allocation8 + $0x168] sm:$0xff]  ;;  %v5213_v5 = vpop.f32.mrf.mxu1 }
 0x274   : > { %v1710_v41 = vld [vmem:[#allocation2 + $0xf9] sm:$0xff]  ;;  %2555 = vmatpush.msrb.mxu3 %v2550_v52  ;;  %1624 = vmatmul.f32.gmra.mxu2 %v1519_v43 }
 0x275   : > { %6315 = vst [vmem:[#allocation45_spill] sm:$0xff] %v5196_v49  ;;  %1806 = vmatmul.f32.gmra.mxu3 %v1709_v16  ;;  %v5207_v15 = vpop.f32.mrf.mxu0  ;;  %v2744_v52 = vld [vmem:[#allocation8 + $0x1e8] sm:$0xff] }
 0x276   : > { %2012 = vmatmul.f32.gmra.mxu0 %v4993_v14  ;;  %v2938_v49 = vld [vmem:[#allocation8 + $0x268] sm:$0xff]  ;;  %v1520_v14 = vld [vmem:[#allocation2 + $0x128] sm:$0xff] }
 0x277   : > { %2749 = vmatpush.msrb.mxu0 %v2744_v52  ;;  %2943 = vmatpush.msrb.mxu1 %v2938_v49 }
 0x278   : > { %v1759_v57 = vpop.f32.mrf.mxu3 }
 0x279   : > { %v1855_v24 = vadd.f32 %v1759_v57, %v1661_v18 }
 0x27b   : > { %v2049_v6 = vadd.f32 %v5173_v31, %v1855_v24  ;;  %v1577_v57 = vpop.f32.mrf.mxu2  ;;  %v2225_v31 = vld [vmem:[#allocation8 + $0x60] sm:$0xff] }
 0x27c   : > { %v1711_v24 = vld [vmem:[#allocation2 + $0x109] sm:$0xff]  ;;  %2394 = vmatpush.msrb.mxu2 %v2225_v31  ;;  %v1521_v31 = vld [vmem:[#allocation2 + $0x138] sm:$0xff] }
 0x27d   : > { %v2084_v53 = vadd.f32 %v5205_v12, %v2049_v6  ;;  %1809 = vmatmul.f32.gmra.mxu3 %v1710_v41  ;;  %v5215_v6 = vpop.f32.mrf.mxu0  ;;  %v1663_v41 = vadd.f32 %v1571_v8, %v4984_v50  ;;  %1627 = vmatmul.f32.gmra.mxu2 %v1520_v14 }
 0x27e   : > { %2015 = vmatmul.f32.gmra.mxu0 %v5004_v3  ;;  %v1664_v3 = vadd.f32 %v1574_v40, %v4995_v17 }
 0x27f   : > { %v2116_v16 = vmax.f32 %v2084_v53, 0.0  ;;  %v5221_v53 = vpop.f32.mrf.mxu1 }
 0x280   : > { %v1762_v44 = vpop.f32.mrf.mxu3 }
 0x281   : > { %2148 = vst [vmem:[#allocation2 + $0x19] sm:$0xff] %v2116_v16  ;;  %v1856_v18 = vadd.f32 %v1762_v44, %v1662_v10  ;;  %2300 = vmatmul.f32.gmra.mxu1 %v2116_v16  ;;  %v2549_v44 = vld [vmem:[#allocation8 + $0x160] sm:$0xff] }
 0x282   : > { %2556 = vmatpush.msrb.mxu3 %v2549_v44  ;;  %v1665_v44 = vadd.f32 %v1577_v57, %v5006_v2 }
 0x283   : > { %v2050_v39 = vadd.f32 %v5180_v9, %v1856_v18  ;;  %v1580_v49 = vpop.f32.mrf.mxu2  ;;  %v1712_v9 = vld [vmem:[#allocation2 + $0x111] sm:$0xff] }
 0x285   : > { %v2085_v54 = vadd.f32 %v5205_v12, %v2050_v39  ;;  %1812 = vmatmul.f32.gmra.mxu3 %v1711_v24  ;;  %v5223_v18 = vpop.f32.mrf.mxu0  ;;  %1630 = vmatmul.f32.gmra.mxu2 %v1521_v31 }
 0x286   : > { %2018 = vmatmul.f32.gmra.mxu0 %v5015_v48  ;;  %v1522_v48 = vld [vmem:[#allocation2 + $0x140] sm:$0xff] }
 0x287   : > { %v2117_v43 = vmax.f32 %v2085_v54, 0.0  ;;  %v2743_v54 = vld [vmem:[#allocation8 + $0x1e0] sm:$0xff] }
 0x288   : > { %v1765_v10 = vpop.f32.mrf.mxu3  ;;  %2750 = vmatpush.msrb.mxu0 %v2743_v54 }
 0x289   : > { %2149 = vst [vmem:[#allocation2 + $0x21] sm:$0xff] %v2117_v43  ;;  %v1857_v16 = vadd.f32 %v1765_v10, %v1663_v41  ;;  %2303 = vmatmul.f32.gmra.mxu1 %v2117_v43  ;;  %v2937_v41 = vld [vmem:[#allocation8 + $0x260] sm:$0xff]  ;;  %v2224_v43 = vld [vmem:[#allocation8 + $0x58] sm:$0xff]  ;;  %v5229_v10 = vpop.f32.mrf.mxu1 }
 0x28a   : > { %2944 = vmatpush.msrb.mxu1 %v2937_v41  ;;  %2395 = vmatpush.msrb.mxu2 %v2224_v43 }
 0x28b   : > { %v2051_v52 = vadd.f32 %v5187_v55, %v1857_v16  ;;  %v1583_v14 = vpop.f32.mrf.mxu2  ;;  %v1713_v55 = vld [vmem:[#allocation2 + $0x121] sm:$0xff] }
 0x28d   : > { %v2086_v50 = vadd.f32 %v5205_v12, %v2051_v52  ;;  %1815 = vmatmul.f32.gmra.mxu3 %v1712_v9  ;;  %v5231_v16 = vpop.f32.mrf.mxu0  ;;  %1633 = vmatmul.f32.gmra.mxu2 %v1522_v48  ;;  %v2936_v48 = vld [vmem:[#allocation8 + $0x258] sm:$0xff] }
 0x28e   : > { %2021 = vmatmul.f32.gmra.mxu0 %v5026_v30  ;;  %v1666_v30 = vadd.f32 %v1580_v49, %v5017_v47  ;;  %2945 = vmatpush.msrb.mxu1 %v2936_v48  ;;  %v1524_v47 = vld [vmem:[#allocation2 + $0x158] sm:$0xff]  ;;  %v1667_v49 = vadd.f32 %v1583_v14, %v5028_v42 }
 0x28f   : > { %v2118_v8 = vmax.f32 %v2086_v50, 0.0 }
 0x290   : > { %v1768_v24 = vpop.f32.mrf.mxu3 }
 0x291   : > { %2150 = vst [vmem:[#allocation2 + $0x31] sm:$0xff] %v2118_v8  ;;  %v1858_v39 = vadd.f32 %v1768_v24, %v1664_v3  ;;  %2306 = vmatmul.f32.gmra.mxu1 %v2118_v8  ;;  %v2548_v3 = vld [vmem:[#allocation8 + $0x158] sm:$0xff]  ;;  %v5240_v54 = vpop.f32.mrf.mxu1 }
 0x292   : > { %v1714_v8 = vld [vmem:[#allocation2 + $0x129] sm:$0xff]  ;;  %2557 = vmatpush.msrb.mxu3 %v2548_v3 }
 0x293   : > { %v2052_v17 = vadd.f32 %v5193_v38, %v1858_v39  ;;  %v1586_v50 = vpop.f32.mrf.mxu2  ;;  %v1523_v39 = vld [vmem:[#allocation2 + $0x150] sm:$0xff] }
 0x295   : > { %v2087_v40 = vadd.f32 %v5205_v12, %v2052_v17  ;;  %1818 = vmatmul.f32.gmra.mxu3 %v1713_v55  ;;  %v5237_v38 = vpop.f32.mrf.mxu0  ;;  %1636 = vmatmul.f32.gmra.mxu2 %v1523_v39  ;;  %v2742_v17 = vld [vmem:[#allocation8 + $0x1d8] sm:$0xff]  ;;  %v2547_v39 = vld [vmem:[#allocation8 + $0x150] sm:$0xff] }
 0x296   : > { %2024 = vmatmul.f32.gmra.mxu0 %v5037_v29  ;;  %2558 = vmatpush.msrb.mxu3 %v2547_v39 }
 0x297   : > { %v2119_v9 = vmax.f32 %v2087_v40, 0.0  ;;  %v1715_v40 = vld [vmem:[#allocation2 + $0x139] sm:$0xff]  ;;  %2751 = vmatpush.msrb.mxu0 %v2742_v17 }
 0x298   : > { %v1771_v52 = vpop.f32.mrf.mxu3 }
 0x299   : > { %2151 = vst [vmem:[#allocation2 + $0x39] sm:$0xff] %v2119_v9  ;;  %v1859_v31 = vadd.f32 %v1771_v52, %v1665_v44  ;;  %2309 = vmatmul.f32.gmra.mxu1 %v2119_v9  ;;  %v5251_v52 = vpop.f32.mrf.mxu1 }
 0x29b   : > { %v2053_v24 = vadd.f32 %v5207_v15, %v1859_v31  ;;  %v1589_v55 = vpop.f32.mrf.mxu2  ;;  %v2223_v15 = vld [vmem:[#allocation8 + $0x50] sm:$0xff] }
 0x29c   : > { %2396 = vmatpush.msrb.mxu2 %v2223_v15  ;;  %v2741_v15 = vld [vmem:[#allocation8 + $0x1d0] sm:$0xff] }
 0x29d   : > { %v2088_v2 = vadd.f32 %v5205_v12, %v2053_v24  ;;  %1821 = vmatmul.f32.gmra.mxu3 %v1714_v8  ;;  %v5245_v44 = vpop.f32.mrf.mxu0  ;;  %1639 = vmatmul.f32.gmra.mxu2 %v1524_v47 }
 0x29e   : > { %2027 = vmatmul.f32.gmra.mxu0 %v5050_v37  ;;  %v1668_v37 = vadd.f32 %v1586_v50, %v5039_v32  ;;  %v1474_v32 = vadd.f32 %v5111_v28, %v5048_v7  ;;  %v1526_v50 = vld [vmem:[#allocation2 + $0x170] sm:$0xff]  ;;  %v1718_v28 = vld [vmem:[#allocation2 + $0x159] sm:$0xff] }
 0x29f   : > { %v2120_v57 = vmax.f32 %v2088_v2, 0.0  ;;  %2752 = vmatpush.msrb.mxu0 %v2741_v15  ;;  %v2740_v15 = vld [vmem:[#allocation8 + $0x1c8] sm:$0xff] }
 0x2a0   : > { %v1774_v41 = vpop.f32.mrf.mxu3 }
 0x2a1   : > { %2152 = vst [vmem:[#allocation2 + $0x49] sm:$0xff] %v2120_v57  ;;  %v1860_v43 = vadd.f32 %v1774_v41, %v1666_v30  ;;  %2312 = vmatmul.f32.gmra.mxu1 %v2120_v57  ;;  %v1525_v57 = vld [vmem:[#allocation2 + $0x168] sm:$0xff]  ;;  %v5259_v41 = vpop.f32.mrf.mxu1  ;;  %2753 = vmatpush.msrb.mxu0 %v2740_v15 }
 0x2a3   : > { %v2054_v9 = vadd.f32 %v5215_v6, %v1860_v43  ;;  %v1592_v24 = vpop.f32.mrf.mxu2  ;;  %v1716_v6 = vld [vmem:[#allocation2 + $0x141] sm:$0xff] }
 0x2a5   : > { %v2089_v29 = vadd.f32 %v5205_v12, %v2054_v9  ;;  %1824 = vmatmul.f32.gmra.mxu3 %v1715_v40  ;;  %v5253_v2 = vpop.f32.mrf.mxu0  ;;  %1642 = vmatmul.f32.gmra.mxu2 %v1525_v57  ;;  %v2935_v40 = vld [vmem:[#allocation8 + $0x250] sm:$0xff]  ;;  %v1717_v9 = vld [vmem:[#allocation2 + $0x151] sm:$0xff] }
 0x2a6   : > { %2030 = vmatmul.f32.gmra.mxu0 %v5065_v60  ;;  %2946 = vmatpush.msrb.mxu1 %v2935_v40  ;;  %v2934_v40 = vld [vmem:[#allocation8 + $0x248] sm:$0xff] }
 0x2a7   : > { %v2121_v31 = vmax.f32 %v2089_v29, 0.0 }
 0x2a8   : > { %v1777_v3 = vpop.f32.mrf.mxu3  ;;  %2947 = vmatpush.msrb.mxu1 %v2934_v40  ;;  %v2541_v40 = vld [vmem:[#allocation8 + $0x120] sm:$0xff] }
 0x2a9   : > { %2153 = vst [vmem:[#allocation2 + $0x51] sm:$0xff] %v2121_v31  ;;  %v1861_v8 = vadd.f32 %v1777_v3, %v1667_v49  ;;  %2315 = vmatmul.f32.gmra.mxu1 %v2121_v31  ;;  %v1669_v49 = vadd.f32 %v1589_v55, %v1474_v32  ;;  %v5270_v7 = vpop.f32.mrf.mxu1  ;;  %v1475_v55 = vadd.f32 %v5116_v59, %v5063_v61  ;;  %v2221_v61 = vld [vmem:[#allocation8 + $0x40] sm:$0xff] }
 0x2aa   : > { %v1719_v59 = vld [vmem:[#allocation2 + $0x169] sm:$0xff] }
 0x2ab   : > { %v2055_v30 = vadd.f32 %v5223_v18, %v1861_v8  ;;  %v1595_v48 = vpop.f32.mrf.mxu2  ;;  %v2222_v18 = vld [vmem:[#allocation8 + $0x48] sm:$0xff]  ;;  %v2545_v32 = vld [vmem:[#allocation8 + $0x140] sm:$0xff] }
 0x2ac   : > { %2397 = vmatpush.msrb.mxu2 %v2222_v18  ;;  %v1916_v18 = vld [vmem:[#allocation2 + $0x18a] sm:$0xff] }
 0x2ad   : > { %v2090_v42 = vadd.f32 %v5205_v12, %v2055_v30  ;;  %1827 = vmatmul.f32.gmra.mxu3 %v1716_v6  ;;  %v5261_v47 = vpop.f32.mrf.mxu0  ;;  %1645 = vmatmul.f32.gmra.mxu2 %v1526_v50  ;;  %v2546_v6 = vld [vmem:[#allocation8 + $0x148] sm:$0xff]  ;;  %v1527_v30 = vld [vmem:[#allocation2 + $0x180] sm:$0xff] }
 0x2ae   : > { %2033 = vmatmul.f32.gmra.mxu0 %v5078_v23  ;;  %2559 = vmatpush.msrb.mxu3 %v2546_v6  ;;  %v2737_v6 = vld [vmem:[#allocation8 + $0x1b0] sm:$0xff] }
 0x2af   : > { %v2122_v14 = vmax.f32 %v2090_v42, 0.0  ;;  %v1670_v42 = vadd.f32 %v1592_v24, %v1475_v55  ;;  %2398 = vmatpush.msrb.mxu2 %v2221_v61  ;;  %v2735_v61 = vld [vmem:[#allocation8 + $0x1a0] sm:$0xff] }
 0x2b0   : > { %v1780_v43 = vpop.f32.mrf.mxu3  ;;  %2560 = vmatpush.msrb.mxu3 %v2545_v32 }
 0x2b1   : > { %2154 = vst [vmem:[#allocation2 + $0x61] sm:$0xff] %v2122_v14  ;;  %v1862_v17 = vadd.f32 %v1780_v43, %v1668_v37  ;;  %2318 = vmatmul.f32.gmra.mxu1 %v2122_v14  ;;  %v5286_v50 = vpop.f32.mrf.mxu1 }
 0x2b3   : > { %v2056_v60 = vadd.f32 %v5231_v16, %v1862_v17  ;;  %v5268_v39 = vpop.f32.mrf.mxu2 }
 0x2b5   : > { %v2091_v29 = vadd.f32 %v5205_v12, %v2056_v60  ;;  %1830 = vmatmul.f32.gmra.mxu3 %v1717_v9  ;;  %v5272_v16 = vpop.f32.mrf.mxu0  ;;  %1648 = vmatmul.f32.gmra.mxu2 %v1527_v30  ;;  %v1528_v9 = vld [vmem:[#allocation2 + $0x188] sm:$0xff]  ;;  %v2739_v60 = vld [vmem:[#allocation8 + $0x1c0] sm:$0xff]  ;;  %v2542_v30 = vld [vmem:[#allocation8 + $0x128] sm:$0xff] }
 0x2b6   : > { %2036 = vmatmul.f32.gmra.mxu0 %v5088_v1  ;;  %v1476_v1 = vadd.f32 %v5121_v26, %v5076_v45  ;;  %v2219_v26 = vld [vmem:[#allocation8 + $0x30] sm:$0xff] }
 0x2b7   : > { %v2123_v31 = vmax.f32 %v2091_v29, 0.0  ;;  %2754 = vmatpush.msrb.mxu0 %v2739_v60  ;;  %v5300_v60 = vld [vmem:[#allocation2] sm:$0xff] }
 0x2b8   : > { %v1783_v3 = vpop.f32.mrf.mxu3 }
 0x2b9   : > { %2155 = vst [vmem:[#allocation2 + $0x69] sm:$0xff] %v2123_v31  ;;  %v1863_v8 = vadd.f32 %v1783_v3, %v1669_v49  ;;  %2321 = vmatmul.f32.gmra.mxu1 %v2123_v31  ;;  %v1671_v49 = vadd.f32 %v1595_v48, %v1476_v1  ;;  %v2220_v31 = vld [vmem:[#allocation8 + $0x38] sm:$0xff]  ;;  %v2218_v48 = vld [vmem:[#allocation8 + $0x28] sm:$0xff]  ;;  %v5298_v32 = vpop.f32.mrf.mxu1 }
 0x2ba   : > { %v2544_v3 = vld [vmem:[#allocation8 + $0x138] sm:$0xff]  ;;  %2399 = vmatpush.msrb.mxu2 %v2220_v31  ;;  %v2733_v31 = vld [vmem:[#allocation8 + $0x190] sm:$0xff] }
 0x2bb   : > { %v2057_v23 = vadd.f32 %v5237_v38, %v1863_v8  ;;  %v5279_v17 = vpop.f32.mrf.mxu2  ;;  %v2738_v8 = vld [vmem:[#allocation8 + $0x1b8] sm:$0xff]  ;;  %2561 = vmatpush.msrb.mxu3 %v2544_v3 }
 0x2bc   : > { %2755 = vmatpush.msrb.mxu0 %v2738_v8  ;;  %2400 = vmatpush.msrb.mxu2 %v2219_v26  ;;  %v2933_v8 = vld [vmem:[#allocation8 + $0x240] sm:$0xff]  ;;  %v1721_v26 = vld [vmem:[#allocation2 + $0x181] sm:$0xff] }
 0x2bd   : > { %v2092_v57 = vadd.f32 %v5205_v12, %v2057_v23  ;;  %1833 = vmatmul.f32.gmra.mxu3 %v1718_v28  ;;  %v5281_v38 = vpop.f32.mrf.mxu0  ;;  %1651 = vmatmul.f32.gmra.mxu2 %v1528_v9  ;;  %v2734_v9 = vld [vmem:[#allocation8 + $0x198] sm:$0xff] }
 0x2be   : > { %2039 = vmatmul.f32.gmra.mxu0 %v1916_v18  ;;  %2401 = vmatpush.msrb.mxu2 %v2218_v48  ;;  %v2732_v48 = vld [vmem:[#allocation8 + $0x188] sm:$0xff] }
 0x2bf   : > { %v2124_v37 = vmax.f32 %v2092_v57, 0.0  ;;  %v2736_v57 = vld [vmem:[#allocation8 + $0x1a8] sm:$0xff]  ;;  %2756 = vmatpush.msrb.mxu0 %v2737_v6  ;;  %2948 = vmatpush.msrb.mxu1 %v2933_v8  ;;  %v1918_v6 = vld [vmem:[#allocation2 + $0x1a2] sm:$0xff] }
 0x2c0   : > { %v1786_v14 = vpop.f32.mrf.mxu3  ;;  %v2699_v8 = vld [vmem:[#allocation2 + $0x20] sm:$0xff] }
 0x2c1   : > { %2156 = vst [vmem:[#allocation2 + $0x79] sm:$0xff] %v2124_v37  ;;  %v1864_v43 = vadd.f32 %v1786_v14, %v1670_v42  ;;  %2324 = vmatmul.f32.gmra.mxu1 %v2124_v37  ;;  %v1720_v42 = vld [vmem:[#allocation2 + $0x171] sm:$0xff]  ;;  %v1917_v14 = vld [vmem:[#allocation2 + $0x19a] sm:$0xff]  ;;  %2757 = vmatpush.msrb.mxu0 %v2736_v57 }
 0x2c2   : > { %v2537_v57 = vld [vmem:[#allocation8 + $0x100] sm:$0xff] }
 0x2c3   : > { %v2058_v24 = vadd.f32 %v5245_v44, %v1864_v43  ;;  %v2543_v44 = vld [vmem:[#allocation8 + $0x130] sm:$0xff]  ;;  %v5289_v23 = vpop.f32.mrf.mxu2  ;;  %v1477_v43 = vadd.f32 %v5126_v58, %v5086_v4  ;;  %2758 = vmatpush.msrb.mxu0 %v2735_v61  ;;  %v2216_v4 = vld [vmem:[#allocation8 + $0x18] sm:$0xff] }
 0x2c4   : > { %2562 = vmatpush.msrb.mxu3 %v2543_v44 }
 0x2c5   : > { %v2093_v29 = vadd.f32 %v5205_v12, %v2058_v24  ;;  %1836 = vmatmul.f32.gmra.mxu3 %v1719_v59  ;;  %v5291_v37 = vpop.f32.mrf.mxu0  ;;  %v2217_v59 = vld [vmem:[#allocation8 + $0x20] sm:$0xff]  ;;  %v1672_v1 = vadd.f32 %v5268_v39, %v1477_v43  ;;  %v2540_v24 = vld [vmem:[#allocation8 + $0x118] sm:$0xff]  ;;  %1654 = vmatmul.f32.gmra.mxu2 %v5300_v60 }
 0x2c6   : > { %2563 = vmatpush.msrb.mxu3 %v2542_v30  ;;  %2042 = vmatmul.f32.gmra.mxu0 %v1917_v14  ;;  %v2214_v30 = vld [vmem:[#allocation8 + $0x8] sm:$0xff]  ;;  %v2731_v43 = vld [vmem:[#allocation8 + $0x180] sm:$0xff] }
 0x2c7   : > { %v2125_v45 = vmax.f32 %v2093_v29, 0.0  ;;  %2402 = vmatpush.msrb.mxu2 %v2217_v59  ;;  %2759 = vmatpush.msrb.mxu0 %v2734_v9  ;;  %v1722_v59 = vld [vmem:[#allocation2 + $0x189] sm:$0xff] }
 0x2c8   : > { %v1789_v28 = vpop.f32.mrf.mxu3  ;;  %2564 = vmatpush.msrb.mxu3 %v2541_v40 }
 0x2c9   : > { %2157 = vst [vmem:[#allocation2 + $0x81] sm:$0xff] %v2125_v45  ;;  %v1865_v55 = vadd.f32 %v1789_v28, %v1671_v49  ;;  %2327 = vmatmul.f32.gmra.mxu1 %v2125_v45  ;;  %v2215_v49 = vld [vmem:[#allocation8 + $0x10] sm:$0xff]  ;;  %2403 = vmatpush.msrb.mxu2 %v2216_v4  ;;  %v2538_v45 = vld [vmem:[#allocation8 + $0x108] sm:$0xff]  ;;  %v1478_v28 = vadd.f32 %v5134_v27, %v5096_v36  ;;  %v5311_v27 = vpop.f32.mrf.mxu1 }
 0x2ca   : > { %2565 = vmatpush.msrb.mxu3 %v2540_v24  ;;  %2760 = vmatpush.msrb.mxu0 %v2733_v31  ;;  %v2698_v24 = vld [vmem:[#allocation2 + $0x18] sm:$0xff]  ;;  %v2932_v31 = vld [vmem:[#allocation8 + $0x238] sm:$0xff] }
 0x2cb   : > { %v2059_v15 = vadd.f32 %v5253_v2, %v1865_v55  ;;  %v2539_v2 = vld [vmem:[#allocation8 + $0x110] sm:$0xff]  ;;  %v1607_v3 = vpop.f32.mrf.mxu2  ;;  %2404 = vmatpush.msrb.mxu2 %v2215_v49  ;;  %v1673_v14 = vadd.f32 %v5279_v17, %v1478_v28  ;;  %2949 = vmatpush.msrb.mxu1 %v2932_v31 }
 0x2cc   : > { %2566 = vmatpush.msrb.mxu3 %v2539_v2  ;;  %2761 = vmatpush.msrb.mxu0 %v2732_v48 }
 0x2cd   : > { %v2094_v18 = vadd.f32 %v5205_v12, %v2059_v15  ;;  %1839 = vmatmul.f32.gmra.mxu3 %v1720_v42  ;;  %v5303_v44 = vpop.f32.mrf.mxu0  ;;  %1657 = vmatmul.f32.gmra.mxu2 %v5300_v60  ;;  %v2213_v15 = vld [vmem:[#allocation8] sm:$0xff] }
 0x2ce   : > { %2567 = vmatpush.msrb.mxu3 %v2538_v45  ;;  %2045 = vmatmul.f32.gmra.mxu0 %v1918_v6 }
 0x2cf   : > { %v2126_v58 = vmax.f32 %v2094_v18, 0.0  ;;  %2405 = vmatpush.msrb.mxu2 %v2214_v30  ;;  %2762 = vmatpush.msrb.mxu0 %v2731_v43  ;;  %v1479_v18 = vadd.f32 %v5139_v46, %v5100_v20  ;;  %v1723_v20 = vld [vmem:[#allocation2 + $0x199] sm:$0xff]  ;;  %v1724_v30 = vld [vmem:[#allocation2 + $0x1a1] sm:$0xff] }
 0x2d0   : > { %v1792_v29 = vpop.f32.mrf.mxu3  ;;  %2568 = vmatpush.msrb.mxu3 %v2537_v57 }
 0x2d1   : > { %2158 = vst [vmem:[#allocation2 + $0x91] sm:$0xff] %v2126_v58  ;;  %v1866_v39 = vadd.f32 %v1792_v29, %v1672_v1  ;;  %2330 = vmatmul.f32.gmra.mxu1 %v2126_v58  ;;  %2406 = vmatpush.msrb.mxu2 %v2213_v15  ;;  %v1674_v4 = vadd.f32 %v5289_v23, %v1479_v18 }
 0x2d3   : > { %v2060_v55 = vadd.f32 %v5261_v47, %v1866_v39  ;;  %v1610_v61 = vpop.f32.mrf.mxu2  ;;  %v5321_v39 = vpop.f32.mrf.mxu1 }
 0x2d5   : > { %v2095_v42 = vadd.f32 %v5205_v12, %v2060_v55  ;;  %1842 = vmatmul.f32.gmra.mxu3 %v1721_v26  ;;  %v5313_v17 = vpop.f32.mrf.mxu0  ;;  %2407 = vmatmul.f32.vlgmr.msrb.gmra.mxu2 %v5300_v60 }
 0x2d6   : > { %2763 = vmatmul.f32.vlgmr.msrb.gmra.mxu0 %v2698_v24 }
 0x2d7   : > { %v2127_v36 = vmax.f32 %v2095_v42, 0.0 }
 0x2d8   : > { %v1795_v47 = vpop.f32.mrf.mxu3 }
 0x2d9   : > { %2159 = vst [vmem:[#allocation2 + $0x99] sm:$0xff] %v2127_v36  ;;  %v1867_v40 = vadd.f32 %v1795_v47, %v1673_v14  ;;  %2333 = vmatmul.f32.gmra.mxu1 %v2127_v36  ;;  %v2931_v47 = vld [vmem:[#allocation8 + $0x230] sm:$0xff] }
 0x2da   : > { %2950 = vmatpush.msrb.mxu1 %v2931_v47 }
 0x2db   : > { %v2061_v1 = vadd.f32 %v5272_v16, %v1867_v40  ;;  %v1613_v49 = vpop.f32.mrf.mxu2  ;;  %v1480_v16 = vadd.f32 %v5144_v63, %v5103_v0  ;;  %v5330_v57 = vpop.f32.mrf.mxu1  ;;  %v1481_v63 = vadd.f32 %v5150_v62, %v5106_v11  ;;  %v2504_v40 = vld [vmem:[#allocation2 + $0x2] sm:$0xff]  ;;  %v6316_v11 = vld [vmem:[#allocation50_spill] sm:$0xff] }
 0x2dc   : > { %v1482_v62 = vadd.f32 %v5161_v22, %v6316_v11  ;;  %v6317_v22 = vld [vmem:[#allocation51_spill] sm:$0xff] }
 0x2dd   : > { %v2096_v9 = vadd.f32 %v5205_v12, %v2061_v1  ;;  %1845 = vmatmul.f32.gmra.mxu3 %v1722_v59  ;;  %v5323_v46 = vpop.f32.mrf.mxu0  ;;  %v1675_v26 = vadd.f32 %v1607_v3, %v1480_v16  ;;  %2410 = vmatmul.f32.gmra.mxu2 %v5300_v60  ;;  %v2700_v3 = vld [vmem:[#allocation2 + $0x30] sm:$0xff]  ;;  %v1676_v60 = vadd.f32 %v1610_v61, %v1481_v63  ;;  %v2701_v61 = vld [vmem:[#allocation2 + $0x38] sm:$0xff]  ;;  %v2702_v16 = vld [vmem:[#allocation2 + $0x48] sm:$0xff] }
 0x2de   : > { %2766 = vmatmul.f32.gmra.mxu0 %v2699_v8 }
 0x2df   : > { %v2128_v58 = vmax.f32 %v2096_v9, 0.0 }
 0x2e0   : > { %v1798_v2 = vpop.f32.mrf.mxu3 }
 0x2e1   : > { %2160 = vst [vmem:[#allocation2 + $0xa9] sm:$0xff] %v2128_v58  ;;  %v1868_v29 = vadd.f32 %v1798_v2, %v1674_v4  ;;  %2336 = vmatmul.f32.gmra.mxu1 %v2128_v58 }
 0x2e3   : > { %v2062_v23 = vadd.f32 %v5281_v38, %v1868_v29  ;;  %v1616_v48 = vpop.f32.mrf.mxu2  ;;  %v5343_v18 = vpop.f32.mrf.mxu1  ;;  %v2505_v29 = vld [vmem:[#allocation2 + $0xa] sm:$0xff] }
 0x2e5   : > { %v2097_v45 = vadd.f32 %v5205_v12, %v2062_v23  ;;  %1848 = vmatmul.f32.gmra.mxu3 %v1723_v20  ;;  %v5332_v0 = vpop.f32.mrf.mxu0  ;;  %2413 = vmatmul.f32.gmra.mxu2 %v2698_v24  ;;  %v1677_v24 = vadd.f32 %v1613_v49, %v1482_v62  ;;  %v2507_v62 = vld [vmem:[#allocation2 + $0x22] sm:$0xff] }
 0x2e6   : > { %2769 = vmatmul.f32.gmra.mxu0 %v2700_v3 }
 0x2e7   : > { %v2129_v6 = vmax.f32 %v2097_v45, 0.0 }
 0x2e8   : > { %v1801_v28 = vpop.f32.mrf.mxu3 }
 0x2e9   : > { %2161 = vst [vmem:[#allocation2 + $0xb1] sm:$0xff] %v2129_v6  ;;  %v1869_v55 = vadd.f32 %v1801_v28, %v1675_v26  ;;  %2339 = vmatmul.f32.gmra.mxu1 %v2129_v6 }
 0x2eb   : > { %v2063_v38 = vadd.f32 %v5291_v37, %v1869_v55  ;;  %v1619_v36 = vpop.f32.mrf.mxu2  ;;  %v2930_v55 = vld [vmem:[#allocation8 + $0x228] sm:$0xff] }
 0x2ec   : > { %2951 = vmatpush.msrb.mxu1 %v2930_v55 }
 0x2ed   : > { %v2098_v42 = vadd.f32 %v5205_v12, %v2063_v38  ;;  %1851 = vmatmul.f32.gmra.mxu3 %v1724_v30  ;;  %v5338_v59 = vpop.f32.mrf.mxu0  ;;  %2416 = vmatmul.f32.gmra.mxu2 %v2699_v8  ;;  %v2703_v38 = vld [vmem:[#allocation2 + $0x50] sm:$0xff] }
 0x2ee   : > { %2772 = vmatmul.f32.gmra.mxu0 %v2701_v61 }
 0x2ef   : > { %v2130_v14 = vmax.f32 %v2098_v42, 0.0 }
 0x2f0   : > { %v1804_v43 = vpop.f32.mrf.mxu3 }
 0x2f1   : > { %2162 = vst [vmem:[#allocation2 + $0xc1] sm:$0xff] %v2130_v14  ;;  %v1870_v15 = vadd.f32 %v1804_v43, %v1676_v60  ;;  %2342 = vmatmul.f32.gmra.mxu1 %v2130_v14 }
 0x2f3   : > { %v2064_v37 = vadd.f32 %v5303_v44, %v1870_v15  ;;  %v1622_v2 = vpop.f32.mrf.mxu2  ;;  %v1483_v44 = vadd.f32 %v5170_v21, %v6317_v22  ;;  %v6318_v21 = vld [vmem:[#allocation52_spill] sm:$0xff] }
 0x2f5   : > { %v2099_v1 = vadd.f32 %v5205_v12, %v2064_v37  ;;  %2569 = vmatmul.f32.vlgmr.msrb.gmra.mxu3 %v2504_v40  ;;  %v5346_v31 = vpop.f32.mrf.mxu0  ;;  %v1678_v49 = vadd.f32 %v1616_v48, %v1483_v44  ;;  %2419 = vmatmul.f32.gmra.mxu2 %v2700_v3  ;;  %v2506_v48 = vld [vmem:[#allocation2 + $0x1a] sm:$0xff]  ;;  %v2705_v44 = vld [vmem:[#allocation2 + $0x68] sm:$0xff] }
 0x2f6   : > { %2775 = vmatmul.f32.gmra.mxu0 %v2702_v16  ;;  %v2704_v37 = vld [vmem:[#allocation2 + $0x60] sm:$0xff] }
 0x2f7   : > { %v2131_v9 = vmax.f32 %v2099_v1, 0.0 }
 0x2f8   : > { %v1807_v4 = vpop.f32.mrf.mxu3 }
 0x2f9   : > { %2163 = vst [vmem:[#allocation2 + $0xc9] sm:$0xff] %v2131_v9  ;;  %v1871_v58 = vadd.f32 %v1807_v4, %v1677_v24  ;;  %2345 = vmatmul.f32.gmra.mxu1 %v2131_v9 }
 0x2fb   : > { %v2065_v20 = vadd.f32 %v5313_v17, %v1871_v58  ;;  %v1625_v28 = vpop.f32.mrf.mxu2  ;;  %v1484_v17 = vadd.f32 %v5178_v51, %v6318_v21  ;;  %v6319_v51 = vld [vmem:[#allocation53_spill] sm:$0xff]  ;;  %v2509_v21 = vld [vmem:[#allocation2 + $0x3a] sm:$0xff] }
 0x2fd   : > { %v2100_v23 = vadd.f32 %v5205_v12, %v2065_v20  ;;  %2572 = vmatmul.f32.gmra.mxu3 %v2505_v29  ;;  %v5354_v30 = vpop.f32.mrf.mxu0  ;;  %v1679_v3 = vadd.f32 %v1619_v36, %v1484_v17  ;;  %2422 = vmatmul.f32.gmra.mxu2 %v2701_v61  ;;  %v2929_v29 = vld [vmem:[#allocation8 + $0x220] sm:$0xff]  ;;  %v2706_v17 = vld [vmem:[#allocation2 + $0x78] sm:$0xff] }
 0x2fe   : > { %v5352_v8 = vpop.f32.mrf.mxu1  ;;  %2778 = vmatmul.f32.gmra.mxu0 %v2703_v38  ;;  %2952 = vmatpush.msrb.mxu1 %v2929_v29  ;;  %v2708_v29 = vld [vmem:[#allocation2 + $0x90] sm:$0xff] }
 0x2ff   : > { %v2132_v45 = vmax.f32 %v2100_v23, 0.0 }
 0x300   : > { %v1810_v26 = vpop.f32.mrf.mxu3 }
 0x301   : > { %2164 = vst [vmem:[#allocation2 + $0xd9] sm:$0xff] %v2132_v45  ;;  %v1872_v6 = vadd.f32 %v1810_v26, %v1678_v49  ;;  %2348 = vmatmul.f32.gmra.mxu1 %v2132_v45 }
 0x303   : > { %v2066_v63 = vadd.f32 %v5323_v46, %v1872_v6  ;;  %v1628_v47 = vpop.f32.mrf.mxu2  ;;  %v1485_v46 = vadd.f32 %v5185_v34, %v6319_v51  ;;  %v2707_v51 = vld [vmem:[#allocation2 + $0x80] sm:$0xff] }
 0x305   : > { %v2101_v42 = vadd.f32 %v5205_v12, %v2066_v63  ;;  %2575 = vmatmul.f32.gmra.mxu3 %v2506_v48  ;;  %v5362_v40 = vpop.f32.mrf.mxu0  ;;  %v1680_v1 = vadd.f32 %v1622_v2, %v1485_v46  ;;  %2425 = vmatmul.f32.gmra.mxu2 %v2702_v16  ;;  %v2508_v2 = vld [vmem:[#allocation2 + $0x32] sm:$0xff] }
 0x306   : > { %v5360_v60 = vpop.f32.mrf.mxu1  ;;  %2781 = vmatmul.f32.gmra.mxu0 %v2704_v37 }
 0x307   : > { %v2133_v14 = vmax.f32 %v2101_v42, 0.0 }
 0x308   : > { %v1813_v43 = vpop.f32.mrf.mxu3 }
 0x309   : > { %2165 = vst [vmem:[#allocation2 + $0xe1] sm:$0xff] %v2133_v14  ;;  %v1873_v15 = vadd.f32 %v1813_v43, %v1679_v3  ;;  %2351 = vmatmul.f32.gmra.mxu1 %v2133_v14  ;;  %v2928_v43 = vld [vmem:[#allocation8 + $0x218] sm:$0xff] }
 0x30a   : > { %2953 = vmatpush.msrb.mxu1 %v2928_v43  ;;  %v2710_v43 = vld [vmem:[#allocation2 + $0xa8] sm:$0xff] }
 0x30b   : > { %v2067_v11 = vadd.f32 %v5332_v0, %v1873_v15  ;;  %v1631_v58 = vpop.f32.mrf.mxu2  ;;  %v1486_v0 = vadd.f32 %v5198_v13, %v5129_v19  ;;  %v6320_v19 = vld [vmem:[#allocation54_spill] sm:$0xff] }
 0x30c   : > { %v1487_v13 = vadd.f32 %v5213_v5, %v6320_v19  ;;  %v2709_v19 = vld [vmem:[#allocation2 + $0x98] sm:$0xff] }
 0x30d   : > { %v2102_v36 = vadd.f32 %v5205_v12, %v2067_v11  ;;  %2578 = vmatmul.f32.gmra.mxu3 %v2507_v62  ;;  %v5370_v34 = vpop.f32.mrf.mxu0  ;;  %v1681_v16 = vadd.f32 %v1625_v28, %v1486_v0  ;;  %2428 = vmatmul.f32.gmra.mxu2 %v2703_v38 }
 0x30e   : > { %v5368_v61 = vpop.f32.mrf.mxu1  ;;  %2784 = vmatmul.f32.gmra.mxu0 %v2705_v44  ;;  %v1682_v63 = vadd.f32 %v1628_v47, %v1487_v13  ;;  %v2510_v47 = vld [vmem:[#allocation2 + $0x4a] sm:$0xff] }
 0x30f   : > { %v2134_v24 = vmax.f32 %v2102_v36, 0.0 }
 0x310   : > { %v1816_v9 = vpop.f32.mrf.mxu3 }
 0x311   : > { %2166 = vst [vmem:[#allocation2 + $0xf1] sm:$0xff] %v2134_v24  ;;  %v1874_v4 = vadd.f32 %v1816_v9, %v1680_v1  ;;  %2354 = vmatmul.f32.gmra.mxu1 %v2134_v24 }
 0x313   : > { %v2068_v22 = vadd.f32 %v5338_v59, %v1874_v4  ;;  %v1634_v6 = vpop.f32.mrf.mxu2  ;;  %v2511_v4 = vld [vmem:[#allocation2 + $0x52] sm:$0xff] }
 0x315   : > { %v2103_v20 = vadd.f32 %v5205_v12, %v2068_v22  ;;  %2581 = vmatmul.f32.gmra.mxu3 %v2508_v2  ;;  %v5378_v55 = vpop.f32.mrf.mxu0  ;;  %2431 = vmatmul.f32.gmra.mxu2 %v2704_v37 }
 0x316   : > { %v5376_v23 = vpop.f32.mrf.mxu1  ;;  %2787 = vmatmul.f32.gmra.mxu0 %v2706_v17 }
 0x317   : > { %v2135_v49 = vmax.f32 %v2103_v20, 0.0 }
 0x318   : > { %v1819_v45 = vpop.f32.mrf.mxu3 }
 0x319   : > { %2167 = vst [vmem:[#allocation2 + $0xf9] sm:$0xff] %v2135_v49  ;;  %v1875_v26 = vadd.f32 %v1819_v45, %v1681_v16  ;;  %2357 = vmatmul.f32.gmra.mxu1 %v2135_v49  ;;  %v2927_v49 = vld [vmem:[#allocation8 + $0x210] sm:$0xff] }
 0x31a   : > { %2954 = vmatpush.msrb.mxu1 %v2927_v49  ;;  %v2515_v49 = vld [vmem:[#allocation2 + $0x82] sm:$0xff] }
 0x31b   : > { %v2069_v59 = vadd.f32 %v5346_v31, %v1875_v26  ;;  %v1637_v14 = vpop.f32.mrf.mxu2  ;;  %v1488_v31 = vadd.f32 %v5221_v53, %v5137_v33  ;;  %v6321_v33 = vld [vmem:[#allocation55_spill] sm:$0xff] }
 0x31c   : > { %v1489_v53 = vadd.f32 %v5229_v10, %v6321_v33 }
 0x31d   : > { %v2104_v28 = vadd.f32 %v5205_v12, %v2069_v59  ;;  %2584 = vmatmul.f32.gmra.mxu3 %v2509_v21  ;;  %v5386_v5 = vpop.f32.mrf.mxu0  ;;  %v1683_v11 = vadd.f32 %v1631_v58, %v1488_v31  ;;  %2434 = vmatmul.f32.gmra.mxu2 %v2705_v44 }
 0x31e   : > { %v5384_v48 = vpop.f32.mrf.mxu1  ;;  %2790 = vmatmul.f32.gmra.mxu0 %v2707_v51  ;;  %v1684_v0 = vadd.f32 %v1634_v6, %v1489_v53  ;;  %v2512_v6 = vld [vmem:[#allocation2 + $0x62] sm:$0xff]  ;;  %v2711_v53 = vld [vmem:[#allocation2 + $0xb0] sm:$0xff] }
 0x31f   : > { %v2136_v38 = vmax.f32 %v2104_v28, 0.0 }
 0x320   : > { %v1822_v42 = vpop.f32.mrf.mxu3 }
 0x321   : > { %2168 = vst [vmem:[#allocation2 + $0x109] sm:$0xff] %v2136_v38  ;;  %v1876_v3 = vadd.f32 %v1822_v42, %v1682_v63  ;;  %2360 = vmatmul.f32.gmra.mxu1 %v2136_v38 }
 0x323   : > { %v2070_v15 = vadd.f32 %v5354_v30, %v1876_v3  ;;  %v1640_v24 = vpop.f32.mrf.mxu2 }
 0x325   : > { %v2105_v46 = vadd.f32 %v5205_v12, %v2070_v15  ;;  %2587 = vmatmul.f32.gmra.mxu3 %v2510_v47  ;;  %v5394_v9 = vpop.f32.mrf.mxu0  ;;  %2437 = vmatmul.f32.gmra.mxu2 %v2706_v17 }
 0x326   : > { %v5392_v62 = vpop.f32.mrf.mxu1  ;;  %2793 = vmatmul.f32.gmra.mxu0 %v2708_v29 }
 0x327   : > { %v2137_v37 = vmax.f32 %v2105_v46, 0.0 }
 0x328   : > { %v1825_v36 = vpop.f32.mrf.mxu3 }
 0x329   : > { %2169 = vst [vmem:[#allocation2 + $0x111] sm:$0xff] %v2137_v37  ;;  %v1877_v1 = vadd.f32 %v1825_v36, %v1683_v11  ;;  %2363 = vmatmul.f32.gmra.mxu1 %v2137_v37  ;;  %v2926_v11 = vld [vmem:[#allocation8 + $0x208] sm:$0xff]  ;;  %v6324_v36 = vld [vmem:[#allocation43_spill] sm:$0xff] }
 0x32a   : > { %2955 = vmatpush.msrb.mxu1 %v2926_v11  ;;  %v2517_v11 = vld [vmem:[#allocation2 + $0x9a] sm:$0xff] }
 0x32b   : > { %v2071_v30 = vadd.f32 %v5362_v40, %v1877_v1  ;;  %v1643_v16 = vpop.f32.mrf.mxu2  ;;  %v6322_v40 = vld [vmem:[#allocation56_spill] sm:$0xff]  ;;  %v1492_v1 = vadd.f32 %v5259_v41, %v6324_v36  ;;  %v1493_v41 = vadd.f32 %v5270_v7, %v5167_v35  ;;  %v2714_v36 = vld [vmem:[#allocation2 + $0xd8] sm:$0xff] }
 0x32c   : > { %v1490_v45 = vadd.f32 %v5240_v54, %v6322_v40  ;;  %v6323_v54 = vld [vmem:[#allocation57_spill] sm:$0xff]  ;;  %v2712_v40 = vld [vmem:[#allocation2 + $0xc0] sm:$0xff]  ;;  %v3134_v35 = vld [vmem:[#allocation8 + $0x2f8] sm:$0xff] }
 0x32d   : > { %v2106_v58 = vadd.f32 %v5205_v12, %v2071_v30  ;;  %2590 = vmatmul.f32.gmra.mxu3 %v2511_v4  ;;  %v5402_v10 = vpop.f32.mrf.mxu0  ;;  %2440 = vmatmul.f32.gmra.mxu2 %v2707_v51  ;;  %v1687_v4 = vadd.f32 %v1643_v16, %v1492_v1 }
 0x32e   : > { %v5400_v22 = vpop.f32.mrf.mxu1  ;;  %v1685_v59 = vadd.f32 %v1637_v14, %v1490_v45  ;;  %2796 = vmatmul.f32.gmra.mxu0 %v2709_v19  ;;  %v5418_v14 = vld [vmem:[%s6218_s2] ss:$0 sm:$0xff]  ;;  %3135 = vmatpush.msra.mxu2 %v3134_v35 }
 0x32f   : > { %v2138_v2 = vmax.f32 %v2106_v58, 0.0 }
 0x330   : > { %v1828_v44 = vpop.f32.mrf.mxu3 }
 0x331   : > { %2170 = vst [vmem:[#allocation2 + $0x121] sm:$0xff] %v2138_v2  ;;  %v1878_v20 = vadd.f32 %v1828_v44, %v1684_v0  ;;  %2366 = vmatmul.f32.gmra.mxu1 %v2138_v2 }
 0x333   : > { %v2072_v26 = vadd.f32 %v5370_v34, %v1878_v20  ;;  %v1646_v38 = vpop.f32.mrf.mxu2  ;;  %v1491_v34 = vadd.f32 %v5251_v52, %v6323_v54 }
 0x334   : > { %v1688_v45 = vadd.f32 %v1646_v38, %v1493_v41  ;;  %v2713_v38 = vld [vmem:[#allocation2 + $0xc8] sm:$0xff] }
 0x335   : > { %v2107_v13 = vadd.f32 %v5205_v12, %v2072_v26  ;;  %2593 = vmatmul.f32.gmra.mxu3 %v2512_v6  ;;  %v5410_v42 = vpop.f32.mrf.mxu0  ;;  %v2513_v12 = vld [vmem:[#allocation2 + $0x6a] sm:$0xff]  ;;  %v1686_v15 = vadd.f32 %v1640_v24, %v1491_v34  ;;  %2443 = vmatmul.f32.gmra.mxu2 %v2708_v29  ;;  %v2514_v24 = vld [vmem:[#allocation2 + $0x7a] sm:$0xff] }
 0x336   : > { %v5408_v21 = vpop.f32.mrf.mxu1  ;;  %2799 = vmatmul.f32.gmra.mxu0 %v2710_v43  ;;  %v2518_v41 = vld [vmem:[#allocation2 + $0xaa] sm:$0xff] }
 0x337   : > { %v2139_v17 = vmax.f32 %v2107_v13, 0.0 }
 0x338   : > { %v1831_v28 = vpop.f32.mrf.mxu3 }
 0x339   : > { %2171 = vst [vmem:[#allocation2 + $0x129] sm:$0xff] %v2139_v17  ;;  %v1879_v63 = vadd.f32 %v1831_v28, %v1685_v59  ;;  %2369 = vmatmul.f32.gmra.mxu1 %v2139_v17  ;;  %v2925_v17 = vld [vmem:[#allocation8 + $0x200] sm:$0xff] }
 0x33a   : > { %2956 = vmatpush.msrb.mxu1 %v2925_v17  ;;  %v3521_v17 = vld [vmem:[#allocation8 + $0x3f0] sm:$0xff] }
 0x33b   : > { %v2073_v3 = vadd.f32 %v5378_v55, %v1879_v63  ;;  %v1649_v55 = vpop.f32.mrf.mxu2  ;;  %v2516_v63 = vld [vmem:[#allocation2 + $0x92] sm:$0xff] }
 0x33d   : > { %v2108_v31 = vadd.f32 %v5418_v14, %v2073_v3  ;;  %2596 = vmatmul.f32.gmra.mxu3 %v2513_v12  ;;  %v5423_v37 = vpop.f32.mrf.mxu0  ;;  %2446 = vmatmul.f32.gmra.mxu2 %v2709_v19 }
 0x33e   : > { %v5421_v47 = vpop.f32.mrf.mxu1  ;;  %2802 = vmatmul.f32.gmra.mxu0 %v2711_v53 }
 0x33f   : > { %v2140_v51 = vmax.f32 %v2108_v31, 0.0 }
 0x340   : > { %v1834_v46 = vpop.f32.mrf.mxu3 }
 0x341   : > { %2172 = vst [vmem:[#allocation2 + $0x139] sm:$0xff] %v2140_v51  ;;  %v1880_v52 = vadd.f32 %v1834_v46, %v1686_v15  ;;  %2372 = vmatmul.f32.gmra.mxu1 %v2140_v51  ;;  %v3328_v51 = vld [vmem:[#allocation8 + $0x378] sm:$0xff] }
 0x342   : > { %3329 = vmatpush.msra.mxu3 %v3328_v51  ;;  %v6325_v46 = vld [vmem:[#allocation44_spill] sm:$0xff] }
 0x343   : > { %v2074_v33 = vadd.f32 %v5386_v5, %v1880_v52  ;;  %v1652_v44 = vpop.f32.mrf.mxu2  ;;  %v1495_v52 = vadd.f32 %v5298_v32, %v6325_v46  ;;  %v2717_v46 = vld [vmem:[#allocation2 + $0xf8] sm:$0xff] }
 0x345   : > { %v2109_v30 = vadd.f32 %v5418_v14, %v2074_v33  ;;  %2599 = vmatmul.f32.gmra.mxu3 %v2514_v24  ;;  %v5431_v20 = vpop.f32.mrf.mxu0  ;;  %2449 = vmatmul.f32.gmra.mxu2 %v2710_v43  ;;  %v1690_v33 = vadd.f32 %v1652_v44, %v1495_v52  ;;  %v3133_v24 = vld [vmem:[#allocation8 + $0x2f0] sm:$0xff] }
 0x346   : > { %v5429_v29 = vpop.f32.mrf.mxu1  ;;  %2805 = vmatmul.f32.gmra.mxu0 %v2712_v40  ;;  %3136 = vmatpush.msra.mxu2 %v3133_v24 }
 0x347   : > { %v2141_v58 = vmax.f32 %v2109_v30, 0.0 }
 0x348   : > { %v1837_v0 = vpop.f32.mrf.mxu3 }
 0x349   : > { %2173 = vst [vmem:[#allocation2 + $0x141] sm:$0xff] %v2141_v58  ;;  %v1881_v2 = vadd.f32 %v1837_v0, %v1687_v4  ;;  %2375 = vmatmul.f32.gmra.mxu1 %v2141_v58 }
 0x34b   : > { %v2075_v5 = vadd.f32 %v5394_v9, %v1881_v2  ;;  %v1655_v59 = vpop.f32.mrf.mxu2  ;;  %v1494_v9 = vadd.f32 %v5286_v50, %v5175_v56  ;;  %v3522_v56 = vld [vmem:[#allocation8 + $0x3f8] sm:$0xff]  ;;  %v1496_v2 = vadd.f32 %v5311_v27, %v5190_v25  ;;  %v3715_v25 = vld [vmem:[#allocation8 + $0x470] sm:$0xff] }
 0x34c   : > { %v3716_v50 = vld [vmem:[#allocation8 + $0x478] sm:$0xff]  ;;  %3523 = vmatpush.msra.mxu0 %v3522_v56 }
 0x34d   : > { %v2110_v16 = vadd.f32 %v5418_v14, %v2075_v5  ;;  %2602 = vmatmul.f32.gmra.mxu3 %v2515_v49  ;;  %v5439_v7 = vpop.f32.mrf.mxu0  ;;  %v1689_v34 = vadd.f32 %v1649_v55, %v1494_v9  ;;  %2452 = vmatmul.f32.gmra.mxu2 %v2711_v53  ;;  %v2715_v5 = vld [vmem:[#allocation2 + $0xe0] sm:$0xff]  ;;  %v2519_v9 = vld [vmem:[#allocation2 + $0xb2] sm:$0xff] }
 0x34e   : > { %v5437_v26 = vpop.f32.mrf.mxu1  ;;  %2808 = vmatmul.f32.gmra.mxu0 %v2713_v38  ;;  %3717 = vmatpush.msra.mxu1 %v3716_v50 }
 0x34f   : > { %v2142_v6 = vmax.f32 %v2110_v16, 0.0  ;;  %3524 = vmatpush.msra.mxu0 %v3521_v17 }
 0x350   : > { %v1840_v19 = vpop.f32.mrf.mxu3  ;;  %3718 = vmatpush.msra.mxu1 %v3715_v25 }
 0x351   : > { %2174 = vst [vmem:[#allocation2 + $0x151] sm:$0xff] %v2142_v6  ;;  %v1882_v13 = vadd.f32 %v1840_v19, %v1688_v45  ;;  %2378 = vmatmul.f32.gmra.mxu1 %v2142_v6 }
 0x353   : > { %v2076_v28 = vadd.f32 %v5402_v10, %v1882_v13  ;;  %v1658_v15 = vpop.f32.mrf.mxu2 }
 0x355   : > { %v2111_v54 = vadd.f32 %v5418_v14, %v2076_v28  ;;  %2605 = vmatmul.f32.gmra.mxu3 %v2516_v63  ;;  %v5447_v10 = vpop.f32.mrf.mxu0  ;;  %2455 = vmatmul.f32.gmra.mxu2 %v2712_v40  ;;  %v1691_v40 = vadd.f32 %v1655_v59, %v1496_v2  ;;  %v2716_v28 = vld [vmem:[#allocation2 + $0xf0] sm:$0xff] }
 0x356   : > { %v5445_v3 = vpop.f32.mrf.mxu1  ;;  %2811 = vmatmul.f32.gmra.mxu0 %v2714_v36  ;;  %v3131_v2 = vld [vmem:[#allocation8 + $0x2e0] sm:$0xff] }
 0x357   : > { %v2143_v12 = vmax.f32 %v2111_v54, 0.0  ;;  %v3132_v54 = vld [vmem:[#allocation8 + $0x2e8] sm:$0xff] }
 0x358   : > { %v1843_v43 = vpop.f32.mrf.mxu3  ;;  %3137 = vmatpush.msra.mxu2 %v3132_v54 }
 0x359   : > { %2175 = vst [vmem:[#allocation2 + $0x159] sm:$0xff] %v2143_v12  ;;  %v1883_v31 = vadd.f32 %v1843_v43, %v1689_v34  ;;  %2381 = vmatmul.f32.gmra.mxu1 %v2143_v12 }
 0x35a   : > { %3138 = vmatpush.msra.mxu2 %v3131_v2 }
 0x35b   : > { %v2077_v55 = vadd.f32 %v5410_v42, %v1883_v31  ;;  %v2408_v32 = vpop.f32.mrf.mxu2  ;;  %v3327_v42 = vld [vmem:[#allocation8 + $0x370] sm:$0xff] }
 0x35c   : > { %3330 = vmatpush.msra.mxu3 %v3327_v42  ;;  %v2892_v31 = vld [vmem:[#allocation2 + $0x19] sm:$0xff] }
 0x35d   : > { %v2112_v1 = vadd.f32 %v5418_v14, %v2077_v55  ;;  %2608 = vmatmul.f32.gmra.mxu3 %v2517_v11  ;;  %v5455_v0 = vpop.f32.mrf.mxu0  ;;  %2458 = vmatmul.f32.gmra.mxu2 %v2713_v38  ;;  %v2409_v55 = vadd.f32 %v2408_v32, %v5330_v57  ;;  %v2521_v57 = vld [vmem:[#allocation2 + $0xca] sm:$0xff] }
 0x35e   : > { %v5453_v53 = vpop.f32.mrf.mxu1  ;;  %2814 = vmatmul.f32.gmra.mxu0 %v2715_v5  ;;  %v2718_v32 = vld [vmem:[#allocation2 + $0x108] sm:$0xff] }
 0x35f   : > { %v2144_v30 = vmax.f32 %v2112_v1, 0.0 }
 0x360   : > { %v1846_v4 = vpop.f32.mrf.mxu3 }
 0x361   : > { %2176 = vst [vmem:[#allocation2 + $0x169] sm:$0xff] %v2144_v30  ;;  %v1884_v58 = vadd.f32 %v1846_v4, %v1690_v33  ;;  %2384 = vmatmul.f32.gmra.mxu1 %v2144_v30  ;;  %v2893_v33 = vld [vmem:[#allocation2 + $0x21] sm:$0xff]  ;;  %v3520_v4 = vld [vmem:[#allocation8 + $0x3e8] sm:$0xff] }
 0x362   : > { %3525 = vmatpush.msra.mxu0 %v3520_v4  ;;  %v3712_v4 = vld [vmem:[#allocation8 + $0x458] sm:$0xff] }
 0x363   : > { %v2078_v44 = vadd.f32 %v5423_v37, %v1884_v58  ;;  %v2411_v13 = vpop.f32.mrf.mxu2  ;;  %v6326_v37 = vld [vmem:[#allocation45_spill] sm:$0xff] }
 0x364   : > { %v1497_v35 = vadd.f32 %v5321_v39, %v6326_v37  ;;  %v2412_v42 = vadd.f32 %v2411_v13, %v5343_v18  ;;  %v2522_v18 = vld [vmem:[#allocation2 + $0xda] sm:$0xff] }
 0x365   : > { %v2113_v49 = vadd.f32 %v5418_v14, %v2078_v44  ;;  %2611 = vmatmul.f32.gmra.mxu3 %v2518_v41  ;;  %v5463_v27 = vpop.f32.mrf.mxu0  ;;  %2461 = vmatmul.f32.gmra.mxu2 %v2714_v36  ;;  %v5497_v37 = vld [vmem:[#allocation2 + $0x39] sm:$0xff] }
 0x366   : > { %v5461_v16 = vpop.f32.mrf.mxu1  ;;  %v1692_v38 = vadd.f32 %v1658_v15, %v1497_v35  ;;  %2817 = vmatmul.f32.gmra.mxu0 %v2716_v28  ;;  %v2520_v15 = vld [vmem:[#allocation2 + $0xc2] sm:$0xff] }
 0x367   : > { %v2145_v45 = vmax.f32 %v2113_v49, 0.0 }
 0x368   : > { %v1849_v6 = vpop.f32.mrf.mxu3 }
 0x369   : > { %2177 = vst [vmem:[#allocation2 + $0x171] sm:$0xff] %v2145_v45  ;;  %v1885_v19 = vadd.f32 %v1849_v6, %v1691_v40  ;;  %2387 = vmatmul.f32.gmra.mxu1 %v2145_v45 }
 0x36b   : > { %v2079_v59 = vadd.f32 %v5431_v20, %v1885_v19  ;;  %v2414_v39 = vpop.f32.mrf.mxu2  ;;  %v3326_v20 = vld [vmem:[#allocation8 + $0x368] sm:$0xff]  ;;  %v2719_v19 = vld [vmem:[#allocation2 + $0x110] sm:$0xff] }
 0x36c   : > { %3331 = vmatpush.msra.mxu3 %v3326_v20  ;;  %v2415_v13 = vadd.f32 %v2414_v39, %v5352_v8  ;;  %v2523_v8 = vld [vmem:[#allocation2 + $0xe2] sm:$0xff] }
 0x36d   : > { %v2114_v63 = vadd.f32 %v5418_v14, %v2079_v59  ;;  %2614 = vmatmul.f32.gmra.mxu3 %v2519_v9  ;;  %v5471_v56 = vpop.f32.mrf.mxu0  ;;  %2464 = vmatmul.f32.gmra.mxu2 %v2715_v5  ;;  %v5486_v5 = vld [vmem:[#allocation2 + $0x31] sm:$0xff] }
 0x36e   : > { %v5469_v34 = vpop.f32.mrf.mxu1  ;;  %2820 = vmatmul.f32.gmra.mxu0 %v2717_v46  ;;  %v3519_v9 = vld [vmem:[#allocation8 + $0x3e0] sm:$0xff] }
 0x36f   : > { %v2146_v12 = vmax.f32 %v2114_v63, 0.0  ;;  %3526 = vmatpush.msra.mxu0 %v3519_v9  ;;  %v5541_v9 = vld [vmem:[#allocation2 + $0x69] sm:$0xff] }
 0x370   : > { %v1852_v43 = vpop.f32.mrf.mxu3 }
 0x371   : > { %2178 = vst [vmem:[#allocation2 + $0x181] sm:$0xff] %v2146_v12  ;;  %v1886_v51 = vadd.f32 %v1852_v43, %v1692_v38  ;;  %2957 = vmatmul.f32.vlgmr.msrb.gmra.mxu1 %v2892_v31  ;;  %v2720_v38 = vld [vmem:[#allocation2 + $0x120] sm:$0xff]  ;;  %v3130_v12 = vld [vmem:[#allocation8 + $0x2d8] sm:$0xff] }
 0x372   : > { %3139 = vmatpush.msra.mxu2 %v3130_v12 }
 0x373   : > { %v2080_v50 = vadd.f32 %v5439_v7, %v1886_v51  ;;  %v2417_v30 = vpop.f32.mrf.mxu2  ;;  %v3714_v7 = vld [vmem:[#allocation8 + $0x468] sm:$0xff]  ;;  %v5508_v51 = vld [vmem:[#allocation2 + $0x49] sm:$0xff] }
 0x374   : > { %3719 = vmatpush.msra.mxu1 %v3714_v7  ;;  %v2418_v54 = vadd.f32 %v2417_v30, %v5360_v60  ;;  %v2524_v60 = vld [vmem:[#allocation2 + $0xf2] sm:$0xff]  ;;  %v3518_v30 = vld [vmem:[#allocation8 + $0x3d8] sm:$0xff] }
 0x375   : > { %v2115_v52 = vadd.f32 %v5418_v14, %v2080_v50  ;;  %2617 = vmatmul.f32.gmra.mxu3 %v2520_v15  ;;  %v5478_v58 = vpop.f32.mrf.mxu0  ;;  %2467 = vmatmul.f32.gmra.mxu2 %v2716_v28  ;;  %v3713_v28 = vld [vmem:[#allocation8 + $0x460] sm:$0xff] }
 0x376   : > { %v5476_v11 = vpop.f32.mrf.mxu1  ;;  %2823 = vmatmul.f32.gmra.mxu0 %v2718_v32  ;;  %3720 = vmatpush.msra.mxu1 %v3713_v28 }
 0x377   : > { %v2147_v36 = vmax.f32 %v2115_v52, 0.0  ;;  %3527 = vmatpush.msra.mxu0 %v3518_v30 }
 0x378   : > { %v2570_v1 = vpop.f32.mrf.mxu3  ;;  %3721 = vmatpush.msra.mxu1 %v3712_v4 }
 0x379   : > { %2179 = vst [vmem:[#allocation2 + $0x189] sm:$0xff] %v2147_v36  ;;  %v2666_v24 = vadd.f32 %v2570_v1, %v2409_v55  ;;  %2960 = vmatmul.f32.gmra.mxu1 %v2893_v33  ;;  %v5519_v1 = vld [vmem:[#allocation2 + $0x51] sm:$0xff] }
 0x37b   : > { %v5481_v14 = vadd.f32 %v5447_v10, %v2666_v24  ;;  %v2420_v40 = vpop.f32.mrf.mxu2  ;;  %v3325_v10 = vld [vmem:[#allocation8 + $0x360] sm:$0xff] }
 0x37c   : > { %3332 = vmatpush.msra.mxu3 %v3325_v10  ;;  %v2421_v52 = vadd.f32 %v2420_v40, %v5368_v61  ;;  %v2525_v61 = vld [vmem:[#allocation2 + $0xfa] sm:$0xff] }
 0x37d   : > { %2620 = vmatmul.f32.gmra.mxu3 %v2521_v57  ;;  %v5489_v45 = vpop.f32.mrf.mxu0  ;;  %2470 = vmatmul.f32.gmra.mxu2 %v2717_v46  ;;  %v2721_v46 = vld [vmem:[#allocation2 + $0x128] sm:$0xff]  ;;  %v2722_v57 = vld [vmem:[#allocation2 + $0x138] sm:$0xff] }
 0x37e   : > { %v5484_v44 = vpop.f32.mrf.mxu1  ;;  %2826 = vmatmul.f32.gmra.mxu0 %v2719_v19 }
 0x380   : > { %v2573_v41 = vpop.f32.mrf.mxu3 }
 0x381   : > { %v2667_v49 = vadd.f32 %v2573_v41, %v2412_v42  ;;  %2963 = vmatmul.f32.gmra.mxu1 %v5486_v5  ;;  %v3129_v42 = vld [vmem:[#allocation8 + $0x2d0] sm:$0xff] }
 0x382   : > { %3140 = vmatpush.msra.mxu2 %v3129_v42 }
 0x383   : > { %v5492_v6 = vadd.f32 %v5455_v0, %v2667_v49  ;;  %v2423_v59 = vpop.f32.mrf.mxu2  ;;  %v5530_v49 = vld [vmem:[#allocation2 + $0x61] sm:$0xff] }
 0x385   : > { %2623 = vmatmul.f32.gmra.mxu3 %v2522_v18  ;;  %v5500_v0 = vpop.f32.mrf.mxu0  ;;  %2473 = vmatmul.f32.gmra.mxu2 %v2718_v32  ;;  %v2424_v32 = vadd.f32 %v2423_v59, %v5376_v23  ;;  %v2526_v23 = vld [vmem:[#allocation2 + $0x10a] sm:$0xff] }
 0x386   : > { %v5495_v17 = vpop.f32.mrf.mxu1  ;;  %2829 = vmatmul.f32.gmra.mxu0 %v2720_v38 }
 0x388   : > { %v2576_v25 = vpop.f32.mrf.mxu3 }
 0x389   : > { %v2668_v35 = vadd.f32 %v2576_v25, %v2415_v13  ;;  %2966 = vmatmul.f32.gmra.mxu1 %v5497_v37  ;;  %v2723_v13 = vld [vmem:[#allocation2 + $0x140] sm:$0xff] }
 0x38b   : > { %v5503_v63 = vadd.f32 %v5463_v27, %v2668_v35  ;;  %v2426_v20 = vpop.f32.mrf.mxu2  ;;  %v3324_v27 = vld [vmem:[#allocation8 + $0x358] sm:$0xff] }
 0x38c   : > { %3333 = vmatpush.msra.mxu3 %v3324_v27  ;;  %v2427_v25 = vadd.f32 %v2426_v20, %v5384_v48  ;;  %v2527_v48 = vld [vmem:[#allocation2 + $0x112] sm:$0xff] }
 0x38d   : > { %2626 = vmatmul.f32.gmra.mxu3 %v2523_v8  ;;  %v5511_v50 = vpop.f32.mrf.mxu0  ;;  %2476 = vmatmul.f32.gmra.mxu2 %v2719_v19  ;;  %v3128_v20 = vld [vmem:[#allocation8 + $0x2c8] sm:$0xff] }
 0x38e   : > { %v5506_v43 = vpop.f32.mrf.mxu1  ;;  %2832 = vmatmul.f32.gmra.mxu0 %v2721_v46  ;;  %3141 = vmatpush.msra.mxu2 %v3128_v20 }
 0x390   : > { %v2579_v31 = vpop.f32.mrf.mxu3 }
 0x391   : > { %v2669_v39 = vadd.f32 %v2579_v31, %v2418_v54  ;;  %2969 = vmatmul.f32.gmra.mxu1 %v5508_v51  ;;  %v3711_v54 = vld [vmem:[#allocation8 + $0x450] sm:$0xff]  ;;  %v2724_v31 = vld [vmem:[#allocation2 + $0x150] sm:$0xff] }
 0x392   : > { %3722 = vmatpush.msra.mxu1 %v3711_v54 }
 0x393   : > { %v5514_v15 = vadd.f32 %v5471_v56, %v2669_v39  ;;  %v2429_v24 = vpop.f32.mrf.mxu2 }
 0x394   : > { %v2430_v39 = vadd.f32 %v2429_v24, %v5392_v62  ;;  %v2528_v62 = vld [vmem:[#allocation2 + $0x122] sm:$0xff]  ;;  %v2725_v24 = vld [vmem:[#allocation2 + $0x158] sm:$0xff] }
 0x395   : > { %2629 = vmatmul.f32.gmra.mxu3 %v2524_v60  ;;  %v5522_v56 = vpop.f32.mrf.mxu0  ;;  %2479 = vmatmul.f32.gmra.mxu2 %v2720_v38  ;;  %v3517_v38 = vld [vmem:[#allocation8 + $0x3d0] sm:$0xff] }
 0x396   : > { %v5517_v55 = vpop.f32.mrf.mxu1  ;;  %2835 = vmatmul.f32.gmra.mxu0 %v2722_v57 }
 0x397   : > { %3528 = vmatpush.msra.mxu0 %v3517_v38  ;;  %v5579_v38 = vld [vmem:[#allocation2 + $0x91] sm:$0xff] }
 0x398   : > { %v2582_v36 = vpop.f32.mrf.mxu3 }
 0x399   : > { %v2670_v33 = vadd.f32 %v2582_v36, %v2421_v52  ;;  %2972 = vmatmul.f32.gmra.mxu1 %v5519_v1 }
 0x39b   : > { %v5525_v7 = vadd.f32 %v5478_v58, %v2670_v33  ;;  %v2432_v10 = vpop.f32.mrf.mxu2  ;;  %v3323_v58 = vld [vmem:[#allocation8 + $0x350] sm:$0xff] }
 0x39c   : > { %3334 = vmatpush.msra.mxu3 %v3323_v58  ;;  %v2433_v4 = vadd.f32 %v2432_v10, %v5400_v22  ;;  %v2529_v10 = vld [vmem:[#allocation2 + $0x12a] sm:$0xff] }
 0x39d   : > { %2632 = vmatmul.f32.gmra.mxu3 %v2525_v61  ;;  %v5533_v18 = vpop.f32.mrf.mxu0  ;;  %2482 = vmatmul.f32.gmra.mxu2 %v2721_v46  ;;  %v5552_v46 = vld [vmem:[#allocation2 + $0x79] sm:$0xff] }
 0x39e   : > { %v5528_v2 = vpop.f32.mrf.mxu1  ;;  %2838 = vmatmul.f32.gmra.mxu0 %v2723_v13 }
 0x3a0   : > { %v2585_v41 = vpop.f32.mrf.mxu3 }
 0x3a1   : > { %v2671_v40 = vadd.f32 %v2585_v41, %v2424_v32  ;;  %2975 = vmatmul.f32.gmra.mxu1 %v5530_v49  ;;  %v5563_v32 = vld [vmem:[#allocation2 + $0x81] sm:$0xff] }
 0x3a3   : > { %v5536_v19 = vadd.f32 %v5489_v45, %v2671_v40  ;;  %v2435_v8 = vpop.f32.mrf.mxu2  ;;  %v3516_v40 = vld [vmem:[#allocation8 + $0x3c8] sm:$0xff] }
 0x3a4   : > { %3529 = vmatpush.msra.mxu0 %v3516_v40 }
 0x3a5   : > { %2635 = vmatmul.f32.gmra.mxu3 %v2526_v23  ;;  %v5544_v45 = vpop.f32.mrf.mxu0  ;;  %2485 = vmatmul.f32.gmra.mxu2 %v2722_v57  ;;  %v5573_v23 = vld [vmem:[#allocation2 + $0x168] sm:$0xff] }
 0x3a6   : > { %v5539_v35 = vpop.f32.mrf.mxu1  ;;  %2841 = vmatmul.f32.gmra.mxu0 %v2724_v31 }
 0x3a8   : > { %v2588_v59 = vpop.f32.mrf.mxu3 }
 0x3a9   : > { %v2672_v28 = vadd.f32 %v2588_v59, %v2427_v25  ;;  %2978 = vmatmul.f32.gmra.mxu1 %v5541_v9  ;;  %v3127_v25 = vld [vmem:[#allocation8 + $0x2c0] sm:$0xff] }
 0x3aa   : > { %3142 = vmatpush.msra.mxu2 %v3127_v25  ;;  %v3512_v25 = vld [vmem:[#allocation8 + $0x3a8] sm:$0xff] }
 0x3ab   : > { %v5547_v12 = vadd.f32 %v5500_v0, %v2672_v28  ;;  %v2438_v36 = vpop.f32.mrf.mxu2  ;;  %v3322_v0 = vld [vmem:[#allocation8 + $0x348] sm:$0xff] }
 0x3ac   : > { %3335 = vmatpush.msra.mxu3 %v3322_v0  ;;  %v3320_v0 = vld [vmem:[#allocation8 + $0x338] sm:$0xff] }
 0x3ad   : > { %2638 = vmatmul.f32.gmra.mxu3 %v2527_v48  ;;  %v5555_v33 = vpop.f32.mrf.mxu0  ;;  %2488 = vmatmul.f32.gmra.mxu2 %v2723_v13  ;;  %v2436_v13 = vadd.f32 %v2435_v8, %v5408_v21  ;;  %v3321_v48 = vld [vmem:[#allocation8 + $0x340] sm:$0xff]  ;;  %v2530_v8 = vld [vmem:[#allocation2 + $0x13a] sm:$0xff] }
 0x3ae   : > { %v5550_v27 = vpop.f32.mrf.mxu1  ;;  %2844 = vmatmul.f32.gmra.mxu0 %v2725_v24  ;;  %3336 = vmatpush.msra.mxu3 %v3321_v48  ;;  %v3511_v48 = vld [vmem:[#allocation8 + $0x3a0] sm:$0xff] }
 0x3b0   : > { %v2591_v60 = vpop.f32.mrf.mxu3  ;;  %3337 = vmatpush.msra.mxu3 %v3320_v0 }
 0x3b1   : > { %v2673_v52 = vadd.f32 %v2591_v60, %v2430_v39  ;;  %2981 = vmatmul.f32.gmra.mxu1 %v5552_v46  ;;  %v3515_v39 = vld [vmem:[#allocation8 + $0x3c0] sm:$0xff]  ;;  %v2439_v60 = vadd.f32 %v2438_v36, %v5421_v47  ;;  %v3124_v36 = vld [vmem:[#allocation8 + $0x2a8] sm:$0xff] }
 0x3b2   : > { %3530 = vmatpush.msra.mxu0 %v3515_v39 }
 0x3b3   : > { %v5558_v30 = vadd.f32 %v5511_v50, %v2673_v52  ;;  %v5566_v41 = vpop.f32.mrf.mxu2  ;;  %v3710_v50 = vld [vmem:[#allocation8 + $0x448] sm:$0xff]  ;;  %v3126_v52 = vld [vmem:[#allocation8 + $0x2b8] sm:$0xff] }
 0x3b4   : > { %3723 = vmatpush.msra.mxu1 %v3710_v50  ;;  %3143 = vmatpush.msra.mxu2 %v3126_v52  ;;  %v5595_v50 = vld [vmem:[#allocation2 + $0x99] sm:$0xff]  ;;  %v3123_v52 = vld [vmem:[#allocation8 + $0x2a0] sm:$0xff]  ;;  %v2442_v0 = vadd.f32 %v5566_v41, %v5429_v29 }
 0x3b5   : > { %2641 = vmatmul.f32.gmra.mxu3 %v2528_v62  ;;  %v5568_v58 = vpop.f32.mrf.mxu0  ;;  %2491 = vmatmul.f32.gmra.mxu2 %v2724_v31  ;;  %v5589_v31 = vld [vmem:[#allocation2 + $0x170] sm:$0xff]  ;;  %v3514_v62 = vld [vmem:[#allocation8 + $0x3b8] sm:$0xff]  ;;  %v3314_v41 = vld [vmem:[#allocation8 + $0x308] sm:$0xff] }
 0x3b6   : > { %v5561_v61 = vpop.f32.mrf.mxu1  ;;  %2847 = vmatmul.f32.gmra.mxu0 %v5573_v23 }
 0x3b7   : > { %3531 = vmatpush.msra.mxu0 %v3514_v62  ;;  %v3316_v62 = vld [vmem:[#allocation8 + $0x318] sm:$0xff] }
 0x3b8   : > { %v2594_v57 = vpop.f32.mrf.mxu3 }
 0x3b9   : > { %v2674_v42 = vadd.f32 %v2594_v57, %v2433_v4  ;;  %2984 = vmatmul.f32.gmra.mxu1 %v5563_v32  ;;  %v3125_v57 = vld [vmem:[#allocation8 + $0x2b0] sm:$0xff] }
 0x3ba   : > { %3144 = vmatpush.msra.mxu2 %v3125_v57  ;;  %v3510_v57 = vld [vmem:[#allocation8 + $0x398] sm:$0xff] }
 0x3bb   : > { %v5571_v22 = vadd.f32 %v5522_v56, %v2674_v42  ;;  %v5582_v56 = vpop.f32.mrf.mxu2  ;;  %v3513_v42 = vld [vmem:[#allocation8 + $0x3b0] sm:$0xff] }
 0x3bc   : > { %3532 = vmatpush.msra.mxu0 %v3513_v42  ;;  %3145 = vmatpush.msra.mxu2 %v3124_v36  ;;  %v3122_v42 = vld [vmem:[#allocation8 + $0x298] sm:$0xff] }
 0x3bd   : > { %2644 = vmatmul.f32.gmra.mxu3 %v2529_v10  ;;  %v5584_v20 = vpop.f32.mrf.mxu0  ;;  %2494 = vmatmul.f32.gmra.mxu2 %v2725_v24  ;;  %v5610_v36 = vld [vmem:[#allocation2 + $0xa9] sm:$0xff] }
 0x3be   : > { %v5577_v59 = vpop.f32.mrf.mxu1  ;;  %2850 = vmatmul.f32.gmra.mxu0 %v5589_v31  ;;  %3146 = vmatpush.msra.mxu2 %v3123_v52  ;;  %v3120_v52 = vld [vmem:[#allocation8 + $0x288] sm:$0xff] }
 0x3bf   : > { %3533 = vmatpush.msra.mxu0 %v3512_v25 }
 0x3c0   : > { %v2597_v28 = vpop.f32.mrf.mxu3  ;;  %3147 = vmatpush.msra.mxu2 %v3122_v42  ;;  %v3119_v42 = vld [vmem:[#allocation8 + $0x280] sm:$0xff] }
 0x3c1   : > { %v2675_v54 = vadd.f32 %v2597_v28, %v2436_v13  ;;  %2987 = vmatmul.f32.gmra.mxu1 %v5579_v38  ;;  %v3318_v13 = vld [vmem:[#allocation8 + $0x328] sm:$0xff]  ;;  %v3709_v28 = vld [vmem:[#allocation8 + $0x440] sm:$0xff]  ;;  %3534 = vmatpush.msra.mxu0 %v3511_v48 }
 0x3c2   : > { %3724 = vmatpush.msra.mxu1 %v3709_v28  ;;  %v3508_v28 = vld [vmem:[#allocation8 + $0x388] sm:$0xff]  ;;  %v3313_v48 = vld [vmem:[#allocation8 + $0x300] sm:$0xff] }
 0x3c3   : > { %v5587_v21 = vadd.f32 %v5533_v18, %v2675_v54  ;;  %v3319_v18 = vld [vmem:[#allocation8 + $0x330] sm:$0xff]  ;;  %v5598_v47 = vpop.f32.mrf.mxu2  ;;  %v3317_v54 = vld [vmem:[#allocation8 + $0x320] sm:$0xff]  ;;  %3535 = vmatpush.msra.mxu0 %v3510_v57 }
 0x3c4   : > { %3338 = vmatpush.msra.mxu3 %v3319_v18 }
 0x3c5   : > { %6327 = vst [vmem:[#allocation46_spill] sm:$0xff] %v5587_v21  ;;  %2647 = vmatmul.f32.gmra.mxu3 %v2530_v8  ;;  %v5600_v24 = vpop.f32.mrf.mxu0  ;;  %v2531_v8 = vld [vmem:[#allocation2 + $0x142] sm:$0xff]  ;;  %2497 = vmatmul.f32.gmra.mxu2 %v5573_v23  ;;  %v2532_v23 = vld [vmem:[#allocation2 + $0x152] sm:$0xff] }
 0x3c6   : > { %v5593_v4 = vpop.f32.mrf.mxu1  ;;  %3339 = vmatpush.msra.mxu3 %v3318_v13  ;;  %v3121_v13 = vld [vmem:[#allocation8 + $0x290] sm:$0xff] }
 0x3c7   : > { %3148 = vmatpush.msra.mxu2 %v3121_v13  ;;  %v3708_v13 = vld [vmem:[#allocation8 + $0x438] sm:$0xff] }
 0x3c8   : > { %v2600_v40 = vpop.f32.mrf.mxu3  ;;  %3340 = vmatpush.msra.mxu3 %v3317_v54  ;;  %3725 = vmatpush.msra.mxu1 %v3708_v13 }
 0x3c9   : > { %v2676_v10 = vadd.f32 %v2600_v40, %v2439_v60  ;;  %2990 = vmatmul.f32.gmra.mxu1 %v5595_v50  ;;  %v2728_v60 = vld [vmem:[#allocation2 + $0x180] sm:$0xff]  ;;  %3149 = vmatpush.msra.mxu2 %v3120_v52 }
 0x3ca   : > { %2853 = vmatmul.f32.gmra.mxu0 %v2728_v60  ;;  %3341 = vmatpush.msra.mxu3 %v3316_v62  ;;  %v3509_v40 = vld [vmem:[#allocation8 + $0x390] sm:$0xff]  ;;  %v2729_v60 = vld [vmem:[#allocation2 + $0x188] sm:$0xff]  ;;  %v2445_v62 = vadd.f32 %v5582_v56, %v5437_v26 }
 0x3cb   : > { %v5603_v39 = vadd.f32 %v5544_v45, %v2676_v10  ;;  %v3315_v45 = vld [vmem:[#allocation8 + $0x310] sm:$0xff]  ;;  %v2450_v29 = vpop.f32.mrf.mxu2  ;;  %3536 = vmatpush.msra.mxu0 %v3509_v40  ;;  %3150 = vmatpush.msra.mxu2 %v3119_v42 }
 0x3cc   : > { %3342 = vmatpush.msra.mxu3 %v3315_v45  ;;  %v5623_v45 = vld [vmem:[#allocation2 + $0xb1] sm:$0xff]  ;;  %v2533_v56 = vld [vmem:[#allocation2 + $0x15a] sm:$0xff] }
 0x3cd   : > { %6328 = vst [vmem:[#allocation47_spill] sm:$0xff] %v5603_v39  ;;  %2650 = vmatmul.f32.gmra.mxu3 %v2531_v8  ;;  %v5613_v54 = vpop.f32.mrf.mxu0  ;;  %3537 = vmatpush.msra.mxu0 %v3508_v28 }
 0x3ce   : > { %v5607_v18 = vpop.f32.mrf.mxu1  ;;  %3343 = vmatpush.msra.mxu3 %v3314_v41  ;;  %2500 = vmatmul.f32.gmra.mxu2 %v5589_v31  ;;  %v2448_v31 = vadd.f32 %v5598_v47, %v5445_v3  ;;  %v3086_v41 = vld [vmem:[#allocation2 + $0x1a] sm:$0xff]  ;;  %v2451_v3 = vadd.f32 %v2450_v29, %v5453_v53  ;;  %v3087_v47 = vld [vmem:[#allocation2 + $0x22] sm:$0xff]  ;;  %v2535_v53 = vld [vmem:[#allocation2 + $0x172] sm:$0xff] }
 0x3cf   : > { %v5651_v29 = vld [vmem:[#allocation2 + $0x32] sm:$0xff] }
 0x3d0   : > { %v2603_v10 = vpop.f32.mrf.mxu3  ;;  %3344 = vmatpush.msra.mxu3 %v3313_v48  ;;  %v5634_v48 = vld [vmem:[#allocation2 + $0xc1] sm:$0xff] }
 0x3d1   : > { %v2677_v25 = vadd.f32 %v2603_v10, %v2442_v0  ;;  %2993 = vmatmul.f32.gmra.mxu1 %v5610_v36  ;;  %v3507_v0 = vld [vmem:[#allocation8 + $0x380] sm:$0xff] }
 0x3d2   : > { %2856 = vmatmul.f32.gmra.mxu0 %v2729_v60 }
 0x3d3   : > { %v5616_v8 = vadd.f32 %v5555_v33, %v2677_v25  ;;  %3538 = vmatpush.msra.mxu0 %v3507_v0  ;;  %v2453_v10 = vpop.f32.mrf.mxu2 }
 0x3d5   : > { %6329 = vst [vmem:[#allocation50_spill] sm:$0xff] %v5616_v8  ;;  %2653 = vmatmul.f32.gmra.mxu3 %v2532_v23  ;;  %v2812_v25 = vpop.f32.mrf.mxu0 }
 0x3d6   : > { %v5620_v57 = vpop.f32.mrf.mxu1  ;;  %3151 = vmatmul.f32.vlgmr.msra.gmra.mxu2 %v3086_v41 }
 0x3d8   : > { %v2606_v33 = vpop.f32.mrf.mxu3 }
 0x3d9   : > { %v2678_v40 = vadd.f32 %v2606_v33, %v2445_v62  ;;  %2996 = vmatmul.f32.gmra.mxu1 %v5623_v45  ;;  %v2534_v62 = vld [vmem:[#allocation2 + $0x16a] sm:$0xff] }
 0x3da   : > { %3539 = vmatmul.f32.vlgmr.msra.gmra.mxu0 %v5486_v5  ;;  %v5644_v33 = vld [vmem:[#allocation2 + $0xc9] sm:$0xff] }
 0x3db   : > { %v5627_v26 = vadd.f32 %v5568_v58, %v2678_v40  ;;  %v2456_v52 = vpop.f32.mrf.mxu2 }
 0x3dd   : > { %6330 = vst [vmem:[#allocation51_spill] sm:$0xff] %v5627_v26  ;;  %2656 = vmatmul.f32.gmra.mxu3 %v2533_v56  ;;  %v2815_v58 = vpop.f32.mrf.mxu0  ;;  %v3707_v56 = vld [vmem:[#allocation8 + $0x430] sm:$0xff] }
 0x3de   : > { %v5632_v28 = vpop.f32.mrf.mxu1  ;;  %3154 = vmatmul.f32.gmra.mxu2 %v3087_v47  ;;  %3726 = vmatpush.msra.mxu1 %v3707_v56  ;;  %v5670_v56 = vld [vmem:[#allocation2 + $0xe1] sm:$0xff] }
 0x3e0   : > { %v2609_v23 = vpop.f32.mrf.mxu3 }
 0x3e1   : > { %v2679_v60 = vadd.f32 %v2609_v23, %v2448_v31  ;;  %2999 = vmatmul.f32.gmra.mxu1 %v5634_v48 }
 0x3e2   : > { %3542 = vmatmul.f32.gmra.mxu0 %v5497_v37  ;;  %v2454_v37 = vadd.f32 %v2453_v10, %v5461_v16  ;;  %v3280_v16 = vld [vmem:[#allocation2 + $0x30] sm:$0xff]  ;;  %v2457_v10 = vadd.f32 %v2456_v52, %v5469_v34  ;;  %v3281_v34 = vld [vmem:[#allocation2 + $0x38] sm:$0xff] }
 0x3e3   : > { %v5638_v0 = vadd.f32 %v5584_v20, %v2679_v60  ;;  %v2459_v13 = vpop.f32.mrf.mxu2  ;;  %v5657_v60 = vld [vmem:[#allocation2 + $0xd9] sm:$0xff]  ;;  %v5676_v52 = vld [vmem:[#allocation2 + $0x4a] sm:$0xff] }
 0x3e5   : > { %6331 = vst [vmem:[#allocation52_spill] sm:$0xff] %v5638_v0  ;;  %2659 = vmatmul.f32.gmra.mxu3 %v2534_v62  ;;  %v2818_v20 = vpop.f32.mrf.mxu0 }
 0x3e6   : > { %v5642_v5 = vpop.f32.mrf.mxu1  ;;  %3157 = vmatmul.f32.gmra.mxu2 %v5651_v29 }
 0x3e8   : > { %v2612_v42 = vpop.f32.mrf.mxu3 }
 0x3e9   : > { %v2680_v40 = vadd.f32 %v2612_v42, %v2451_v3  ;;  %3002 = vmatmul.f32.gmra.mxu1 %v5644_v33 }
 0x3ea   : > { %3545 = vmatmul.f32.gmra.mxu0 %v5508_v51  ;;  %v5664_v51 = vld [vmem:[#allocation2 + $0x3a] sm:$0xff] }
 0x3eb   : > { %v5648_v31 = vadd.f32 %v5600_v24, %v2680_v40  ;;  %v2462_v24 = vpop.f32.mrf.mxu2 }
 0x3ed   : > { %6332 = vst [vmem:[#allocation53_spill] sm:$0xff] %v5648_v31  ;;  %2662 = vmatmul.f32.gmra.mxu3 %v2535_v53  ;;  %v2821_v3 = vpop.f32.mrf.mxu0 }
 0x3ee   : > { %v5654_v41 = vpop.f32.mrf.mxu1  ;;  %3160 = vmatmul.f32.gmra.mxu2 %v5664_v51 }
 0x3f0   : > { %v2615_v23 = vpop.f32.mrf.mxu3 }
 0x3f1   : > { %v2681_v62 = vadd.f32 %v2615_v23, %v2454_v37  ;;  %3005 = vmatmul.f32.gmra.mxu1 %v5657_v60  ;;  %v3706_v37 = vld [vmem:[#allocation8 + $0x428] sm:$0xff] }
 0x3f2   : > { %3548 = vmatmul.f32.gmra.mxu0 %v5519_v1  ;;  %3727 = vmatpush.msra.mxu1 %v3706_v37  ;;  %v2460_v1 = vadd.f32 %v2459_v13, %v5476_v11  ;;  %v2463_v11 = vadd.f32 %v2462_v24, %v5484_v44  ;;  %v5688_v13 = vld [vmem:[#allocation2 + $0x52] sm:$0xff]  ;;  %v5700_v24 = vld [vmem:[#allocation2 + $0x62] sm:$0xff] }
 0x3f3   : > { %v5661_v47 = vadd.f32 %v5613_v54, %v2681_v62  ;;  %v2465_v54 = vpop.f32.mrf.mxu2  ;;  %v3283_v44 = vld [vmem:[#allocation2 + $0x50] sm:$0xff] }
 0x3f5   : > { %6333 = vst [vmem:[#allocation54_spill] sm:$0xff] %v5661_v47  ;;  %3345 = vmatmul.f32.vlgmr.msra.gmra.mxu3 %v3280_v16  ;;  %v2824_v23 = vpop.f32.mrf.mxu0 }
 0x3f6   : > { %v5667_v42 = vpop.f32.mrf.mxu1  ;;  %3163 = vmatmul.f32.gmra.mxu2 %v5676_v52 }
 0x3f8   : > { %v2618_v40 = vpop.f32.mrf.mxu3 }
 0x3f9   : > { %v2682_v53 = vadd.f32 %v2618_v40, %v2457_v10  ;;  %3008 = vmatmul.f32.gmra.mxu1 %v5670_v56  ;;  %v5682_v40 = vld [vmem:[#allocation2 + $0xf1] sm:$0xff] }
 0x3fa   : > { %3551 = vmatmul.f32.gmra.mxu0 %v5530_v49 }
 0x3fb   : > { %v5673_v62 = vadd.f32 %v2812_v25, %v2682_v53  ;;  %v2468_v25 = vpop.f32.mrf.mxu2 }
 0x3fd   : > { %6334 = vst [vmem:[#allocation55_spill] sm:$0xff] %v5673_v62  ;;  %3348 = vmatmul.f32.gmra.mxu3 %v3281_v34  ;;  %v2827_v53 = vpop.f32.mrf.mxu0  ;;  %v3282_v34 = vld [vmem:[#allocation2 + $0x48] sm:$0xff] }
 0x3fe   : > { %v5679_v16 = vpop.f32.mrf.mxu1  ;;  %3166 = vmatmul.f32.gmra.mxu2 %v5688_v13 }
 0x400   : > { %v2621_v10 = vpop.f32.mrf.mxu3 }
 0x401   : > { %v2683_v47 = vadd.f32 %v2621_v10, %v2460_v1  ;;  %3011 = vmatmul.f32.gmra.mxu1 %v5682_v40  ;;  %v5694_v1 = vld [vmem:[#allocation2 + $0xf9] sm:$0xff] }
 0x402   : > { %3554 = vmatmul.f32.gmra.mxu0 %v5541_v9  ;;  %v2466_v9 = vadd.f32 %v2465_v54, %v5495_v17  ;;  %v2469_v17 = vadd.f32 %v2468_v25, %v5506_v43  ;;  %v5712_v54 = vld [vmem:[#allocation2 + $0x6a] sm:$0xff] }
 0x403   : > { %v5685_v37 = vadd.f32 %v2815_v58, %v2683_v47  ;;  %v2471_v58 = vpop.f32.mrf.mxu2  ;;  %v3705_v47 = vld [vmem:[#allocation8 + $0x420] sm:$0xff]  ;;  %v3285_v43 = vld [vmem:[#allocation2 + $0x68] sm:$0xff] }
 0x404   : > { %3728 = vmatpush.msra.mxu1 %v3705_v47 }
 0x405   : > { %6335 = vst [vmem:[#allocation56_spill] sm:$0xff] %v5685_v37  ;;  %3351 = vmatmul.f32.gmra.mxu3 %v3282_v34  ;;  %v2830_v37 = vpop.f32.mrf.mxu0 }
 0x406   : > { %v5691_v49 = vpop.f32.mrf.mxu1  ;;  %3169 = vmatmul.f32.gmra.mxu2 %v5700_v24 }
 0x408   : > { %v2624_v62 = vpop.f32.mrf.mxu3 }
 0x409   : > { %v2684_v10 = vadd.f32 %v2624_v62, %v2463_v11  ;;  %3014 = vmatmul.f32.gmra.mxu1 %v5694_v1  ;;  %v5706_v11 = vld [vmem:[#allocation2 + $0x109] sm:$0xff] }
 0x40a   : > { %3557 = vmatmul.f32.gmra.mxu0 %v5552_v46 }
 0x40b   : > { %v5697_v34 = vadd.f32 %v2818_v20, %v2684_v10  ;;  %v2474_v20 = vpop.f32.mrf.mxu2 }
 0x40d   : > { %6336 = vst [vmem:[#allocation57_spill] sm:$0xff] %v5697_v34  ;;  %3354 = vmatmul.f32.gmra.mxu3 %v3283_v44  ;;  %v2833_v10 = vpop.f32.mrf.mxu0  ;;  %v3284_v44 = vld [vmem:[#allocation2 + $0x60] sm:$0xff] }
 0x40e   : > { %v5703_v31 = vpop.f32.mrf.mxu1  ;;  %3172 = vmatmul.f32.gmra.mxu2 %v5712_v54 }
 0x410   : > { %v2627_v62 = vpop.f32.mrf.mxu3 }
 0x411   : > { %v2685_v0 = vadd.f32 %v2627_v62, %v2466_v9  ;;  %3017 = vmatmul.f32.gmra.mxu1 %v5706_v11  ;;  %v5718_v9 = vld [vmem:[#allocation2 + $0x111] sm:$0xff] }
 0x412   : > { %3560 = vmatmul.f32.gmra.mxu0 %v5563_v32  ;;  %v2472_v32 = vadd.f32 %v2471_v58, %v5517_v55  ;;  %v2475_v55 = vadd.f32 %v2474_v20, %v5528_v2  ;;  %v5736_v58 = vld [vmem:[#allocation2 + $0x82] sm:$0xff]  ;;  %v5748_v20 = vld [vmem:[#allocation2 + $0x92] sm:$0xff] }
 0x413   : > { %v5709_v47 = vadd.f32 %v2821_v3, %v2685_v0  ;;  %v2477_v0 = vpop.f32.mrf.mxu2  ;;  %v3704_v3 = vld [vmem:[#allocation8 + $0x418] sm:$0xff]  ;;  %v3287_v2 = vld [vmem:[#allocation2 + $0x80] sm:$0xff] }
 0x414   : > { %3729 = vmatpush.msra.mxu1 %v3704_v3  ;;  %v3286_v3 = vld [vmem:[#allocation2 + $0x78] sm:$0xff] }
 0x415   : > { %6337 = vst [vmem:[#allocation43_spill] sm:$0xff] %v5709_v47  ;;  %3357 = vmatmul.f32.gmra.mxu3 %v3284_v44  ;;  %v2836_v25 = vpop.f32.mrf.mxu0  ;;  %v5724_v47 = vld [vmem:[#allocation2 + $0x7a] sm:$0xff] }
 0x416   : > { %v5715_v46 = vpop.f32.mrf.mxu1  ;;  %3175 = vmatmul.f32.gmra.mxu2 %v5724_v47 }
 0x418   : > { %v2630_v34 = vpop.f32.mrf.mxu3 }
 0x419   : > { %v2686_v62 = vadd.f32 %v2630_v34, %v2469_v17  ;;  %3020 = vmatmul.f32.gmra.mxu1 %v5718_v9  ;;  %v5730_v17 = vld [vmem:[#allocation2 + $0x121] sm:$0xff] }
 0x41a   : > { %3563 = vmatmul.f32.gmra.mxu0 %v5579_v38 }
 0x41b   : > { %v5721_v44 = vadd.f32 %v2824_v23, %v2686_v62  ;;  %v2480_v23 = vpop.f32.mrf.mxu2 }
 0x41d   : > { %6338 = vst [vmem:[#allocation44_spill] sm:$0xff] %v5721_v44  ;;  %3360 = vmatmul.f32.gmra.mxu3 %v3285_v43  ;;  %v2839_v43 = vpop.f32.mrf.mxu0 }
 0x41e   : > { %v5727_v26 = vpop.f32.mrf.mxu1  ;;  %3178 = vmatmul.f32.gmra.mxu2 %v5736_v58 }
 0x420   : > { %v2633_v34 = vpop.f32.mrf.mxu3 }
 0x421   : > { %v2687_v8 = vadd.f32 %v2633_v34, %v2472_v32  ;;  %3023 = vmatmul.f32.gmra.mxu1 %v5730_v17  ;;  %v5742_v32 = vld [vmem:[#allocation2 + $0x129] sm:$0xff] }
 0x422   : > { %3566 = vmatmul.f32.gmra.mxu0 %v5595_v50  ;;  %v2478_v50 = vadd.f32 %v2477_v0, %v5539_v35  ;;  %v2481_v35 = vadd.f32 %v2480_v23, %v5550_v27  ;;  %v5760_v0 = vld [vmem:[#allocation2 + $0x9a] sm:$0xff]  ;;  %v5772_v23 = vld [vmem:[#allocation2 + $0xaa] sm:$0xff] }
 0x423   : > { %v5733_v62 = vadd.f32 %v2827_v53, %v2687_v8  ;;  %v2483_v8 = vpop.f32.mrf.mxu2  ;;  %v3703_v53 = vld [vmem:[#allocation8 + $0x410] sm:$0xff]  ;;  %v3289_v27 = vld [vmem:[#allocation2 + $0x98] sm:$0xff] }
 0x424   : > { %3730 = vmatpush.msra.mxu1 %v3703_v53  ;;  %v3288_v53 = vld [vmem:[#allocation2 + $0x90] sm:$0xff] }
 0x425   : > { %6339 = vst [vmem:[#allocation45_spill] sm:$0xff] %v5733_v62  ;;  %3363 = vmatmul.f32.gmra.mxu3 %v3286_v3  ;;  %v2842_v39 = vpop.f32.mrf.mxu0 }
 0x426   : > { %v5739_v38 = vpop.f32.mrf.mxu1  ;;  %3181 = vmatmul.f32.gmra.mxu2 %v5748_v20 }
 0x428   : > { %v2636_v44 = vpop.f32.mrf.mxu3 }
 0x429   : > { %v2688_v34 = vadd.f32 %v2636_v44, %v2475_v55  ;;  %3026 = vmatmul.f32.gmra.mxu1 %v5742_v32  ;;  %v5754_v55 = vld [vmem:[#allocation2 + $0x139] sm:$0xff] }
 0x42a   : > { %3569 = vmatmul.f32.gmra.mxu0 %v5610_v36 }
 0x42b   : > { %v5745_v3 = vadd.f32 %v2830_v37, %v2688_v34  ;;  %v2486_v37 = vpop.f32.mrf.mxu2 }
 0x42d   : > { %6340 = vst [vmem:[#allocation58_spill] sm:$0xff] %v5745_v3  ;;  %3366 = vmatmul.f32.gmra.mxu3 %v3287_v2  ;;  %v5766_v3 = vld [vmem:[#allocation2 + $0x141] sm:$0xff] }
 0x42e   : > { %v5751_v62 = vpop.f32.mrf.mxu1  ;;  %3184 = vmatmul.f32.gmra.mxu2 %v5760_v0 }
 0x430   : > { %v2639_v44 = vpop.f32.mrf.mxu3 }
 0x431   : > { %v2689_v21 = vadd.f32 %v2639_v44, %v2478_v50  ;;  %3029 = vmatmul.f32.gmra.mxu1 %v5754_v55  ;;  %v2845_v44 = vpop.f32.mrf.mxu0 }
 0x432   : > { %3572 = vmatmul.f32.gmra.mxu0 %v5623_v45  ;;  %v2484_v45 = vadd.f32 %v2483_v8, %v5561_v61  ;;  %v2487_v61 = vadd.f32 %v2486_v37, %v5577_v59  ;;  %v5784_v8 = vld [vmem:[#allocation2 + $0xb2] sm:$0xff] }
 0x433   : > { %v5757_v34 = vadd.f32 %v2833_v10, %v2689_v21  ;;  %v2489_v21 = vpop.f32.mrf.mxu2  ;;  %v3702_v10 = vld [vmem:[#allocation8 + $0x408] sm:$0xff]  ;;  %v3291_v59 = vld [vmem:[#allocation2 + $0xb0] sm:$0xff] }
 0x434   : > { %3731 = vmatpush.msra.mxu1 %v3702_v10  ;;  %v3290_v10 = vld [vmem:[#allocation2 + $0xa8] sm:$0xff]  ;;  %v2490_v37 = vadd.f32 %v2489_v21, %v5593_v4 }
 0x435   : > { %6341 = vst [vmem:[#allocation59_spill] sm:$0xff] %v5757_v34  ;;  %3369 = vmatmul.f32.gmra.mxu3 %v3288_v53  ;;  %v5808_v21 = vld [vmem:[#allocation2 + $0xca] sm:$0xff] }
 0x436   : > { %v5763_v36 = vpop.f32.mrf.mxu1  ;;  %3187 = vmatmul.f32.gmra.mxu2 %v5772_v23 }
 0x437   : > { %6342 = vst [vmem:[#allocation60_spill] sm:$0xff] %v5763_v36 }
 0x438   : > { %v2642_v2 = vpop.f32.mrf.mxu3 }
 0x439   : > { %v2690_v50 = vadd.f32 %v2642_v2, %v2481_v35  ;;  %3032 = vmatmul.f32.gmra.mxu1 %v5766_v3  ;;  %v5778_v2 = vld [vmem:[#allocation2 + $0x151] sm:$0xff] }
 0x43a   : > { %3575 = vmatmul.f32.gmra.mxu0 %v5634_v48 }
 0x43b   : > { %v5769_v53 = vadd.f32 %v2836_v25, %v2690_v50  ;;  %v2492_v25 = vpop.f32.mrf.mxu2 }
 0x43c   : > { %v2493_v4 = vadd.f32 %v2492_v25, %v5607_v18  ;;  %v5820_v25 = vld [vmem:[#allocation2 + $0xda] sm:$0xff] }
 0x43d   : > { %6343 = vst [vmem:[#allocation61_spill] sm:$0xff] %v5769_v53  ;;  %3372 = vmatmul.f32.gmra.mxu3 %v3289_v27  ;;  %v2848_v27 = vpop.f32.mrf.mxu0 }
 0x43e   : > { %v5775_v34 = vpop.f32.mrf.mxu1  ;;  %3190 = vmatmul.f32.gmra.mxu2 %v5784_v8 }
 0x43f   : > { %6344 = vst [vmem:[#allocation62_spill] sm:$0xff] %v5775_v34 }
 0x440   : > { %v2645_v35 = vpop.f32.mrf.mxu3 }
 0x441   : > { %v2691_v36 = vadd.f32 %v2645_v35, %v2484_v45  ;;  %3035 = vmatmul.f32.gmra.mxu1 %v5778_v2  ;;  %v5790_v45 = vld [vmem:[#allocation2 + $0x159] sm:$0xff] }
 0x442   : > { %3578 = vmatmul.f32.gmra.mxu0 %v5644_v33  ;;  %v5796_v33 = vld [vmem:[#allocation2 + $0xc2] sm:$0xff] }
 0x443   : > { %v5781_v50 = vadd.f32 %v2839_v43, %v2691_v36  ;;  %v2495_v43 = vpop.f32.mrf.mxu2  ;;  %v3701_v36 = vld [vmem:[#allocation8 + $0x400] sm:$0xff] }
 0x444   : > { %3732 = vmatpush.msra.mxu1 %v3701_v36  ;;  %v3292_v36 = vld [vmem:[#allocation2 + $0xc0] sm:$0xff]  ;;  %v2496_v18 = vadd.f32 %v2495_v43, %v5620_v57 }
 0x445   : > { %6345 = vst [vmem:[#allocation63_spill] sm:$0xff] %v5781_v50  ;;  %3375 = vmatmul.f32.gmra.mxu3 %v3290_v10 }
 0x446   : > { %v5787_v48 = vpop.f32.mrf.mxu1  ;;  %3193 = vmatmul.f32.gmra.mxu2 %v5796_v33 }
 0x447   : > { %6346 = vst [vmem:[#allocation64_spill] sm:$0xff] %v5787_v48  ;;  %v2851_v48 = vpop.f32.mrf.mxu0 }
 0x448   : > { %v2648_v53 = vpop.f32.mrf.mxu3 }
 0x449   : > { %v2692_v35 = vadd.f32 %v2648_v53, %v2487_v61  ;;  %3038 = vmatmul.f32.gmra.mxu1 %v5790_v45  ;;  %v5802_v61 = vld [vmem:[#allocation2 + $0x169] sm:$0xff] }
 0x44a   : > { %3581 = vmatmul.f32.gmra.mxu0 %v5657_v60 }
 0x44b   : > { %v5793_v10 = vadd.f32 %v2842_v39, %v2692_v35  ;;  %v2498_v39 = vpop.f32.mrf.mxu2 }
 0x44d   : > { %6347 = vst [vmem:[#allocation65_spill] sm:$0xff] %v5793_v10  ;;  %3378 = vmatmul.f32.gmra.mxu3 %v3291_v59 }
 0x44e   : > { %v5799_v50 = vpop.f32.mrf.mxu1  ;;  %3196 = vmatmul.f32.gmra.mxu2 %v5808_v21 }
 0x44f   : > { %v2854_v10 = vpop.f32.mrf.mxu0 }
 0x450   : > { %v2651_v53 = vpop.f32.mrf.mxu3 }
 0x451   : > { %v2693_v34 = vadd.f32 %v2651_v53, %v2490_v37  ;;  %3041 = vmatmul.f32.gmra.mxu1 %v5802_v61  ;;  %v5814_v37 = vld [vmem:[#allocation2 + $0x171] sm:$0xff] }
 0x452   : > { %3584 = vmatmul.f32.gmra.mxu0 %v5670_v56 }
 0x453   : > { %v5805_v35 = vadd.f32 %v2845_v44, %v2693_v34  ;;  %v2501_v34 = vpop.f32.mrf.mxu2 }
 0x455   : > { %6348 = vst [vmem:[#allocation66_spill] sm:$0xff] %v5805_v35  ;;  %3381 = vmatmul.f32.gmra.mxu3 %v3292_v36  ;;  %v3293_v36 = vld [vmem:[#allocation2 + $0xc8] sm:$0xff] }
 0x456   : > { %v5811_v60 = vpop.f32.mrf.mxu1  ;;  %3199 = vmatmul.f32.gmra.mxu2 %v5820_v25  ;;  %v5828_v35 = vld [vmem:[#allocation2 + $0x181] sm:$0xff] }
 0x458   : > { %v2654_v59 = vpop.f32.mrf.mxu3 }
 0x459   : > { %v2694_v53 = vadd.f32 %v2654_v59, %v2493_v4  ;;  %3044 = vmatmul.f32.gmra.mxu1 %v5814_v37  ;;  %v3054_v4 = vadd.f32 %v5654_v41, %v5481_v14  ;;  %v3055_v41 = vadd.f32 %v5667_v42, %v5492_v6  ;;  %v3056_v42 = vadd.f32 %v5679_v16, %v5503_v63 }
 0x45a   : > { %3587 = vmatmul.f32.gmra.mxu0 %v5682_v40  ;;  %v2499_v40 = vadd.f32 %v2498_v39, %v5632_v28  ;;  %v3295_v39 = vld [vmem:[#allocation2 + $0xe0] sm:$0xff]  ;;  %v3057_v63 = vadd.f32 %v5691_v49, %v5514_v15  ;;  %v3058_v15 = vadd.f32 %v5703_v31, %v5525_v7  ;;  %v3059_v7 = vadd.f32 %v5715_v46, %v5536_v19 }
 0x45b   : > { %v5817_v44 = vadd.f32 %v2848_v27, %v2694_v53  ;;  %v3152_v53 = vpop.f32.mrf.mxu2  ;;  %v3060_v19 = vadd.f32 %v5727_v26, %v5547_v12  ;;  %v3061_v12 = vadd.f32 %v5739_v38, %v5558_v30 }
 0x45c   : > { %v3248_v57 = vadd.f32 %v3152_v53, %v3054_v4  ;;  %v5848_v53 = vld [vmem:[#allocation2 + $0xf2] sm:$0xff] }
 0x45d   : > { %6349 = vst [vmem:[#allocation67_spill] sm:$0xff] %v5817_v44  ;;  %3384 = vmatmul.f32.gmra.mxu3 %v3293_v36  ;;  %v2857_v36 = vpop.f32.mrf.mxu0  ;;  %v3294_v44 = vld [vmem:[#allocation2 + $0xd8] sm:$0xff] }
 0x45e   : > { %v5823_v56 = vpop.f32.mrf.mxu1 }
 0x45f   : > { %6350 = vst [vmem:[#allocation68_spill] sm:$0xff] %v5823_v56  ;;  %v5834_v56 = vld [vmem:[#allocation2 + $0xe2] sm:$0xff] }
 0x460   : > { %v2657_v59 = vpop.f32.mrf.mxu3  ;;  %3202 = vmatmul.f32.gmra.mxu2 %v5834_v56 }
 0x461   : > { %v2695_v27 = vadd.f32 %v2657_v59, %v2496_v18  ;;  %3047 = vmatmul.f32.gmra.mxu1 %v5828_v35  ;;  %v5842_v59 = vld [vmem:[#allocation2 + $0x189] sm:$0xff] }
 0x462   : > { %3590 = vmatmul.f32.gmra.mxu0 %v5694_v1  ;;  %v2502_v1 = vadd.f32 %v2501_v34, %v5642_v5  ;;  %v3296_v5 = vld [vmem:[#allocation2 + $0xf0] sm:$0xff]  ;;  %v5859_v34 = vld [vmem:[#allocation2 + $0xfa] sm:$0xff] }
 0x463   : > { %v5831_v43 = vadd.f32 %v2851_v48, %v2695_v27 }
 0x465   : > { %3387 = vmatmul.f32.gmra.mxu3 %v3294_v44  ;;  %v3155_v44 = vpop.f32.mrf.mxu2  ;;  %v3540_v27 = vpop.f32.mrf.mxu0 }
 0x466   : > { %v5837_v14 = vpop.f32.mrf.mxu1  ;;  %v3249_v4 = vadd.f32 %v3155_v44, %v3055_v41 }
 0x468   : > { %v2660_v18 = vpop.f32.mrf.mxu3  ;;  %3205 = vmatmul.f32.gmra.mxu2 %v5848_v53 }
 0x469   : > { %v2696_v48 = vadd.f32 %v2660_v18, %v2499_v40  ;;  %3050 = vmatmul.f32.gmra.mxu1 %v5842_v59 }
 0x46a   : > { %3593 = vmatmul.f32.gmra.mxu0 %v5706_v11 }
 0x46b   : > { %v5845_v28 = vadd.f32 %v2854_v10, %v2696_v48 }
 0x46d   : > { %3390 = vmatmul.f32.gmra.mxu3 %v3295_v39  ;;  %v3158_v10 = vpop.f32.mrf.mxu2  ;;  %v3543_v11 = vpop.f32.mrf.mxu0 }
 0x46e   : > { %v5851_v6 = vpop.f32.mrf.mxu1  ;;  %v3250_v18 = vadd.f32 %v3158_v10, %v3056_v42  ;;  %v3297_v42 = vld [vmem:[#allocation2 + $0xf8] sm:$0xff] }
 0x470   : > { %v2663_v40 = vpop.f32.mrf.mxu3  ;;  %3208 = vmatmul.f32.gmra.mxu2 %v5859_v34 }
 0x471   : > { %v2697_v41 = vadd.f32 %v2663_v40, %v2502_v1  ;;  %3733 = vmatmul.f32.vlgmr.msra.gmra.mxu1 %v5651_v29  ;;  %v5870_v40 = vld [vmem:[#allocation2 + $0x10a] sm:$0xff] }
 0x472   : > { %3596 = vmatmul.f32.gmra.mxu0 %v5718_v9 }
 0x473   : > { %v5857_v48 = vadd.f32 %v2857_v36, %v2697_v41 }
 0x475   : > { %3393 = vmatmul.f32.gmra.mxu3 %v3296_v5  ;;  %v3161_v36 = vpop.f32.mrf.mxu2  ;;  %v3298_v5 = vld [vmem:[#allocation2 + $0x108] sm:$0xff] }
 0x476   : > { %v5862_v44 = vpop.f32.mrf.mxu1  ;;  %v3251_v39 = vadd.f32 %v3161_v36, %v3057_v63  ;;  %v5881_v63 = vld [vmem:[#allocation2 + $0x112] sm:$0xff] }
 0x477   : > { %v3299_v36 = vld [vmem:[#allocation2 + $0x110] sm:$0xff] }
 0x478   : > { %v3346_v16 = vpop.f32.mrf.mxu3  ;;  %3211 = vmatmul.f32.gmra.mxu2 %v5870_v40 }
 0x479   : > { %v3442_v29 = vadd.f32 %v3346_v16, %v3248_v57  ;;  %3736 = vmatmul.f32.gmra.mxu1 %v5664_v51  ;;  %v3546_v57 = vpop.f32.mrf.mxu0 }
 0x47a   : > { %3599 = vmatmul.f32.gmra.mxu0 %v5730_v17 }
 0x47b   : > { %v5868_v1 = vadd.f32 %v3540_v27, %v3442_v29 }
 0x47d   : > { %3396 = vmatmul.f32.gmra.mxu3 %v3297_v42  ;;  %v3164_v27 = vpop.f32.mrf.mxu2  ;;  %v5892_v42 = vld [vmem:[#allocation2 + $0x122] sm:$0xff] }
 0x47e   : > { %v5873_v9 = vpop.f32.mrf.mxu1  ;;  %v3252_v41 = vadd.f32 %v3164_v27, %v3058_v15  ;;  %v5903_v27 = vld [vmem:[#allocation2 + $0x12a] sm:$0xff] }
 0x480   : > { %v3349_v49 = vpop.f32.mrf.mxu3  ;;  %3214 = vmatmul.f32.gmra.mxu2 %v5881_v63 }
 0x481   : > { %v3443_v51 = vadd.f32 %v3349_v49, %v3249_v4  ;;  %3739 = vmatmul.f32.gmra.mxu1 %v5676_v52 }
 0x482   : > { %3602 = vmatmul.f32.gmra.mxu0 %v5742_v32 }
 0x483   : > { %v5879_v10 = vadd.f32 %v3543_v11, %v3443_v51  ;;  %v3549_v11 = vpop.f32.mrf.mxu0  ;;  %v3300_v51 = vld [vmem:[#allocation2 + $0x120] sm:$0xff] }
 0x485   : > { %3399 = vmatmul.f32.gmra.mxu3 %v3298_v5  ;;  %v3167_v52 = vpop.f32.mrf.mxu2 }
 0x486   : > { %v5884_v17 = vpop.f32.mrf.mxu1  ;;  %v3253_v16 = vadd.f32 %v3167_v52, %v3059_v7 }
 0x488   : > { %v3352_v31 = vpop.f32.mrf.mxu3  ;;  %3217 = vmatmul.f32.gmra.mxu2 %v5892_v42 }
 0x489   : > { %v3444_v4 = vadd.f32 %v3352_v31, %v3250_v18  ;;  %3742 = vmatmul.f32.gmra.mxu1 %v5688_v13  ;;  %v3301_v31 = vld [vmem:[#allocation2 + $0x128] sm:$0xff] }
 0x48a   : > { %3605 = vmatmul.f32.gmra.mxu0 %v5754_v55 }
 0x48b   : > { %v5890_v29 = vadd.f32 %v3546_v57, %v3444_v4  ;;  %v3552_v57 = vpop.f32.mrf.mxu0  ;;  %v5914_v4 = vld [vmem:[#allocation2 + $0x13a] sm:$0xff] }
 0x48d   : > { %3402 = vmatmul.f32.gmra.mxu3 %v3299_v36  ;;  %v3170_v18 = vpop.f32.mrf.mxu2 }
 0x48e   : > { %v5895_v32 = vpop.f32.mrf.mxu1  ;;  %v3254_v15 = vadd.f32 %v3170_v18, %v3060_v19 }
 0x490   : > { %v3355_v46 = vpop.f32.mrf.mxu3  ;;  %3220 = vmatmul.f32.gmra.mxu2 %v5903_v27 }
 0x491   : > { %v3445_v13 = vadd.f32 %v3355_v46, %v3251_v39  ;;  %3745 = vmatmul.f32.gmra.mxu1 %v5700_v24 }
 0x492   : > { %3608 = vmatmul.f32.gmra.mxu0 %v5766_v3 }
 0x493   : > { %v5901_v49 = vadd.f32 %v3549_v11, %v3445_v13  ;;  %v3555_v3 = vpop.f32.mrf.mxu0  ;;  %v5923_v11 = vld [vmem:[#allocation2 + $0x142] sm:$0xff]  ;;  %v5932_v13 = vld [vmem:[#allocation2 + $0x152] sm:$0xff] }
 0x495   : > { %3405 = vmatmul.f32.gmra.mxu3 %v3300_v51  ;;  %v3173_v39 = vpop.f32.mrf.mxu2 }
 0x496   : > { %v5906_v55 = vpop.f32.mrf.mxu1  ;;  %v3255_v5 = vadd.f32 %v3173_v39, %v3061_v12  ;;  %v5941_v12 = vld [vmem:[#allocation2 + $0x15a] sm:$0xff]  ;;  %v3306_v39 = vld [vmem:[#allocation2 + $0x168] sm:$0xff] }
 0x498   : > { %v3358_v26 = vpop.f32.mrf.mxu3  ;;  %3223 = vmatmul.f32.gmra.mxu2 %v5914_v4 }
 0x499   : > { %v3446_v24 = vadd.f32 %v3358_v26, %v3252_v41  ;;  %3748 = vmatmul.f32.gmra.mxu1 %v5712_v54  ;;  %v3302_v41 = vld [vmem:[#allocation2 + $0x138] sm:$0xff] }
 0x49a   : > { %3611 = vmatmul.f32.gmra.mxu0 %v5778_v2 }
 0x49b   : > { %v5912_v7 = vadd.f32 %v3552_v57, %v3446_v24  ;;  %v3558_v2 = vpop.f32.mrf.mxu0  ;;  %v5948_v24 = vld [vmem:[#allocation2 + $0x16a] sm:$0xff] }
 0x49d   : > { %3408 = vmatmul.f32.gmra.mxu3 %v3301_v31  ;;  %v3504_v31 = vld [vmem:[#allocation2 + $0x199] sm:$0xff] }
 0x49e   : > { %v5917_v52 = vpop.f32.mrf.mxu1 }
 0x4a0   : > { %v3361_v30 = vpop.f32.mrf.mxu3  ;;  %3226 = vmatmul.f32.gmra.mxu2 %v5923_v11 }
 0x4a1   : > { %v3447_v38 = vadd.f32 %v3361_v30, %v3253_v16  ;;  %3751 = vmatmul.f32.gmra.mxu1 %v5724_v47  ;;  %v3303_v47 = vld [vmem:[#allocation2 + $0x140] sm:$0xff]  ;;  %v5968_v30 = vld [vmem:[#allocation2 + $0x18a] sm:$0xff] }
 0x4a2   : > { %3614 = vmatmul.f32.gmra.mxu0 %v5790_v45 }
 0x4a3   : > { %v5921_v54 = vadd.f32 %v3555_v3, %v3447_v38  ;;  %v3561_v51 = vpop.f32.mrf.mxu0 }
 0x4a5   : > { %3411 = vmatmul.f32.gmra.mxu3 %v3302_v41 }
 0x4a6   : > { %v5926_v36 = vpop.f32.mrf.mxu1 }
 0x4a8   : > { %v3364_v19 = vpop.f32.mrf.mxu3  ;;  %3229 = vmatmul.f32.gmra.mxu2 %v5932_v13 }
 0x4a9   : > { %v3448_v46 = vadd.f32 %v3364_v19, %v3254_v15  ;;  %3754 = vmatmul.f32.gmra.mxu1 %v5736_v58  ;;  %v3304_v58 = vld [vmem:[#allocation2 + $0x150] sm:$0xff]  ;;  %v5983_v19 = vld [vmem:[%s6220_s4] ss:$0 sm:$0xff] }
 0x4aa   : > { %3617 = vmatmul.f32.gmra.mxu0 %v5802_v61  ;;  %v3305_v61 = vld [vmem:[#allocation2 + $0x158] sm:$0xff] }
 0x4ab   : > { %v5930_v16 = vadd.f32 %v3558_v2, %v3448_v46 }
 0x4ad   : > { %3414 = vmatmul.f32.gmra.mxu3 %v3303_v47 }
 0x4ae   : > { %v5935_v18 = vpop.f32.mrf.mxu1 }
 0x4b0   : > { %v3367_v45 = vpop.f32.mrf.mxu3  ;;  %3232 = vmatmul.f32.gmra.mxu2 %v5941_v12 }
 0x4b1   : > { %v3449_v57 = vadd.f32 %v3367_v45, %v3255_v5  ;;  %3757 = vmatmul.f32.gmra.mxu1 %v5748_v20 }
 0x4b2   : > { %3620 = vmatmul.f32.gmra.mxu0 %v5814_v37  ;;  %v5955_v37 = vld [vmem:[#allocation2 + $0x172] sm:$0xff] }
 0x4b3   : > { %v5939_v15 = vadd.f32 %v3561_v51, %v3449_v57  ;;  %v3176_v57 = vpop.f32.mrf.mxu2 }
 0x4b5   : > { %3417 = vmatmul.f32.gmra.mxu3 %v3304_v58 }
 0x4b6   : > { %v5944_v26 = vpop.f32.mrf.mxu1 }
 0x4b8   : > { %3235 = vmatmul.f32.gmra.mxu2 %v5948_v24 }
 0x4b9   : > { %3760 = vmatmul.f32.gmra.mxu1 %v5760_v0  ;;  %v3307_v0 = vld [vmem:[#allocation2 + $0x170] sm:$0xff] }
 0x4ba   : > { %3623 = vmatmul.f32.gmra.mxu0 %v5828_v35  ;;  %v5962_v35 = vld [vmem:[#allocation2 + $0x182] sm:$0xff] }
 0x4bd   : > { %3420 = vmatmul.f32.gmra.mxu3 %v3305_v61 }
 0x4be   : > { %v5951_v20 = vpop.f32.mrf.mxu1 }
 0x4c0   : > { %3238 = vmatmul.f32.gmra.mxu2 %v5955_v37 }
 0x4c1   : > { %3763 = vmatmul.f32.gmra.mxu1 %v5772_v23  ;;  %v3505_v23 = vld [vmem:[#allocation2 + $0x1a1] sm:$0xff] }
 0x4c2   : > { %3626 = vmatmul.f32.gmra.mxu0 %v5842_v59  ;;  %v3308_v59 = vld [vmem:[#allocation2 + $0x180] sm:$0xff] }
 0x4c5   : > { %3423 = vmatmul.f32.gmra.mxu3 %v3306_v39 }
 0x4c6   : > { %v5958_v5 = vpop.f32.mrf.mxu1 }
 0x4c8   : > { %3241 = vmatmul.f32.gmra.mxu2 %v5962_v35 }
 0x4c9   : > { %3766 = vmatmul.f32.gmra.mxu1 %v5784_v8  ;;  %v3309_v8 = vld [vmem:[#allocation2 + $0x188] sm:$0xff] }
 0x4ca   : > { %3629 = vmatmul.f32.gmra.mxu0 %v3504_v31 }
 0x4cd   : > { %3426 = vmatmul.f32.gmra.mxu3 %v3307_v0  ;;  %v5998_v0 = vpop.f32.mrf.mxu0 }
 0x4ce   : > { %v5964_v3 = vpop.f32.mrf.mxu1 }
 0x4d0   : > { %3244 = vmatmul.f32.gmra.mxu2 %v5968_v30 }
 0x4d1   : > { %3769 = vmatmul.f32.gmra.mxu1 %v5796_v33  ;;  %v4229_v33 = vld [vmem:[#allocation2] sm:$0xff] }
 0x4d2   : > { %3632 = vmatmul.f32.gmra.mxu0 %v3505_v23  ;;  %v3179_v23 = vpop.f32.mrf.mxu2 }
 0x4d5   : > { %3429 = vmatmul.f32.gmra.mxu3 %v3308_v59 }
 0x4d6   : > { %v5970_v38 = vpop.f32.mrf.mxu1 }
 0x4d9   : > { %3772 = vmatmul.f32.gmra.mxu1 %v5808_v21 }
 0x4dd   : > { %3432 = vmatmul.f32.gmra.mxu3 %v3309_v8 }
 0x4de   : > { %v5974_v41 = vpop.f32.mrf.mxu1 }
 0x4e1   : > { %3775 = vmatmul.f32.gmra.mxu1 %v5820_v25  ;;  %v6351_v25 = vld [vmem:[#allocation15_spill] sm:$0xff] }
 0x4e5   : > { %3435 = vmatmul.f32.gmra.mxu3 %v4229_v33 }
 0x4e6   : > { %v5977_v2 = vpop.f32.mrf.mxu1 }
 0x4e9   : > { %3778 = vmatmul.f32.gmra.mxu1 %v5834_v56 }
 0x4ed   : > { %3438 = vmatmul.f32.gmra.mxu3 %v4229_v33 }
 0x4ee   : > { %v3734_v21 = vpop.f32.mrf.mxu1 }
 0x4ef   : > { %v3830_v46 = vadd.f32 %v3734_v21, %v5868_v1  ;;  %v3370_v1 = vpop.f32.mrf.mxu3 }
 0x4f1   : > { %v3865_v47 = vadd.f32 %v5983_v19, %v3830_v46  ;;  %3781 = vmatmul.f32.gmra.mxu1 %v5848_v53  ;;  %v6352_v53 = vld [vmem:[#allocation18_spill] sm:$0xff] }
 0x4f3   : > { %v3897_v45 = vadd.f32 %v3865_v47, %v6351_v25  ;;  %v6005_v25 = vpop.f32.mrf.mxu0 }
 0x4f5   : > { %v3929_v51 = vmax.f32 %v3897_v45, 0.0 }
 0x4f6   : > { %v3737_v58 = vpop.f32.mrf.mxu1 }
 0x4f7   : > { %3961 = vst [vmem:[%s5991_s15] sm:$0xff] %v3929_v51  ;;  %v3831_v56 = vadd.f32 %v3737_v58, %v5879_v10  ;;  %v6353_v10 = vld [vmem:[#allocation20_spill] sm:$0xff]  ;;  %v3182_v51 = vpop.f32.mrf.mxu2 }
 0x4f9   : > { %v3866_v61 = vadd.f32 %v5983_v19, %v3831_v56  ;;  %3784 = vmatmul.f32.gmra.mxu1 %v5859_v34  ;;  %v3373_v34 = vpop.f32.mrf.mxu3 }
 0x4fb   : > { %v3898_v39 = vadd.f32 %v3866_v61, %v6352_v53 }
 0x4fd   : > { %v3930_v31 = vmax.f32 %v3898_v39, 0.0 }
 0x4fe   : > { %v3740_v59 = vpop.f32.mrf.mxu1 }
 0x4ff   : > { %3962 = vst [vmem:[%s5991_s15 + $0x8] sm:$0xff] %v3930_v31  ;;  %v3832_v8 = vadd.f32 %v3740_v59, %v5890_v29  ;;  %v6354_v29 = vld [vmem:[#allocation22_spill] sm:$0xff]  ;;  %v6014_v31 = vpop.f32.mrf.mxu0 }
 0x501   : > { %v3867_v33 = vadd.f32 %v5983_v19, %v3832_v8  ;;  %3787 = vmatmul.f32.gmra.mxu1 %v5870_v40  ;;  %v3376_v40 = vpop.f32.mrf.mxu3  ;;  %v6355_v8 = vld [vmem:[#allocation24_spill] sm:$0xff] }
 0x503   : > { %v3899_v21 = vadd.f32 %v3867_v33, %v6353_v10 }
 0x505   : > { %v3931_v46 = vmax.f32 %v3899_v21, 0.0 }
 0x506   : > { %v3743_v47 = vpop.f32.mrf.mxu1 }
 0x507   : > { %3963 = vst [vmem:[%s5991_s15 + $0x10] sm:$0xff] %v3931_v46  ;;  %v3833_v45 = vadd.f32 %v3743_v47, %v5901_v49  ;;  %v3185_v49 = vpop.f32.mrf.mxu2 }
 0x509   : > { %v3868_v58 = vadd.f32 %v5983_v19, %v3833_v45  ;;  %3790 = vmatmul.f32.gmra.mxu1 %v5881_v63  ;;  %v3379_v46 = vpop.f32.mrf.mxu3  ;;  %v6356_v45 = vld [vmem:[#allocation26_spill] sm:$0xff] }
 0x50b   : > { %v3900_v56 = vadd.f32 %v3868_v58, %v6354_v29 }
 0x50d   : > { %v3932_v61 = vmax.f32 %v3900_v56, 0.0 }
 0x50e   : > { %v3746_v53 = vpop.f32.mrf.mxu1 }
 0x50f   : > { %3964 = vst [vmem:[%s5991_s15 + $0x18] sm:$0xff] %v3932_v61  ;;  %v3834_v39 = vadd.f32 %v3746_v53, %v5912_v7  ;;  %v6023_v7 = vpop.f32.mrf.mxu0  ;;  %v6026_v29 = vpop.f32.mrf.mxu2 }
 0x511   : > { %v3869_v59 = vadd.f32 %v5983_v19, %v3834_v39  ;;  %3793 = vmatmul.f32.gmra.mxu1 %v5892_v42  ;;  %v6357_v39 = vld [vmem:[#allocation28_spill] sm:$0xff] }
 0x513   : > { %v3901_v33 = vadd.f32 %v3869_v59, %v6355_v8 }
 0x515   : > { %v3933_v10 = vmax.f32 %v3901_v33, 0.0 }
 0x516   : > { %v3749_v63 = vpop.f32.mrf.mxu1 }
 0x517   : > { %3965 = vst [vmem:[%s5991_s15 + $0x20] sm:$0xff] %v3933_v10  ;;  %v3835_v21 = vadd.f32 %v3749_v63, %v5921_v54  ;;  %v6032_v54 = vpop.f32.mrf.mxu3  ;;  %v6037_v33 = vpop.f32.mrf.mxu0 }
 0x518   : > { %v6039_v63 = vpop.f32.mrf.mxu2 }
 0x519   : > { %v3870_v47 = vadd.f32 %v5983_v19, %v3835_v21  ;;  %3796 = vmatmul.f32.gmra.mxu1 %v5903_v27  ;;  %v3062_v27 = vadd.f32 %v5751_v62, %v5571_v22  ;;  %v6359_v22 = vld [vmem:[#allocation60_spill] sm:$0xff] }
 0x51b   : > { %v3902_v58 = vadd.f32 %v3870_v47, %v6356_v45  ;;  %v3256_v8 = vadd.f32 %v3176_v57, %v3062_v27  ;;  %v6358_v45 = vld [vmem:[#allocation46_spill] sm:$0xff] }
 0x51c   : > { %v3063_v62 = vadd.f32 %v6359_v22, %v6358_v45 }
 0x51d   : > { %v3934_v42 = vmax.f32 %v3902_v58, 0.0  ;;  %v3450_v47 = vadd.f32 %v3370_v1, %v3256_v8  ;;  %v6360_v58 = vld [vmem:[#allocation30_spill] sm:$0xff]  ;;  %v6361_v8 = vld [vmem:[#allocation47_spill] sm:$0xff] }
 0x51e   : > { %v3752_v56 = vpop.f32.mrf.mxu1 }
 0x51f   : > { %3966 = vst [vmem:[%s5991_s15 + $0x28] sm:$0xff] %v3934_v42  ;;  %v3836_v61 = vadd.f32 %v3752_v56, %v5930_v16  ;;  %v3385_v42 = vpop.f32.mrf.mxu3  ;;  %v3257_v56 = vadd.f32 %v3179_v23, %v3063_v62 }
 0x520   : > { %v3194_v1 = vpop.f32.mrf.mxu2 }
 0x521   : > { %v3871_v53 = vadd.f32 %v5983_v19, %v3836_v61  ;;  %3799 = vmatmul.f32.gmra.mxu1 %v5914_v4 }
 0x523   : > { %v3903_v59 = vadd.f32 %v3871_v53, %v6357_v39  ;;  %v3644_v53 = vadd.f32 %v5998_v0, %v3450_v47  ;;  %v6049_v39 = vpop.f32.mrf.mxu0 }
 0x525   : > { %v3935_v10 = vmax.f32 %v3903_v59, 0.0  ;;  %v3451_v59 = vadd.f32 %v3373_v34, %v3257_v56  ;;  %v6364_v56 = vld [vmem:[#allocation50_spill] sm:$0xff] }
 0x526   : > { %v3755_v21 = vpop.f32.mrf.mxu1 }
 0x527   : > { %3967 = vst [vmem:[%s5991_s15 + $0x30] sm:$0xff] %v3935_v10  ;;  %v3837_v16 = vadd.f32 %v3755_v21, %v5939_v15  ;;  %v6362_v10 = vld [vmem:[#allocation62_spill] sm:$0xff]  ;;  %v3645_v0 = vadd.f32 %v6005_v25, %v3451_v59  ;;  %v3388_v47 = vpop.f32.mrf.mxu3 }
 0x528   : > { %v3064_v21 = vadd.f32 %v6362_v10, %v6361_v8 }
 0x529   : > { %v3872_v4 = vadd.f32 %v5983_v19, %v3837_v16  ;;  %3802 = vmatmul.f32.gmra.mxu1 %v5923_v11  ;;  %v6363_v16 = vld [vmem:[#allocation32_spill] sm:$0xff] }
 0x52b   : > { %v3904_v57 = vadd.f32 %v3872_v4, %v6360_v58  ;;  %v3258_v4 = vadd.f32 %v3182_v51, %v3064_v21  ;;  %v3582_v34 = vpop.f32.mrf.mxu0 }
 0x52d   : > { %v3936_v61 = vmax.f32 %v3904_v57, 0.0  ;;  %v3452_v58 = vadd.f32 %v3376_v40, %v3258_v4  ;;  %v6368_v4 = vld [vmem:[#allocation36_spill] sm:$0xff] }
 0x52e   : > { %v3758_v27 = vpop.f32.mrf.mxu1 }
 0x52f   : > { %3968 = vst [vmem:[%s5991_s15 + $0x38] sm:$0xff] %v3936_v61  ;;  %v3838_v15 = vadd.f32 %v3758_v27, %v3644_v53  ;;  %v6365_v61 = vld [vmem:[#allocation64_spill] sm:$0xff]  ;;  %v6366_v27 = vld [vmem:[#allocation34_spill] sm:$0xff]  ;;  %v3646_v25 = vadd.f32 %v6014_v31, %v3452_v58  ;;  %v3391_v40 = vpop.f32.mrf.mxu3 }
 0x530   : > { %v3065_v53 = vadd.f32 %v6365_v61, %v6364_v56  ;;  %v6370_v61 = vld [vmem:[#allocation38_spill] sm:$0xff] }
 0x531   : > { %v3873_v11 = vadd.f32 %v5983_v19, %v3838_v15  ;;  %3805 = vmatmul.f32.gmra.mxu1 %v5932_v13  ;;  %v3197_v13 = vpop.f32.mrf.mxu2 }
 0x532   : > { %v3259_v15 = vadd.f32 %v3185_v49, %v3065_v53 }
 0x533   : > { %v3905_v23 = vadd.f32 %v3873_v11, %v6363_v16 }
 0x534   : > { %v3453_v10 = vadd.f32 %v3379_v46, %v3259_v15 }
 0x535   : > { %v3937_v45 = vmax.f32 %v3905_v23, 0.0  ;;  %v3585_v23 = vpop.f32.mrf.mxu0 }
 0x536   : > { %v3761_v22 = vpop.f32.mrf.mxu1 }
 0x537   : > { %3969 = vst [vmem:[%s5991_s15 + $0x40] sm:$0xff] %v3937_v45  ;;  %v3839_v62 = vadd.f32 %v3761_v22, %v3645_v0  ;;  %v3647_v22 = vadd.f32 %v6023_v7, %v3453_v10  ;;  %v6373_v10 = vld [vmem:[#allocation40_spill] sm:$0xff] }
 0x539   : > { %v3874_v57 = vadd.f32 %v5983_v19, %v3839_v62  ;;  %3808 = vmatmul.f32.gmra.mxu1 %v5941_v12  ;;  %v6367_v12 = vld [vmem:[#allocation51_spill] sm:$0xff]  ;;  %v3200_v49 = vpop.f32.mrf.mxu2 }
 0x53a   : > { %v3066_v16 = vadd.f32 %v5799_v50, %v6367_v12  ;;  %v3394_v50 = vpop.f32.mrf.mxu3 }
 0x53b   : > { %v3906_v51 = vadd.f32 %v3874_v57, %v6366_v27  ;;  %v6369_v57 = vld [vmem:[#allocation52_spill] sm:$0xff] }
 0x53c   : > { %v3260_v0 = vadd.f32 %v6026_v29, %v3066_v16  ;;  %v3067_v56 = vadd.f32 %v5811_v60, %v6369_v57  ;;  %v6372_v60 = vld [vmem:[#allocation68_spill] sm:$0xff] }
 0x53d   : > { %v3938_v11 = vmax.f32 %v3906_v51, 0.0  ;;  %v3588_v27 = vpop.f32.mrf.mxu0 }
 0x53e   : > { %v3764_v59 = vpop.f32.mrf.mxu1  ;;  %v3454_v58 = vadd.f32 %v6032_v54, %v3260_v0  ;;  %v3261_v29 = vadd.f32 %v6039_v63, %v3067_v56 }
 0x53f   : > { %3970 = vst [vmem:[%s5991_s15 + $0x48] sm:$0xff] %v3938_v11  ;;  %v3840_v8 = vadd.f32 %v3764_v59, %v3646_v25  ;;  %v6371_v59 = vld [vmem:[#allocation53_spill] sm:$0xff] }
 0x540   : > { %v3648_v51 = vadd.f32 %v6037_v33, %v3454_v58  ;;  %v3455_v25 = vadd.f32 %v3385_v42, %v3261_v29 }
 0x541   : > { %v3875_v21 = vadd.f32 %v5983_v19, %v3840_v8  ;;  %3811 = vmatmul.f32.gmra.mxu1 %v5948_v24  ;;  %v3203_v15 = vpop.f32.mrf.mxu2  ;;  %v3068_v8 = vadd.f32 %v6372_v60, %v6371_v59  ;;  %v3699_v59 = vld [vmem:[#allocation2 + $0x1a2] sm:$0xff] }
 0x542   : > { %v3397_v63 = vpop.f32.mrf.mxu3  ;;  %v3649_v33 = vadd.f32 %v6049_v39, %v3455_v25 }
 0x543   : > { %v3907_v45 = vadd.f32 %v3875_v21, %v6368_v4  ;;  %v3262_v12 = vadd.f32 %v3194_v1, %v3068_v8 }
 0x545   : > { %v3939_v31 = vmax.f32 %v3907_v45, 0.0  ;;  %v3591_v45 = vpop.f32.mrf.mxu0 }
 0x546   : > { %v3767_v62 = vpop.f32.mrf.mxu1 }
 0x547   : > { %3971 = vst [vmem:[%s5991_s15 + $0x50] sm:$0xff] %v3939_v31  ;;  %v3841_v46 = vadd.f32 %v3767_v62, %v3647_v22  ;;  %v3456_v31 = vadd.f32 %v3388_v47, %v3262_v12 }
 0x549   : > { %v3876_v24 = vadd.f32 %v5983_v19, %v3841_v46  ;;  %3814 = vmatmul.f32.gmra.mxu1 %v5955_v37  ;;  %v3206_v42 = vpop.f32.mrf.mxu2  ;;  %v6375_v46 = vld [vmem:[#allocation42_spill] sm:$0xff]  ;;  %v3650_v57 = vadd.f32 %v3582_v34, %v3456_v31 }
 0x54a   : > { %v3400_v39 = vpop.f32.mrf.mxu3 }
 0x54b   : > { %v3908_v53 = vadd.f32 %v3876_v24, %v6370_v61  ;;  %v3698_v61 = vld [vmem:[#allocation2 + $0x19a] sm:$0xff] }
 0x54d   : > { %v3940_v7 = vmax.f32 %v3908_v53, 0.0  ;;  %v3594_v47 = vpop.f32.mrf.mxu0 }
 0x54e   : > { %v3770_v11 = vpop.f32.mrf.mxu1 }
 0x54f   : > { %3972 = vst [vmem:[%s5991_s15 + $0x58] sm:$0xff] %v3940_v7  ;;  %v3842_v54 = vadd.f32 %v3770_v11, %v3648_v51  ;;  %v6376_v51 = vld [vmem:[#allocation55_spill] sm:$0xff]  ;;  %v6377_v11 = vld [vmem:[#allocation13_spill] sm:$0xff] }
 0x551   : > { %v3877_v37 = vadd.f32 %v5983_v19, %v3842_v54  ;;  %3817 = vmatmul.f32.gmra.mxu1 %v5962_v35  ;;  %v6374_v35 = vld [vmem:[#allocation54_spill] sm:$0xff] }
 0x552   : > { %v3069_v62 = vadd.f32 %v5837_v14, %v6374_v35  ;;  %v3070_v14 = vadd.f32 %v5851_v6, %v6376_v51  ;;  %v3403_v8 = vpop.f32.mrf.mxu3  ;;  %v6379_v6 = vld [vmem:[#allocation14_spill] sm:$0xff] }
 0x553   : > { %v3909_v21 = vadd.f32 %v3877_v37, %v6373_v10 }
 0x554   : > { %v3263_v1 = vadd.f32 %v3197_v13, %v3069_v62  ;;  %v3264_v13 = vadd.f32 %v3200_v49, %v3070_v14  ;;  %v6383_v14 = vld [vmem:[#allocation17_spill] sm:$0xff] }
 0x555   : > { %v3941_v16 = vmax.f32 %v3909_v21, 0.0  ;;  %v6378_v21 = vld [vmem:[#allocation56_spill] sm:$0xff] }
 0x556   : > { %v3773_v4 = vpop.f32.mrf.mxu1  ;;  %v3457_v29 = vadd.f32 %v3391_v40, %v3263_v1  ;;  %v3458_v40 = vadd.f32 %v3394_v50, %v3264_v13  ;;  %v3071_v12 = vadd.f32 %v5862_v44, %v6378_v21  ;;  %v6381_v1 = vld [vmem:[#allocation16_spill] sm:$0xff] }
 0x557   : > { %3973 = vst [vmem:[%s5991_s15 + $0x60] sm:$0xff] %v3941_v16  ;;  %v3843_v0 = vadd.f32 %v3773_v4, %v3649_v33  ;;  %v3597_v16 = vpop.f32.mrf.mxu0 }
 0x558   : > { %v3651_v34 = vadd.f32 %v3585_v23, %v3457_v29  ;;  %v3265_v49 = vadd.f32 %v3203_v15, %v3071_v12  ;;  %v3652_v23 = vadd.f32 %v3588_v27, %v3458_v40 }
 0x559   : > { %v3878_v22 = vadd.f32 %v5983_v19, %v3843_v0  ;;  %3820 = vmatmul.f32.gmra.mxu1 %v5968_v30  ;;  %v3209_v30 = vpop.f32.mrf.mxu2 }
 0x55a   : > { %v3459_v35 = vadd.f32 %v3397_v63, %v3265_v49  ;;  %v3406_v62 = vpop.f32.mrf.mxu3 }
 0x55b   : > { %v3910_v58 = vadd.f32 %v3878_v22, %v6375_v46  ;;  %v6380_v46 = vld [vmem:[#allocation57_spill] sm:$0xff] }
 0x55c   : > { %v3653_v15 = vadd.f32 %v3591_v45, %v3459_v35  ;;  %v6387_v35 = vld [vmem:[#allocation21_spill] sm:$0xff] }
 0x55d   : > { %v3942_v24 = vmax.f32 %v3910_v58, 0.0  ;;  %v3072_v58 = vadd.f32 %v5873_v9, %v6380_v46 }
 0x55e   : > { %v3776_v56 = vpop.f32.mrf.mxu1 }
 0x55f   : > { %3974 = vst [vmem:[%s5991_s15 + $0x68] sm:$0xff] %v3942_v24  ;;  %v3844_v53 = vadd.f32 %v3776_v56, %v3650_v57  ;;  %v3266_v24 = vadd.f32 %v3206_v42, %v3072_v58  ;;  %v3600_v57 = vpop.f32.mrf.mxu0 }
 0x561   : > { %v3879_v7 = vadd.f32 %v5983_v19, %v3844_v53  ;;  %3823 = vmatmul.f32.gmra.mxu1 %v3698_v61  ;;  %v3212_v4 = vpop.f32.mrf.mxu2  ;;  %v3460_v29 = vadd.f32 %v3400_v39, %v3266_v24  ;;  %v6388_v24 = vld [vmem:[#allocation58_spill] sm:$0xff] }
 0x562   : > { %v3409_v9 = vpop.f32.mrf.mxu3 }
 0x563   : > { %v3911_v54 = vadd.f32 %v3879_v7, %v6377_v11  ;;  %v6382_v7 = vld [vmem:[#allocation43_spill] sm:$0xff]  ;;  %v3654_v42 = vadd.f32 %v3594_v47, %v3460_v29 }
 0x564   : > { %v3073_v51 = vadd.f32 %v5884_v17, %v6382_v7 }
 0x565   : > { %v3943_v25 = vmax.f32 %v3911_v54, 0.0 }
 0x566   : > { %v3779_v37 = vpop.f32.mrf.mxu1  ;;  %v3267_v54 = vadd.f32 %v3209_v30, %v3073_v51 }
 0x567   : > { %3975 = vst [vmem:[%s5991_s15 + $0x70] sm:$0xff] %v3943_v25  ;;  %v3845_v60 = vadd.f32 %v3779_v37, %v3651_v34  ;;  %v3603_v34 = vpop.f32.mrf.mxu0 }
 0x569   : > { %v3880_v10 = vadd.f32 %v5983_v19, %v3845_v60  ;;  %3826 = vmatmul.f32.gmra.mxu1 %v3699_v59  ;;  %v3215_v61 = vpop.f32.mrf.mxu2  ;;  %v3461_v59 = vadd.f32 %v3403_v8, %v3267_v54  ;;  %v6384_v60 = vld [vmem:[#allocation44_spill] sm:$0xff] }
 0x56a   : > { %v3074_v40 = vadd.f32 %v5895_v32, %v6384_v60 }
 0x56b   : > { %v3912_v33 = vadd.f32 %v3880_v10, %v6379_v6  ;;  %v6385_v10 = vld [vmem:[#allocation19_spill] sm:$0xff]  ;;  %v3655_v30 = vadd.f32 %v3597_v16, %v3461_v59  ;;  %v3412_v6 = vpop.f32.mrf.mxu3 }
 0x56c   : > { %v3268_v21 = vadd.f32 %v3212_v4, %v3074_v40 }
 0x56d   : > { %v3944_v0 = vmax.f32 %v3912_v33, 0.0 }
 0x56e   : > { %v3782_v31 = vpop.f32.mrf.mxu1  ;;  %v3462_v49 = vadd.f32 %v3406_v62, %v3268_v21  ;;  %v6393_v21 = vld [vmem:[#allocation27_spill] sm:$0xff] }
 0x56f   : > { %3976 = vst [vmem:[%s5991_s15 + $0x78] sm:$0xff] %v3944_v0  ;;  %v3846_v22 = vadd.f32 %v3782_v31, %v3652_v23  ;;  %v3606_v0 = vpop.f32.mrf.mxu0  ;;  %v6386_v31 = vld [vmem:[#allocation45_spill] sm:$0xff] }
 0x570   : > { %v3656_v4 = vadd.f32 %v3600_v57, %v3462_v49 }
 0x571   : > { %v3881_v50 = vadd.f32 %v5983_v19, %v3846_v22  ;;  %v3218_v37 = vpop.f32.mrf.mxu2  ;;  %v3075_v22 = vadd.f32 %v5906_v55, %v6386_v31 }
 0x573   : > { %v3913_v44 = vadd.f32 %v3881_v50, %v6381_v1  ;;  %v3269_v50 = vadd.f32 %v3215_v61, %v3075_v22  ;;  %v3415_v1 = vpop.f32.mrf.mxu3  ;;  %v6394_v22 = vld [vmem:[#allocation63_spill] sm:$0xff] }
 0x575   : > { %v3945_v56 = vmax.f32 %v3913_v44, 0.0  ;;  %v3463_v44 = vadd.f32 %v3409_v9, %v3269_v50  ;;  %v6390_v9 = vld [vmem:[#allocation59_spill] sm:$0xff] }
 0x576   : > { %v3785_v53 = vpop.f32.mrf.mxu1  ;;  %v3077_v54 = vadd.f32 %v5926_v36, %v6390_v9 }
 0x577   : > { %3977 = vst [vmem:[%s5991_s15 + $0x80] sm:$0xff] %v3945_v56  ;;  %v3847_v27 = vadd.f32 %v3785_v53, %v3653_v15  ;;  %v3076_v56 = vadd.f32 %v5917_v52, %v6388_v24  ;;  %v3609_v15 = vpop.f32.mrf.mxu0  ;;  %v6389_v53 = vld [vmem:[#allocation23_spill] sm:$0xff]  ;;  %v3657_v61 = vadd.f32 %v3603_v34, %v3463_v44 }
 0x579   : > { %v3882_v63 = vadd.f32 %v5983_v19, %v3847_v27  ;;  %v3221_v8 = vpop.f32.mrf.mxu2  ;;  %v3270_v29 = vadd.f32 %v3218_v37, %v3076_v56 }
 0x57b   : > { %v3914_v11 = vadd.f32 %v3882_v63, %v6383_v14  ;;  %v3464_v51 = vadd.f32 %v3412_v6, %v3270_v29 }
 0x57d   : > { %v3946_v13 = vmax.f32 %v3914_v11, 0.0  ;;  %v3418_v11 = vpop.f32.mrf.mxu3  ;;  %v3658_v37 = vadd.f32 %v3606_v0, %v3464_v51 }
 0x57e   : > { %v3788_v25 = vpop.f32.mrf.mxu1 }
 0x57f   : > { %3978 = vst [vmem:[%s5991_s15 + $0x88] sm:$0xff] %v3946_v13  ;;  %v3848_v45 = vadd.f32 %v3788_v25, %v3654_v42  ;;  %v6391_v13 = vld [vmem:[#allocation25_spill] sm:$0xff]  ;;  %v3271_v42 = vadd.f32 %v3221_v8, %v3077_v54  ;;  %v3612_v25 = vpop.f32.mrf.mxu0 }
 0x581   : > { %v3883_v39 = vadd.f32 %v5983_v19, %v3848_v45  ;;  %v3224_v55 = vpop.f32.mrf.mxu2  ;;  %v3465_v60 = vadd.f32 %v3415_v1, %v3271_v42 }
 0x583   : > { %v3915_v17 = vadd.f32 %v3883_v39, %v6385_v10  ;;  %v6392_v10 = vld [vmem:[#allocation61_spill] sm:$0xff] }
 0x585   : > { %v3947_v12 = vmax.f32 %v3915_v17, 0.0  ;;  %v3078_v17 = vadd.f32 %v5935_v18, %v6392_v10  ;;  %v3421_v36 = vpop.f32.mrf.mxu3 }
 0x586   : > { %v3791_v33 = vpop.f32.mrf.mxu1 }
 0x587   : > { %3979 = vst [vmem:[%s5991_s15 + $0x90] sm:$0xff] %v3947_v12  ;;  %v3849_v47 = vadd.f32 %v3791_v33, %v3655_v30  ;;  %v3272_v30 = vadd.f32 %v3224_v55, %v3078_v17  ;;  %v3659_v33 = vadd.f32 %v3609_v15, %v3465_v60  ;;  %v3615_v49 = vpop.f32.mrf.mxu0  ;;  %v6396_v15 = vld [vmem:[#allocation65_spill] sm:$0xff]  ;;  %v6401_v17 = vld [vmem:[#allocation35_spill] sm:$0xff] }
 0x589   : > { %v3884_v23 = vadd.f32 %v5983_v19, %v3849_v47  ;;  %v3227_v59 = vpop.f32.mrf.mxu2  ;;  %v3466_v8 = vadd.f32 %v3418_v11, %v3272_v30  ;;  %v6398_v11 = vld [vmem:[#allocation66_spill] sm:$0xff] }
 0x58a   : > { %v3081_v9 = vadd.f32 %v5958_v5, %v6398_v11 }
 0x58b   : > { %v3916_v32 = vadd.f32 %v3884_v23, %v6387_v35  ;;  %v3079_v35 = vadd.f32 %v5944_v26, %v6394_v22 }
 0x58d   : > { %v3948_v46 = vmax.f32 %v3916_v32, 0.0  ;;  %v6395_v32 = vld [vmem:[#allocation29_spill] sm:$0xff]  ;;  %v3273_v50 = vadd.f32 %v3227_v59, %v3079_v35 }
 0x58e   : > { %v3794_v58 = vpop.f32.mrf.mxu1 }
 0x58f   : > { %3980 = vst [vmem:[%s5991_s15 + $0x98] sm:$0xff] %v3948_v46  ;;  %v3850_v16 = vadd.f32 %v3794_v58, %v3656_v4  ;;  %v3660_v4 = vadd.f32 %v3612_v25, %v3466_v8  ;;  %v3424_v58 = vpop.f32.mrf.mxu3  ;;  %v3467_v44 = vadd.f32 %v3421_v36, %v3273_v50  ;;  %v6402_v8 = vld [vmem:[#allocation37_spill] sm:$0xff] }
 0x591   : > { %v3885_v62 = vadd.f32 %v5983_v19, %v3850_v16  ;;  %v3230_v23 = vpop.f32.mrf.mxu2 }
 0x593   : > { %v3917_v27 = vadd.f32 %v3885_v62, %v6389_v53  ;;  %v3618_v62 = vpop.f32.mrf.mxu0  ;;  %v3080_v53 = vadd.f32 %v5951_v20, %v6396_v15 }
 0x595   : > { %v3949_v63 = vmax.f32 %v3917_v27, 0.0  ;;  %v6397_v27 = vld [vmem:[#allocation31_spill] sm:$0xff]  ;;  %v3274_v55 = vadd.f32 %v3230_v23, %v3080_v53  ;;  %v3083_v23 = vadd.f32 %v5970_v38, %v5831_v43 }
 0x596   : > { %v3797_v7 = vpop.f32.mrf.mxu1 }
 0x597   : > { %3981 = vst [vmem:[%s5991_s15 + $0xa0] sm:$0xff] %v3949_v63  ;;  %v3851_v57 = vadd.f32 %v3797_v7, %v3657_v61  ;;  %v3661_v63 = vadd.f32 %v3615_v49, %v3467_v44  ;;  %v3468_v51 = vadd.f32 %v3424_v58, %v3274_v55  ;;  %v6403_v44 = vld [vmem:[#allocation39_spill] sm:$0xff] }
 0x599   : > { %v3886_v14 = vadd.f32 %v5983_v19, %v3851_v57  ;;  %v3233_v56 = vpop.f32.mrf.mxu2  ;;  %v3427_v57 = vpop.f32.mrf.mxu3 }
 0x59a   : > { %v3275_v42 = vadd.f32 %v3233_v56, %v3081_v9 }
 0x59b   : > { %v3918_v52 = vadd.f32 %v3886_v14, %v6391_v13  ;;  %v3621_v54 = vpop.f32.mrf.mxu0  ;;  %v6399_v13 = vld [vmem:[#allocation33_spill] sm:$0xff] }
 0x59d   : > { %v3950_v45 = vmax.f32 %v3918_v52, 0.0 }
 0x59e   : > { %v3800_v39 = vpop.f32.mrf.mxu1 }
 0x59f   : > { %3982 = vst [vmem:[%s5991_s15 + $0xa8] sm:$0xff] %v3950_v45  ;;  %v3852_v34 = vadd.f32 %v3800_v39, %v3658_v37  ;;  %v3662_v45 = vadd.f32 %v3618_v62, %v3468_v51  ;;  %v3469_v39 = vadd.f32 %v3427_v57, %v3275_v42 }
 0x5a1   : > { %v3887_v40 = vadd.f32 %v5983_v19, %v3852_v34  ;;  %v3236_v20 = vpop.f32.mrf.mxu2  ;;  %v3430_v60 = vpop.f32.mrf.mxu3  ;;  %v3663_v30 = vadd.f32 %v3621_v54, %v3469_v39 }
 0x5a3   : > { %v3919_v12 = vadd.f32 %v3887_v40, %v6393_v21  ;;  %v6400_v40 = vld [vmem:[#allocation67_spill] sm:$0xff]  ;;  %v3624_v21 = vpop.f32.mrf.mxu0 }
 0x5a4   : > { %v3082_v10 = vadd.f32 %v5964_v3, %v6400_v40 }
 0x5a5   : > { %v3951_v6 = vmax.f32 %v3919_v12, 0.0 }
 0x5a6   : > { %v3803_v47 = vpop.f32.mrf.mxu1  ;;  %v3276_v12 = vadd.f32 %v3236_v20, %v3082_v10 }
 0x5a7   : > { %3983 = vst [vmem:[%s5991_s15 + $0xb0] sm:$0xff] %v3951_v6  ;;  %v3853_v0 = vadd.f32 %v3803_v47, %v3659_v33 }
 0x5a8   : > { %v3470_v49 = vadd.f32 %v3430_v60, %v3276_v12 }
 0x5a9   : > { %v3888_v31 = vadd.f32 %v5983_v19, %v3853_v0  ;;  %v3239_v6 = vpop.f32.mrf.mxu2  ;;  %v3433_v3 = vpop.f32.mrf.mxu3 }
 0x5aa   : > { %v3277_v22 = vadd.f32 %v3239_v6, %v3083_v23 }
 0x5ab   : > { %v3920_v18 = vadd.f32 %v3888_v31, %v6395_v32  ;;  %v3664_v32 = vadd.f32 %v3624_v21, %v3470_v49 }
 0x5ac   : > { %v3471_v58 = vadd.f32 %v3433_v3, %v3277_v22 }
 0x5ad   : > { %v3952_v46 = vmax.f32 %v3920_v18, 0.0 }
 0x5ae   : > { %v3806_v16 = vpop.f32.mrf.mxu1 }
 0x5af   : > { %3984 = vst [vmem:[%s5991_s15 + $0xb8] sm:$0xff] %v3952_v46  ;;  %v3854_v1 = vadd.f32 %v3806_v16, %v3660_v4  ;;  %v3627_v46 = vpop.f32.mrf.mxu0 }
 0x5b0   : > { %v3665_v56 = vadd.f32 %v3627_v46, %v3471_v58 }
 0x5b1   : > { %v3889_v24 = vadd.f32 %v5983_v19, %v3854_v1  ;;  %v3242_v4 = vpop.f32.mrf.mxu2  ;;  %v3084_v1 = vadd.f32 %v5974_v41, %v5845_v28  ;;  %v3436_v38 = vpop.f32.mrf.mxu3  ;;  %v6404_v28 = vld [vmem:[#allocation41_spill] sm:$0xff] }
 0x5b3   : > { %v3921_v26 = vadd.f32 %v3889_v24, %v6397_v27  ;;  %v3278_v62 = vadd.f32 %v3242_v4, %v3084_v1 }
 0x5b5   : > { %v3953_v29 = vmax.f32 %v3921_v26, 0.0  ;;  %v3472_v26 = vadd.f32 %v3436_v38, %v3278_v62 }
 0x5b6   : > { %v3809_v61 = vpop.f32.mrf.mxu1 }
 0x5b7   : > { %3985 = vst [vmem:[%s5991_s15 + $0xc0] sm:$0xff] %v3953_v29  ;;  %v3855_v7 = vadd.f32 %v3809_v61, %v3661_v63  ;;  %v3630_v27 = vpop.f32.mrf.mxu0  ;;  %v3085_v63 = vadd.f32 %v5977_v2, %v5857_v48 }
 0x5b8   : > { %v3666_v61 = vadd.f32 %v3630_v27, %v3472_v26 }
 0x5b9   : > { %v3890_v14 = vadd.f32 %v5983_v19, %v3855_v7  ;;  %v3245_v29 = vpop.f32.mrf.mxu2  ;;  %v3439_v51 = vpop.f32.mrf.mxu3 }
 0x5ba   : > { %v3279_v7 = vadd.f32 %v3245_v29, %v3085_v63 }
 0x5bb   : > { %v3922_v52 = vadd.f32 %v3890_v14, %v6399_v13 }
 0x5bc   : > { %v3473_v9 = vadd.f32 %v3439_v51, %v3279_v7 }
 0x5bd   : > { %v3954_v25 = vmax.f32 %v3922_v52, 0.0  ;;  %v6405_v52 = vld [vmem:[#allocation48_spill] sm:$0xff] }
 0x5be   : > { %v3812_v37 = vpop.f32.mrf.mxu1 }
 0x5bf   : > { %3986 = vst [vmem:[%s5991_s15 + $0xc8] sm:$0xff] %v3954_v25  ;;  %v3856_v59 = vadd.f32 %v3812_v37, %v3662_v45  ;;  %v3633_v13 = vpop.f32.mrf.mxu0  ;;  %v6406_v37 = vld [vmem:[#allocation49_spill] sm:$0xff] }
 0x5c0   : > { %v3667_v48 = vadd.f32 %v3633_v13, %v3473_v9 }
 0x5c1   : > { %v3891_v34 = vadd.f32 %v5983_v19, %v3856_v59 }
 0x5c3   : > { %v3923_v5 = vadd.f32 %v3891_v34, %v6401_v17 }
 0x5c5   : > { %v3955_v36 = vmax.f32 %v3923_v5, 0.0 }
 0x5c6   : > { %v3815_v33 = vpop.f32.mrf.mxu1 }
 0x5c7   : > { %3987 = vst [vmem:[%s5991_s15 + $0xd0] sm:$0xff] %v3955_v36  ;;  %v3857_v47 = vadd.f32 %v3815_v33, %v3663_v30 }
 0x5c9   : > { %v3892_v0 = vadd.f32 %v5983_v19, %v3857_v47 }
 0x5cb   : > { %v3924_v31 = vadd.f32 %v3892_v0, %v6402_v8 }
 0x5cd   : > { %v3956_v35 = vmax.f32 %v3924_v31, 0.0 }
 0x5ce   : > { %v3818_v18 = vpop.f32.mrf.mxu1 }
 0x5cf   : > { %3988 = vst [vmem:[%s5991_s15 + $0xd8] sm:$0xff] %v3956_v35  ;;  %v3858_v50 = vadd.f32 %v3818_v18, %v3664_v32 }
 0x5d1   : > { %v3893_v16 = vadd.f32 %v5983_v19, %v3858_v50 }
 0x5d3   : > { %v3925_v43 = vadd.f32 %v3893_v16, %v6403_v44 }
 0x5d5   : > { %v3957_v24 = vmax.f32 %v3925_v43, 0.0 }
 0x5d6   : > { %v3821_v15 = vpop.f32.mrf.mxu1 }
 0x5d7   : > { %3989 = vst [vmem:[%s5991_s15 + $0xe0] sm:$0xff] %v3957_v24  ;;  %v3859_v53 = vadd.f32 %v3821_v15, %v3665_v56 }
 0x5d9   : > { %v3894_v55 = vadd.f32 %v5983_v19, %v3859_v53 }
 0x5db   : > { %v3926_v41 = vadd.f32 %v3894_v55, %v6404_v28 }
 0x5dd   : > { %v3958_v57 = vmax.f32 %v3926_v41, 0.0 }
 0x5de   : > { %v3824_v14 = vpop.f32.mrf.mxu1 }
 0x5df   : > { %3990 = vst [vmem:[%s5991_s15 + $0xe8] sm:$0xff] %v3958_v57  ;;  %v3860_v11 = vadd.f32 %v3824_v14, %v3666_v61 }
 0x5e1   : > { %v3895_v54 = vadd.f32 %v5983_v19, %v3860_v11 }
 0x5e3   : > { %v3927_v20 = vadd.f32 %v3895_v54, %v6405_v52 }
 0x5e5   : > { %v3959_v2 = vmax.f32 %v3927_v20, 0.0 }
 0x5e6   : > { %v3827_v42 = vpop.f32.mrf.mxu1 }
 0x5e7   : > { %3991 = vst [vmem:[%s5991_s15 + $0xf0] sm:$0xff] %v3959_v2  ;;  %v3861_v25 = vadd.f32 %v3827_v42, %v3667_v48 }
 0x5e9   : > { %v3896_v45 = vadd.f32 %v5983_v19, %v3861_v25 }
 0x5eb   : > { %v3928_v59 = vadd.f32 %v3896_v45, %v6406_v37 }
 0x5ed   : > { %v3960_v39 = vmax.f32 %v3928_v59, 0.0 }
 0x5ef   : > { %3992 = vst [vmem:[%s5991_s15 + $0xf8] sm:$0xff] %v3960_v39 }
 0x5f0   : > { %4347 = shalt.err (!%p4344_p10)
}
 0x5f1   : > { %s4397_s8 = smov 128   ;;  %s4398_s13 = smov 8  }
 0x5f2   : > { %4163 = dma.vmem_to_hbm [thread:$0]  (%p4501_p3), %s4007_s26, 4096, %s4009_s10, %s3994_s22, %s4397_s8, %s4397_s8, %s4398_s13  }
 0x5f3 PF: > { %s4023_s15 = sand.u32 1, %s4378_s18   ;;  %p6407_p12 = scmp.ge.s32.totalorder %s4390_s21, 2 }
 0x5f4   : > { %s4024_s27 = scalar_lea.sflag [#allocation5], %s4023_s15 }
 0x5f5   : > { %p4177_p13 = pnand %p6407_p12, %p4464_p6 }
 0x5f7   : > { %p4178_p0 = pneg %p4177_p13 }
 0x5f9   : > { %4373 = dma.done.wait (%p4178_p0), %s4024_s27, 4096  }
 0x5fa   : > { %4375 = vsyncadd (%p4178_p0), %s4024_s27, 4294963200  ;;  %p19_p5 = scmp.ge.s32.totalorder %s4491_s14, 4   ;;  %s6408_s18 = smov %s4382_s19 }
 0x5fb   : > { %s6409_s19 = smov %s4386_s20  ;;  %s6410_s20 = smov %s4507_s23 }
 0x5fc   : > { %s6411_s21 = smov %s4491_s14  ;;  %21 = sbr.rel (!%p19_p5) target bundleno = 6 (0x6), region = 111 }
 0x601   :  { %4030 = vsyncpa [#allocation4], 1 }
 0x602   :  { %4032 = vsyncpa [#allocation4 + $0x1], 1 }
 0x603   :  { %4033 = vsyncpa [#allocation7], 1 }
 0x604   :  { %4034 = vsyncpa [#allocation5], 1 }
 0x605   :  { %4036 = vsyncpa [#allocation5 + $0x1], 1 }

</bundles_post_ra>
